<compile_context>
chip_gen: v7x
topology: tpu7x:2x2x1
jax: 0.10.0
libtpu: 0.0.40
codegen_flags: <defaults>
</compile_context>

<pallas_src>
import jax
import jax.numpy as jnp
import numpy as np
from jax.experimental import pallas as pl
from jax.experimental.pallas import tpu as pltpu

_O_PAD = 128                     # lane-dense output slab width


# --------------------------- hardware queries --------------------------------
def _num_tensorcores() -> int:
    """2 on v7x (two TensorCores per chip), else 1 (v5e / v6e are single-TC)."""
    try:
        dev = jax.devices()[0]
        if dev.platform != "tpu":
            return 1
        kind = str(getattr(dev, "device_kind", "")).lower()
        if "v7" in kind or "7x" in kind:
            return 2
    except Exception:
        pass
    return 1


def _vmem_budget_bytes() -> int:
    """Conservative per-kernel VMEM budget (headroom under the scoped limit)."""
    try:
        cap = int(getattr(pltpu.get_tpu_info(), "vmem_capacity_bytes", 0))
        if cap > 0:
            # 24 MiB on v7x (64 MiB phys), 48 MiB on v5e/v6e (128 MiB phys)
            return max(16 * 1024 * 1024, (cap * 3) // 8)
    except Exception:
        pass
    return 24 * 1024 * 1024


# ------------------------------ kernel bodies --------------------------------
def _project_and_accumulate(tmpl_ref, srch_ref, wbt_ref, bbc_ref, w1_ref,
                            acc_ref):
    """acc (B, H) += ReLU(proj(x))_flat @ W1_block for this step's Cf channels."""
    cf = wbt_ref.shape[0]                   # feature channels in this block
    n_ch = tmpl_ref.shape[1]                # input channels C (= 4)
    wbt = wbt_ref[...]                      # (cf, C)  f32
    bias = bbc_ref[...]                     # (cf, 1)  f32

    def project(x_ref):
        # Per-pixel tokens, shared linear C -> cf + ReLU, computed directly in
        # (cf, B, n) layout so it feeds the batched MXU matmul with no
        # swapaxes / relayout.  C=4 static unroll: pure VPU FMAs, no MXU.
        x = x_ref[...]                      # (B, C, n)  f32
        b_sz, _, ntok = x.shape
        h = jnp.broadcast_to(bias[:, :, None], (cf, b_sz, ntok))
        for c in range(n_ch):
            h = h + wbt[:, c][:, None, None] * x[None, :, c, :]
        return jnp.maximum(h, 0.0).astype(jnp.bfloat16)      # (cf, B, n)

    ft = project(tmpl_ref)                  # (cf, B, Nt)
    fs = project(srch_ref)                  # (cf, B, Ns)
    nt = ft.shape[2]

    # Batched-over-feature bf16 MXU matmuls with f32 accumulation; template and
    # search token halves consumed separately so the flattened-feature order
    # matches `out.reshape(B, -1)` of the reference (no concat materialized).
    pt = jnp.einsum("fbn,fnh->fbh", ft, w1_ref[:, :nt, :],
                    preferred_element_type=jnp.float32)
    ps = jnp.einsum("fbn,fnh->fbh", fs, w1_ref[:, nt:, :],
                    preferred_element_type=jnp.float32)
    acc_ref[...] += pt.sum(axis=0) + ps.sum(axis=0)


def _fused_kernel_single(tmpl_ref, srch_ref, wbt_ref, bbc_ref, w1_ref,
                         b1_ref, w2_ref, b2_ref, o_ref, acc_ref):
    """Single-TensorCore variant: full Cf reduction + whole MLP head in-kernel."""
    k = pl.program_id(0)

    @pl.when(k == 0)
    def _():
        acc_ref[...] = jnp.zeros_like(acc_ref)

    _project_and_accumulate(tmpl_ref, srch_ref, wbt_ref, bbc_ref, w1_ref,
                            acc_ref)

    @pl.when(k == pl.num_programs(0) - 1)
    def _():
        hidden = jnp.maximum(acc_ref[...] + b1_ref[...], 0.0)        # (B, H)
        o_ref[...] = (jnp.dot(hidden.astype(jnp.bfloat16), w2_ref[...],
                              preferred_element_type=jnp.float32)
                      + b2_ref[...])                                 # (B, 128)


def _fused_kernel_split(tmpl_ref, srch_ref, wbt_ref, bbc_ref, w1_ref,
                        o_ref, acc_ref):
    """Multi-TensorCore variant (v7x): each core owns a slice of the Cf/D
    reduction with full 256-wide W1 columns and emits its partial
    pre-activation; b1 / ReLU / W2 / b2 run in the (tiny) XLA epilogue."""
    k = pl.program_id(1)

    @pl.when(k == 0)
    def _():
        acc_ref[...] = jnp.zeros_like(acc_ref)

    _project_and_accumulate(tmpl_ref, srch_ref, wbt_ref, bbc_ref, w1_ref,
                            acc_ref)

    @pl.when(k == pl.num_programs(1) - 1)
    def _():
        o_ref[...] = acc_ref[...][None, :, :]                        # (1, B, H)


# ----------------------------- forward wrapper -------------------------------
def score_pure_rmt_mlp_forward(template, search, params):
    B, C, Ht, Wt = template.shape
    _, _, Hs, Ws = search.shape
    Nt, Ns = Ht * Wt, Hs * Ws
    N = Nt + Ns

    wb = params["wb"].astype(jnp.float32)          # (C, Cf)
    bb = params["bb"].astype(jnp.float32)          # (Cf,)
    w1 = params["w1"].astype(jnp.bfloat16)         # (D, H)  only large stream
    b1 = params["b1"].astype(jnp.float32).reshape(1, -1)
    w2 = params["w2"].astype(jnp.bfloat16)         # (H, O)
    b2 = params["b2"].astype(jnp.float32).reshape(1, -1)

    Cf = wb.shape[1]
    D, H = w1.shape
    O = w2.shape[1]
    assert D == Cf * N, "box-head input must equal flattened backbone features"
    assert O <= _O_PAD

    # layout plumbing only (free reshapes / tiny constants, no data pass):
    tmpl = template.reshape(B, C, Nt).astype(jnp.float32)
    srch = search.reshape(B, C, Ns).astype(jnp.float32)
    wbt = wb.T                                     # (Cf, C)
    bbc = bb.reshape(Cf, 1)
    w1v = w1.reshape(Cf, N, H)                     # free view of (D, H)

    # ------------------------------- tiling ----------------------------------
    NC = _num_tensorcores()
    if Cf % NC != 0:
        NC = 1                                     # fall back to one core
    cf_core = Cf // NC                             # Cf channels owned per core
    budget = _vmem_budget_bytes()

    def vmem_estimate(ct):
        w1_blk = 2 * (ct * N * H * 2)              # double-buffered bf16 W1
        imgs = 2 * (B * C * Nt * 4 + B * C * Ns * 4)
        feats = 2 * ct * B * N * 2                 # bf16 projected features
        inter = 2 * ct * B * H * 4                 # f32 einsum partials
        head = 2 * (H * 4 + H * _O_PAD * 2 + _O_PAD * 4)
        small = 2 * ct * (C + 1) * 4
        acc_out = B * H * 4 + 2 * B * _O_PAD * 4
        return w1_blk + imgs + feats + inter + head + small + acc_out

    cf_tile = None
    for d in range(cf_core, 0, -1):                # largest divisor that fits
        if cf_core % d:
            continue
        if d % 8 and d != Cf:                      # keep wbt/bbc blocks legal
            continue
        if vmem_estimate(d) <= budget:
            cf_tile = d
            break
    if cf_tile is None:
        cf_tile = cf_core
    KF = cf_core // cf_tile
    assert NC * KF * cf_tile == Cf                 # never drop feature channels

    vmem_limit = int(min(budget + 8 * 1024 * 1024, 64 * 1024 * 1024))

    if NC == 1:
        # -------- single-TC (v5e / v6e): finish everything in-kernel ---------
        w2p = jnp.zeros((H, _O_PAD), jnp.bfloat16).at[:, :O].set(w2)
        b2p = jnp.zeros((1, _O_PAD), jnp.float32).at[:, :O].set(b2)
        out = pl.pallas_call(
            _fused_kernel_single,
            out_shape=jax.ShapeDtypeStruct((B, _O_PAD), jnp.float32),
            grid_spec=pltpu.PrefetchScalarGridSpec(
                num_scalar_prefetch=0,
                grid=(KF,),
                in_specs=[
                    pl.BlockSpec((B, C, Nt), lambda k: (0, 0, 0)),
                    pl.BlockSpec((B, C, Ns), lambda k: (0, 0, 0)),
                    pl.BlockSpec((cf_tile, C), lambda k: (k, 0)),
                    pl.BlockSpec((cf_tile, 1), lambda k: (k, 0)),
                    pl.BlockSpec((cf_tile, N, H), lambda k: (k, 0, 0)),
                    pl.BlockSpec((1, H), lambda k: (0, 0)),
                    pl.BlockSpec((H, _O_PAD), lambda k: (0, 0)),
                    pl.BlockSpec((1, _O_PAD), lambda k: (0, 0)),
                ],
                out_specs=pl.BlockSpec((B, _O_PAD), lambda k: (0, 0)),
                scratch_shapes=[pltpu.VMEM((B, H), jnp.float32)],
            ),
            compiler_params=pltpu.CompilerParams(
                dimension_semantics=("arbitrary",),
                vmem_limit_bytes=vmem_limit),
        )(tmpl, srch, wbt, bbc, w1v, b1, w2p, b2p)
        return out[:, :O]

    # -------- v7x (2 TCs): split the Cf/D reduction across the cores ---------
    partials = pl.pallas_call(
        _fused_kernel_split,
        out_shape=jax.ShapeDtypeStruct((NC, B, H), jnp.float32),
        grid_spec=pltpu.PrefetchScalarGridSpec(
            num_scalar_prefetch=0,
            grid=(NC, KF),
            in_specs=[
                pl.BlockSpec((B, C, Nt), lambda j, k: (0, 0, 0)),
                pl.BlockSpec((B, C, Ns), lambda j, k: (0, 0, 0)),
                pl.BlockSpec((cf_tile, C), lambda j, k: (j * KF + k, 0)),
                pl.BlockSpec((cf_tile, 1), lambda j, k: (j * KF + k, 0)),
                pl.BlockSpec((cf_tile, N, H), lambda j, k: (j * KF + k, 0, 0)),
            ],
            out_specs=pl.BlockSpec((1, B, H), lambda j, k: (j, 0, 0)),
            scratch_shapes=[pltpu.VMEM((B, H), jnp.float32)],
        ),
        compiler_params=pltpu.CompilerParams(
            dimension_semantics=("parallel", "arbitrary"),
            vmem_limit_bytes=vmem_limit),
    )(tmpl, srch, wbt, bbc, w1v)

    hidden = jnp.maximum(partials.sum(axis=0) + b1, 0.0)             # (B, H)
    return jnp.dot(hidden.astype(jnp.bfloat16), w2,
                   preferred_element_type=jnp.float32) + b2


# ----------------------------- pure-JAX reference ----------------------------
def _reference_forward(template, search, params):
    B, C, Ht, Wt = template.shape
    _, _, Hs, Ws = search.shape
    x = jnp.concatenate([template.reshape(B, C, Ht * Wt),
                         search.reshape(B, C, Hs * Ws)], axis=2)      # (B, C, N)
    feats = jnp.maximum(
        jnp.einsum("bcn,cf->bfn", x, params["wb"],
                   precision=jax.lax.Precision.HIGHEST)
        + params["bb"][None, :, None], 0.0)                           # (B, Cf, N)
    out = feats.reshape(B, -1)                                        # flatten
    h = jnp.maximum(
        jnp.dot(out.astype(jnp.bfloat16), params["w1"].astype(jnp.bfloat16),
                preferred_element_type=jnp.float32) + params["b1"], 0.0)
    return (jnp.dot(h.astype(jnp.bfloat16), params["w2"].astype(jnp.bfloat16),
                    preferred_element_type=jnp.float32) + params["b2"])


if __name__ == "__main__":
    key = jax.random.PRNGKey(0)
    kt, ks, k0, k1, k2, k3, k4, k5 = jax.random.split(key, 8)

    B, C = 2, 4
    Ht = Wt = 8            # template spatial
    Hs = Ws = 16           # search spatial
    Cf, HID, OUT = 16, 256, 4
    N = Ht * Wt + Hs * Ws  # 320 tokens
    D = N * Cf             # 5120 flattened features

    template = jax.random.normal(kt, (B, C, Ht, Wt), jnp.float32)
    search = jax.random.normal(ks, (B, C, Hs, Ws), jnp.float32)

    params = {
        "wb": jax.random.normal(k0, (C, Cf), jnp.float32) * 0.1,
        "bb": jax.random.normal(k3, (Cf,), jnp.float32) * 0.1,
        # large weights live in bf16 (halves HBM/DMA traffic; MXU-native dtype)
        "w1": (jax.random.normal(k1, (D, HID), jnp.float32) * 0.02
               ).astype(jnp.bfloat16),
        "b1": jax.random.normal(k4, (1, HID), jnp.float32) * 0.02,
        "w2": (jax.random.normal(k2, (HID, OUT), jnp.float32) * 0.02
               ).astype(jnp.bfloat16),
        "b2": jax.random.normal(k5, (1, OUT), jnp.float32) * 0.02,
    }

    fwd = jax.jit(score_pure_rmt_mlp_forward)
    box = fwd(template, search, params)
    jax.block_until_ready(box)

    ref = _reference_forward(template, search, params)
    np.testing.assert_allclose(np.asarray(box), np.asarray(ref),
                               rtol=5e-3, atol=1e-3)
    print("KERNEL_OK")
</pallas_src>

<mosaic_0001>
module attributes {stable_mosaic.version = 11 : i64} {
  func.func @_fused_kernel_single(%arg0: i32, %arg1: memref<2x4x64xf32, #tpu.memory_space<vmem>>, %arg2: memref<2x4x256xf32, #tpu.memory_space<vmem>>, %arg3: memref<16x4xf32, #tpu.memory_space<vmem>>, %arg4: memref<16x1xf32, #tpu.memory_space<vmem>>, %arg5: memref<16x320x256xbf16, #tpu.memory_space<vmem>>, %arg6: memref<1x256xf32, #tpu.memory_space<vmem>>, %arg7: memref<256x128xbf16, #tpu.memory_space<vmem>>, %arg8: memref<1x128xf32, #tpu.memory_space<vmem>>, %arg9: memref<2x128xf32, #tpu.memory_space<vmem>>, %arg10: memref<2x256xf32, #tpu.memory_space<vmem>>) attributes {dimension_semantics = [#tpu.dimension_semantics<arbitrary>], iteration_bounds = array<i64: 1>, scalar_prefetch = 0 : i64, scratch_operands = 1 : i64, tpu.core_type = #tpu.core_type<tc>, window_params = [{pipeline_mode = #tpu.pipeline_mode<synchronous>, transform_indices = @transform_0, window_bounds = array<i64: 2, 4, 64>}, {pipeline_mode = #tpu.pipeline_mode<synchronous>, transform_indices = @transform_1, window_bounds = array<i64: 2, 4, 256>}, {transform_indices = @transform_2, window_bounds = array<i64: 16, 4>}, {transform_indices = @transform_3, window_bounds = array<i64: 16, 1>}, {transform_indices = @transform_4, window_bounds = array<i64: 16, 320, 256>}, {pipeline_mode = #tpu.pipeline_mode<synchronous>, transform_indices = @transform_5, window_bounds = array<i64: 1, 256>}, {pipeline_mode = #tpu.pipeline_mode<synchronous>, transform_indices = @transform_6, window_bounds = array<i64: 256, 128>}, {pipeline_mode = #tpu.pipeline_mode<synchronous>, transform_indices = @transform_7, window_bounds = array<i64: 1, 128>}, {pipeline_mode = #tpu.pipeline_mode<synchronous>, transform_indices = @transform_8, window_bounds = array<i64: 2, 128>}]} {
    %c0_i32 = arith.constant 0 : i32
    %0 = arith.cmpi eq, %arg0, %c0_i32 : i32
    %1 = arith.extui %0 : i1 to i32
    %c0_i32_0 = arith.constant 0 : i32
    %2 = arith.cmpi ne, %1, %c0_i32_0 : i32
    scf.if %2 {
      %cst_26 = arith.constant 0.000000e+00 : f32
      %112 = vector.broadcast %cst_26 : f32 to vector<2x256xf32>
      %c0_27 = arith.constant 0 : index
      %c0_28 = arith.constant 0 : index
      %113 = vector.load %arg10[%c0_27, %c0_28] : memref<2x256xf32, #tpu.memory_space<vmem>>, vector<2x256xf32>
      tpu.vector_store %arg10[%c0_27, %c0_28], %112 {strides = array<i32>} : memref<2x256xf32, #tpu.memory_space<vmem>>, vector<2x256xf32>,
    } else {
    }
    %c0 = arith.constant 0 : index
    %c0_1 = arith.constant 0 : index
    %3 = vector.load %arg3[%c0, %c0_1] : memref<16x4xf32, #tpu.memory_space<vmem>>, vector<16x4xf32>
    %c0_2 = arith.constant 0 : index
    %c0_3 = arith.constant 0 : index
    %4 = vector.load %arg4[%c0_2, %c0_3] : memref<16x1xf32, #tpu.memory_space<vmem>>, vector<16x1xf32>
    %c0_4 = arith.constant 0 : index
    %c0_5 = arith.constant 0 : index
    %c0_6 = arith.constant 0 : index
    %5 = vector.load %arg1[%c0_4, %c0_5, %c0_6] : memref<2x4x64xf32, #tpu.memory_space<vmem>>, vector<2x4x64xf32>
    %6 = vector.shape_cast %4 : vector<16x1xf32> to vector<16x1x1xf32>
    %7 = vector.shape_cast %6 : vector<16x1x1xf32> to vector<16x1x1xf32>
    %8 = vector.broadcast %7 : vector<16x1x1xf32> to vector<16x2x64xf32>
    %9 = vector.extract_strided_slice %3 {offsets = [0, 0], sizes = [16, 1], strides = [1, 1]} : vector<16x4xf32> to vector<16x1xf32>
    %10 = vector.shape_cast %9 : vector<16x1xf32> to vector<16xf32>
    %11 = vector.shape_cast %10 : vector<16xf32> to vector<16x1x1xf32>
    %12 = vector.extract_strided_slice %5 {offsets = [0, 0, 0], sizes = [2, 1, 64], strides = [1, 1, 1]} : vector<2x4x64xf32> to vector<2x1x64xf32>
    %13 = vector.shape_cast %12 : vector<2x1x64xf32> to vector<2x64xf32>
    %14 = vector.shape_cast %13 : vector<2x64xf32> to vector<1x2x64xf32>
    %15 = vector.broadcast %11 : vector<16x1x1xf32> to vector<16x2x64xf32>
    %16 = vector.broadcast %14 : vector<1x2x64xf32> to vector<16x2x64xf32>
    %17 = arith.mulf %15, %16 : vector<16x2x64xf32>
    %18 = arith.addf %8, %17 : vector<16x2x64xf32>
    %19 = vector.extract_strided_slice %3 {offsets = [0, 1], sizes = [16, 1], strides = [1, 1]} : vector<16x4xf32> to vector<16x1xf32>
    %20 = vector.shape_cast %19 : vector<16x1xf32> to vector<16xf32>
    %21 = vector.shape_cast %20 : vector<16xf32> to vector<16x1x1xf32>
    %22 = vector.extract_strided_slice %5 {offsets = [0, 1, 0], sizes = [2, 1, 64], strides = [1, 1, 1]} : vector<2x4x64xf32> to vector<2x1x64xf32>
    %23 = vector.shape_cast %22 : vector<2x1x64xf32> to vector<2x64xf32>
    %24 = vector.shape_cast %23 : vector<2x64xf32> to vector<1x2x64xf32>
    %25 = vector.broadcast %21 : vector<16x1x1xf32> to vector<16x2x64xf32>
    %26 = vector.broadcast %24 : vector<1x2x64xf32> to vector<16x2x64xf32>
    %27 = arith.mulf %25, %26 : vector<16x2x64xf32>
    %28 = arith.addf %18, %27 : vector<16x2x64xf32>
    %29 = vector.extract_strided_slice %3 {offsets = [0, 2], sizes = [16, 1], strides = [1, 1]} : vector<16x4xf32> to vector<16x1xf32>
    %30 = vector.shape_cast %29 : vector<16x1xf32> to vector<16xf32>
    %31 = vector.shape_cast %30 : vector<16xf32> to vector<16x1x1xf32>
    %32 = vector.extract_strided_slice %5 {offsets = [0, 2, 0], sizes = [2, 1, 64], strides = [1, 1, 1]} : vector<2x4x64xf32> to vector<2x1x64xf32>
    %33 = vector.shape_cast %32 : vector<2x1x64xf32> to vector<2x64xf32>
    %34 = vector.shape_cast %33 : vector<2x64xf32> to vector<1x2x64xf32>
    %35 = vector.broadcast %31 : vector<16x1x1xf32> to vector<16x2x64xf32>
    %36 = vector.broadcast %34 : vector<1x2x64xf32> to vector<16x2x64xf32>
    %37 = arith.mulf %35, %36 : vector<16x2x64xf32>
    %38 = arith.addf %28, %37 : vector<16x2x64xf32>
    %39 = vector.extract_strided_slice %3 {offsets = [0, 3], sizes = [16, 1], strides = [1, 1]} : vector<16x4xf32> to vector<16x1xf32>
    %40 = vector.shape_cast %39 : vector<16x1xf32> to vector<16xf32>
    %41 = vector.shape_cast %40 : vector<16xf32> to vector<16x1x1xf32>
    %42 = vector.extract_strided_slice %5 {offsets = [0, 3, 0], sizes = [2, 1, 64], strides = [1, 1, 1]} : vector<2x4x64xf32> to vector<2x1x64xf32>
    %43 = vector.shape_cast %42 : vector<2x1x64xf32> to vector<2x64xf32>
    %44 = vector.shape_cast %43 : vector<2x64xf32> to vector<1x2x64xf32>
    %45 = vector.broadcast %41 : vector<16x1x1xf32> to vector<16x2x64xf32>
    %46 = vector.broadcast %44 : vector<1x2x64xf32> to vector<16x2x64xf32>
    %47 = arith.mulf %45, %46 : vector<16x2x64xf32>
    %48 = arith.addf %38, %47 : vector<16x2x64xf32>
    %cst = arith.constant 0.000000e+00 : f32
    %49 = vector.broadcast %cst : f32 to vector<16x2x64xf32>
    %50 = arith.maximumf %48, %49 : vector<16x2x64xf32>
    %51 = arith.truncf %50 : vector<16x2x64xf32> to vector<16x2x64xbf16>
    %c0_7 = arith.constant 0 : index
    %c0_8 = arith.constant 0 : index
    %c0_9 = arith.constant 0 : index
    %52 = vector.load %arg2[%c0_7, %c0_8, %c0_9] : memref<2x4x256xf32, #tpu.memory_space<vmem>>, vector<2x4x256xf32>
    %53 = vector.shape_cast %4 : vector<16x1xf32> to vector<16x1x1xf32>
    %54 = vector.shape_cast %53 : vector<16x1x1xf32> to vector<16x1x1xf32>
    %55 = vector.broadcast %54 : vector<16x1x1xf32> to vector<16x2x256xf32>
    %56 = vector.extract_strided_slice %3 {offsets = [0, 0], sizes = [16, 1], strides = [1, 1]} : vector<16x4xf32> to vector<16x1xf32>
    %57 = vector.shape_cast %56 : vector<16x1xf32> to vector<16xf32>
    %58 = vector.shape_cast %57 : vector<16xf32> to vector<16x1x1xf32>
    %59 = vector.extract_strided_slice %52 {offsets = [0, 0, 0], sizes = [2, 1, 256], strides = [1, 1, 1]} : vector<2x4x256xf32> to vector<2x1x256xf32>
    %60 = vector.shape_cast %59 : vector<2x1x256xf32> to vector<2x256xf32>
    %61 = vector.shape_cast %60 : vector<2x256xf32> to vector<1x2x256xf32>
    %62 = vector.broadcast %58 : vector<16x1x1xf32> to vector<16x2x256xf32>
    %63 = vector.broadcast %61 : vector<1x2x256xf32> to vector<16x2x256xf32>
    %64 = arith.mulf %62, %63 : vector<16x2x256xf32>
    %65 = arith.addf %55, %64 : vector<16x2x256xf32>
    %66 = vector.extract_strided_slice %3 {offsets = [0, 1], sizes = [16, 1], strides = [1, 1]} : vector<16x4xf32> to vector<16x1xf32>
    %67 = vector.shape_cast %66 : vector<16x1xf32> to vector<16xf32>
    %68 = vector.shape_cast %67 : vector<16xf32> to vector<16x1x1xf32>
    %69 = vector.extract_strided_slice %52 {offsets = [0, 1, 0], sizes = [2, 1, 256], strides = [1, 1, 1]} : vector<2x4x256xf32> to vector<2x1x256xf32>
    %70 = vector.shape_cast %69 : vector<2x1x256xf32> to vector<2x256xf32>
    %71 = vector.shape_cast %70 : vector<2x256xf32> to vector<1x2x256xf32>
    %72 = vector.broadcast %68 : vector<16x1x1xf32> to vector<16x2x256xf32>
    %73 = vector.broadcast %71 : vector<1x2x256xf32> to vector<16x2x256xf32>
    %74 = arith.mulf %72, %73 : vector<16x2x256xf32>
    %75 = arith.addf %65, %74 : vector<16x2x256xf32>
    %76 = vector.extract_strided_slice %3 {offsets = [0, 2], sizes = [16, 1], strides = [1, 1]} : vector<16x4xf32> to vector<16x1xf32>
    %77 = vector.shape_cast %76 : vector<16x1xf32> to vector<16xf32>
    %78 = vector.shape_cast %77 : vector<16xf32> to vector<16x1x1xf32>
    %79 = vector.extract_strided_slice %52 {offsets = [0, 2, 0], sizes = [2, 1, 256], strides = [1, 1, 1]} : vector<2x4x256xf32> to vector<2x1x256xf32>
    %80 = vector.shape_cast %79 : vector<2x1x256xf32> to vector<2x256xf32>
    %81 = vector.shape_cast %80 : vector<2x256xf32> to vector<1x2x256xf32>
    %82 = vector.broadcast %78 : vector<16x1x1xf32> to vector<16x2x256xf32>
    %83 = vector.broadcast %81 : vector<1x2x256xf32> to vector<16x2x256xf32>
    %84 = arith.mulf %82, %83 : vector<16x2x256xf32>
    %85 = arith.addf %75, %84 : vector<16x2x256xf32>
    %86 = vector.extract_strided_slice %3 {offsets = [0, 3], sizes = [16, 1], strides = [1, 1]} : vector<16x4xf32> to vector<16x1xf32>
    %87 = vector.shape_cast %86 : vector<16x1xf32> to vector<16xf32>
    %88 = vector.shape_cast %87 : vector<16xf32> to vector<16x1x1xf32>
    %89 = vector.extract_strided_slice %52 {offsets = [0, 3, 0], sizes = [2, 1, 256], strides = [1, 1, 1]} : vector<2x4x256xf32> to vector<2x1x256xf32>
    %90 = vector.shape_cast %89 : vector<2x1x256xf32> to vector<2x256xf32>
    %91 = vector.shape_cast %90 : vector<2x256xf32> to vector<1x2x256xf32>
    %92 = vector.broadcast %88 : vector<16x1x1xf32> to vector<16x2x256xf32>
    %93 = vector.broadcast %91 : vector<1x2x256xf32> to vector<16x2x256xf32>
    %94 = arith.mulf %92, %93 : vector<16x2x256xf32>
    %95 = arith.addf %85, %94 : vector<16x2x256xf32>
    %cst_10 = arith.constant 0.000000e+00 : f32
    %96 = vector.broadcast %cst_10 : f32 to vector<16x2x256xf32>
    %97 = arith.maximumf %95, %96 : vector<16x2x256xf32>
    %98 = arith.truncf %97 : vector<16x2x256xf32> to vector<16x2x256xbf16>
    %c0_11 = arith.constant 0 : index
    %c0_12 = arith.constant 0 : index
    %c0_13 = arith.constant 0 : index
    %99 = vector.load %arg5[%c0_11, %c0_12, %c0_13] : memref<16x320x256xbf16, #tpu.memory_space<vmem>>, vector<16x64x256xbf16>
    "tpu.trace_start"() <{level = 10 : i32, message = "fbn,fnh->fbh"}> : () -> ()
    %cst_14 = arith.constant dense<0.000000e+00> : vector<16x2x256xf32>
    %100 = tpu.matmul %51, %99, %cst_14 {dimension_numbers = #tpu.dot_dimension_numbers<[2], [1], [1], [2], [0, 0, 0, 1, 1, 2], [0], [0]>} : vector<16x2x64xbf16>, vector<16x64x256xbf16>, vector<16x2x256xf32> -> vector<16x2x256xf32>
    "tpu.trace_stop"() : () -> ()
    %c0_15 = arith.constant 0 : index
    %c64 = arith.constant 64 : index
    %c0_16 = arith.constant 0 : index
    %101 = vector.load %arg5[%c0_15, %c64, %c0_16] : memref<16x320x256xbf16, #tpu.memory_space<vmem>>, vector<16x256x256xbf16>
    "tpu.trace_start"() <{level = 10 : i32, message = "fbn,fnh->fbh"}> : () -> ()
    %cst_17 = arith.constant dense<0.000000e+00> : vector<16x2x256xf32>
    %102 = tpu.matmul %98, %101, %cst_17 {dimension_numbers = #tpu.dot_dimension_numbers<[2], [1], [1], [2], [0, 0, 0, 1, 1, 2], [0], [0]>} : vector<16x2x256xbf16>, vector<16x256x256xbf16>, vector<16x2x256xf32> -> vector<16x2x256xf32>
    "tpu.trace_stop"() : () -> ()
    %c0_18 = arith.constant 0 : index
    %c0_19 = arith.constant 0 : index
    %103 = vector.load %arg10[%c0_18, %c0_19] : memref<2x256xf32, #tpu.memory_space<vmem>>, vector<2x256xf32>
    %cst_20 = arith.constant dense<0.000000e+00> : vector<2x256xf32>
    %104 = vector.multi_reduction <add>, %100, %cst_20 [0] : vector<16x2x256xf32> to vector<2x256xf32>
    %cst_21 = arith.constant dense<0.000000e+00> : vector<2x256xf32>
    %105 = vector.multi_reduction <add>, %102, %cst_21 [0] : vector<16x2x256xf32> to vector<2x256xf32>
    %106 = arith.addf %104, %105 : vector<2x256xf32>
    %107 = arith.addf %103, %106 : vector<2x256xf32>
    %c0_22 = arith.constant 0 : index
    %c0_23 = arith.constant 0 : index
    %108 = vector.load %arg10[%c0_22, %c0_23] : memref<2x256xf32, #tpu.memory_space<vmem>>, vector<2x256xf32>
    tpu.vector_store %arg10[%c0_22, %c0_23], %107 {strides = array<i32>} : memref<2x256xf32, #tpu.memory_space<vmem>>, vector<2x256xf32>,
    %c0_i32_24 = arith.constant 0 : i32
    %109 = arith.cmpi eq, %arg0, %c0_i32_24 : i32
    %110 = arith.extui %109 : i1 to i32
    %c0_i32_25 = arith.constant 0 : i32
    %111 = arith.cmpi ne, %110, %c0_i32_25 : i32
    scf.if %111 {
      %c0_26 = arith.constant 0 : index
      %c0_27 = arith.constant 0 : index
      %112 = vector.load %arg10[%c0_26, %c0_27] : memref<2x256xf32, #tpu.memory_space<vmem>>, vector<2x256xf32>
      %c0_28 = arith.constant 0 : index
      %c0_29 = arith.constant 0 : index
      %113 = vector.load %arg6[%c0_28, %c0_29] : memref<1x256xf32, #tpu.memory_space<vmem>>, vector<1x256xf32>
      %114 = vector.broadcast %113 : vector<1x256xf32> to vector<2x256xf32>
      %115 = arith.addf %112, %114 : vector<2x256xf32>
      %cst_30 = arith.constant 0.000000e+00 : f32
      %116 = vector.broadcast %cst_30 : f32 to vector<2x256xf32>
      %117 = arith.maximumf %115, %116 : vector<2x256xf32>
      %118 = arith.truncf %117 : vector<2x256xf32> to vector<2x256xbf16>
      %c0_31 = arith.constant 0 : index
      %c0_32 = arith.constant 0 : index
      %119 = vector.load %arg7[%c0_31, %c0_32] : memref<256x128xbf16, #tpu.memory_space<vmem>>, vector<256x128xbf16>
      %cst_33 = arith.constant dense<0.000000e+00> : vector<2x128xf32>
      %120 = tpu.matmul %118, %119, %cst_33 {dimension_numbers = #tpu.dot_dimension_numbers<[1], [0], [0], [1], [0, 0, 1, 1], [], []>} : vector<2x256xbf16>, vector<256x128xbf16>, vector<2x128xf32> -> vector<2x128xf32>
      %c0_34 = arith.constant 0 : index
      %c0_35 = arith.constant 0 : index
      %121 = vector.load %arg8[%c0_34, %c0_35] : memref<1x128xf32, #tpu.memory_space<vmem>>, vector<1x128xf32>
      %122 = vector.broadcast %121 : vector<1x128xf32> to vector<2x128xf32>
      %123 = arith.addf %120, %122 : vector<2x128xf32>
      %c0_36 = arith.constant 0 : index
      %c0_37 = arith.constant 0 : index
      %124 = vector.load %arg9[%c0_36, %c0_37] : memref<2x128xf32, #tpu.memory_space<vmem>>, vector<2x128xf32>
      tpu.vector_store %arg9[%c0_36, %c0_37], %123 {strides = array<i32>} : memref<2x128xf32, #tpu.memory_space<vmem>>, vector<2x128xf32>,
    } else {
    }
    return
  }
  func.func @transform_0(%arg0: i32) -> (i32, i32, i32) {
    %c0_i32 = arith.constant 0 : i32
    %c0_i32_0 = arith.constant 0 : i32
    %c0_i32_1 = arith.constant 0 : i32
    %c0_i32_2 = arith.constant 0 : i32
    return %c0_i32, %c0_i32_0, %c0_i32_1 : i32, i32, i32
  }
  func.func @transform_1(%arg0: i32) -> (i32, i32, i32) {
    %c0_i32 = arith.constant 0 : i32
    %c0_i32_0 = arith.constant 0 : i32
    %c0_i32_1 = arith.constant 0 : i32
    %c0_i32_2 = arith.constant 0 : i32
    return %c0_i32, %c0_i32_0, %c0_i32_1 : i32, i32, i32
  }
  func.func @transform_2(%arg0: i32) -> (i32, i32) {
    %c0_i32 = arith.constant 0 : i32
    %c0_i32_0 = arith.constant 0 : i32
    return %arg0, %c0_i32 : i32, i32
  }
  func.func @transform_3(%arg0: i32) -> (i32, i32) {
    %c0_i32 = arith.constant 0 : i32
    %c0_i32_0 = arith.constant 0 : i32
    return %arg0, %c0_i32 : i32, i32
  }
  func.func @transform_4(%arg0: i32) -> (i32, i32, i32) {
    %c0_i32 = arith.constant 0 : i32
    %c0_i32_0 = arith.constant 0 : i32
    %c0_i32_1 = arith.constant 0 : i32
    return %arg0, %c0_i32, %c0_i32_0 : i32, i32, i32
  }
  func.func @transform_5(%arg0: i32) -> (i32, i32) {
    %c0_i32 = arith.constant 0 : i32
    %c0_i32_0 = arith.constant 0 : i32
    %c0_i32_1 = arith.constant 0 : i32
    return %c0_i32, %c0_i32_0 : i32, i32
  }
  func.func @transform_6(%arg0: i32) -> (i32, i32) {
    %c0_i32 = arith.constant 0 : i32
    %c0_i32_0 = arith.constant 0 : i32
    %c0_i32_1 = arith.constant 0 : i32
    return %c0_i32, %c0_i32_0 : i32, i32
  }
  func.func @transform_7(%arg0: i32) -> (i32, i32) {
    %c0_i32 = arith.constant 0 : i32
    %c0_i32_0 = arith.constant 0 : i32
    %c0_i32_1 = arith.constant 0 : i32
    return %c0_i32, %c0_i32_0 : i32, i32
  }
  func.func @transform_8(%arg0: i32) -> (i32, i32) {
    %c0_i32 = arith.constant 0 : i32
    %c0_i32_0 = arith.constant 0 : i32
    %c0_i32_1 = arith.constant 0 : i32
    return %c0_i32, %c0_i32_0 : i32, i32
  }
}

</mosaic_0001>

<bundles_post_ra>
// kernel: score_pure_rmt_mlp_forward.1
= control target key start
LH: loop header
LB: loop body
LE: loop exit
PB: predicated region body
PF: predicated region fallthrough
CT: control target
= control target key end

     0   :  { %13 = vsyncpa [#allocation4], 0  ;;  %s12093_s0 = inlined_call_operand.vmem [shape: f32[2,4,64], index: 0, kind: input, shape index: {}]   ;;  %s12094_s1 = inlined_call_operand.vmem [shape: f32[2,4,256], index: 1, kind: input, shape index: {}]   ;;  %s12095_s2 = inlined_call_operand.vmem [shape: f32[16,4], index: 2, kind: input, shape index: {}]   ;;  %s12096_s3 = inlined_call_operand.vmem [shape: f32[16,1], index: 3, kind: input, shape index: {}]   ;;  %s12097_s4 = inlined_call_operand.hbm [shape: bf16[16,320,256], index: 4, kind: input, shape index: {}]   ;;  %s12098_s5 = inlined_call_operand.hbm [shape: f32[1,256], index: 5, kind: input, shape index: {}]   ;;  %s12099_s6 = inlined_call_operand.vmem [shape: bf16[256,128], index: 6, kind: input, shape index: {}]   ;;  %s12100_s7 = inlined_call_operand.vmem [shape: f32[1,128], index: 7, kind: input, shape index: {}]   ;;  %s12101_s8 = inlined_call_operand.hbm [shape: f32[2,128], index: 8, kind: output, shape index: {}]  }
   0x1   :  { %14 = vsyncpa [#allocation7], 0 }
   0x2   :  { %15 = vsyncpa [#allocation5], 0  ;;  %s10270_s27 = smov [#allocation3]   ;;  %s10198_s9 = scalar_lea.hbm %s12097_s4, 81920 }
   0x3   :  { %s29_s28 = sshll.u32 %s10270_s27, 4  ;;  %p10199_p0 = scmp.ne.s32.totalorder %s12097_s4, %s10198_s9  ;;  %s30_s28 = int_to_ptr.vmem [resolvable:$true] %s29_s28 }
   0x4   :  { %p10202_p1 = scmp.lt.u32.totalorder %s10198_s9, %s12097_s4 }
   0x6   :  { %p10204_p2 = pnand %p10202_p1, %p10199_p0 }
   0x8   :  { %10207 = shalt.err (!%p10204_p2)
}
   0x9   :  { %s10208_s14 = scalar_lea.vmem %s30_s28, 81920  ;;  %p10213_p4 = scmp.lt.s32.totalorder %s30_s28, %s30_s28 }
   0xa   :  { %p10209_p3 = scmp.ne.s32.totalorder %s30_s28, %s10208_s14  ;;  %p10214_p5 = scmp.lt.s32.totalorder %s10208_s14, %s10208_s14 }
   0xc   :  { %p10215_p6 = por %p10214_p5, %p10213_p4 }
   0xe   :  { %p10216_p7 = pnand %p10215_p6, %p10209_p3 }
  0x10   :  { %10219 = shalt.err (!%p10216_p7)
}
  0x11   :  { %s10271_s15 = smov 128   ;;  %s10272_s16 = smov 8  }
  0x12   :  { %35 = dma.hbm_to_vmem [thread:$0]  %s12097_s4, 81920, %s30_s28, [#allocation4], %s10271_s15, %s10271_s15, %s10272_s16  }
  0x13   :  { %s10273_s19 = smov [#allocation6]   ;;  %s10220_s23 = scalar_lea.hbm %s12098_s5, 32 }
  0x14   :  { %s42_s20 = sshll.u32 %s10273_s19, 4  ;;  %p10221_p8 = scmp.ne.s32.totalorder %s12098_s5, %s10220_s23  ;;  %s43_s20 = int_to_ptr.vmem [resolvable:$true] %s42_s20 }
  0x15   :  { %p10224_p9 = scmp.lt.u32.totalorder %s10220_s23, %s12098_s5 }
  0x17   :  { %p10226_p10 = pnand %p10224_p9, %p10221_p8 }
  0x19   :  { %10229 = shalt.err (!%p10226_p10)
}
  0x1a   :  { %s10230_s29 = scalar_lea.vmem %s43_s20, 32  ;;  %p10235_p12 = scmp.lt.s32.totalorder %s43_s20, %s43_s20 }
  0x1b   :  { %p10231_p11 = scmp.ne.s32.totalorder %s43_s20, %s10230_s29  ;;  %p10236_p13 = scmp.lt.s32.totalorder %s10230_s29, %s10230_s29 }
  0x1d   :  { %p10237_p0 = por %p10236_p13, %p10235_p12 }
  0x1f   :  { %p10238_p1 = pnand %p10237_p0, %p10231_p11 }
  0x21   :  { %10241 = shalt.err (!%p10238_p1)
}
  0x22   :  { %45 = dma.hbm_to_vmem [thread:$0]  %s12098_s5, 32, %s43_s20, [#allocation7]  }
  0x23   :  { %10264 = dma.done.wait [#allocation4], 81920  }
  0x24   :  { %10265 = vsyncadd [#allocation4], 4294885376 }
  0x25   :  { %10266 = dma.done.wait [#allocation7], 32  }
  0x26   :  { %10267 = vsyncadd [#allocation7], 4294967264  ;;  %v74_v0 = vlaneseq  ;;  %v12102_v1 = vmov 1   ;;  %v12106_v2 = vmov 0   ;;  %v10276_v3 = vmov 1966171168  }
  0x27   :  { %9158 = vset.pattern.permute.xlu0 %v12102_v1  ;;  %9159 = vset.pattern.permute.xlu1 %v12106_v2  ;;  %v72_v4 = vunpack.c.l.s4 %v10276_v3  ;;  %v64_v8 = vld [vmem:[%s12096_s3] sm:$0xff]  ;;  %v10277_v21 = vmov 2   ;;  %v12104_v25 = vmov 3   ;;  %v9212_v33 = vld [vmem:[#allocation3 + $0x4] ss:$8 sps:$4 sm:$0xff]   ;;  %vm2547_vm0 = vcmask 1041409  }
  0x28   :  { %v10353_v5 = vshrl.u32 %v74_v0, 7  ;;  %2626 = vmatprep.mubr.bf16.mxu1 %v12106_v2  ;;  %2808 = vmatprep.mubr.bf16.mxu0 %v12106_v2  ;;  %v62_v9 = vld [vmem:[%s12095_s2] sm:$0xff]  ;;  %v70_v27 = vcombine.high %v64_v8, %v64_v8  ;;  %v10410_v42 = vld [vmem:[%s12095_s2 + $0x8] sm:$0xff]  ;;  %v9217_v46 = vld [vmem:[#allocation3 + $0x10] ss:$8 sps:$4 sm:$0xff]   ;;  %vm2590_vm1 = vcmask 523264  }
  0x29   :  { %v73_v6 = vunpack.c.0.s8 %v72_v4  ;;  %v9214_v37 = vld [vmem:[#allocation3] ss:$8 sps:$4 sm:$0xff]   ;;  %v298_v38 = vcombine.high %v62_v9, %v62_v9  ;;  %2594 = vmatprep.subr.bf16.mxu1 %v9212_v33  ;;  %v9215_v44 = vld [vmem:[#allocation3 + $0x14] ss:$8 sps:$4 sm:$0xff]   ;;  %v9218_v50 = vld [vmem:[#allocation3 + $0x24] ss:$8 sps:$4 sm:$0xff]  }
  0x2a   :  { %12129 = vst [vmem:[#allocation12_spill] sm:$0xff] %v10353_v5  ;;  %v10368_v11 = vsub.s32 0, %v10353_v5  ;;  %2595 = vmatpush1.bf16.msra.mxu1 %v9214_v37  ;;  %v9220_v51 = vld [vmem:[#allocation3 + $0x20] ss:$8 sps:$4 sm:$0xff]   ;;  %v9221_v54 = vld [vmem:[#allocation3 + $0x34] ss:$8 sps:$4 sm:$0xff]  }
  0x2b   :  { %v10358_v7 = vsub.s32 %v73_v6, %v10353_v5  ;;  %2596 = vmatprep.subr.bf16.mxu1 %v9215_v44  ;;  %v9224_v55 = vld [vmem:[#allocation3 + $0x30] ss:$8 sps:$4 sm:$0xff]   ;;  %v9227_v57 = vld [vmem:[#allocation3 + $0x144] ss:$8 sps:$4 sm:$0xff]   ;;  %v9240_v4 = vld [vmem:[#allocation3 + $0x280] ss:$8 sps:$4 sm:$0xff]  }
  0x2c   :  { %v9238_v0 = vld [vmem:[#allocation3 + $0x284] ss:$8 sps:$4 sm:$0xff]   ;;  %vm7985_vm2 = vcmask 1041408   ;;  %s10281_s14 = smov [#allocation8]  }
  0x2d   :  { %v77_v10 = vrot.slane %v64_v8, %v10358_v7  ;;  %v305_v12 = vrot.slane %v62_v9, %v10358_v7  ;;  %v84_v29 = vrot.slane %v70_v27, %v10358_v7  ;;  %v312_v43 = vrot.slane %v298_v38, %v10358_v7  ;;  %2776 = vmatprep.subr.bf16.mxu0 %v9238_v0  ;;  %s8345_s15 = sshll.u32 %s10281_s14, 4  ;;  %s8346_s15 = int_to_ptr.vmem [resolvable:$true] %s8345_s15 }
  0x2e   :  { %v354_v49 = vrot.slane %v10410_v42, %v10358_v7  ;;  %2597 = vmatpush1.bf16.msra.mxu1 %v9217_v46  ;;  %2777 = vmatpush1.bf16.msra.mxu0 %v9240_v4  ;;  %s10242_s16 = scalar_lea.vmem %s8346_s15, 32  ;;  %p10247_p3 = scmp.lt.s32.totalorder %s8346_s15, %s8346_s15 }
  0x2f   :  { %v93_v13 = vrot.slane %v77_v10, %v10358_v7  ;;  %v321_v14 = vrot.slane %v305_v12, %v10358_v7  ;;  %v313_v15 = vcombine.high %v305_v12, %v305_v12  ;;  %v85_v24 = vcombine.high %v77_v10, %v77_v10  ;;  %2598 = vmatprep.subr.bf16.mxu1 %v9218_v50  ;;  %v65_v10 = vld [vmem:[%s12096_s3 + $0x8] sm:$0xff]  ;;  %p10243_p2 = scmp.ne.s32.totalorder %s8346_s15, %s10242_s16  ;;  %p10248_p4 = scmp.lt.s32.totalorder %s10242_s16, %s10242_s16 }
  0x30   :  { %v86_v32 = vcombine.high %v84_v29, %v84_v29  ;;  %v10397_v35 = vrot.slane %v84_v29, %v10358_v7  ;;  %v328_v48 = vrot.slane %v312_v43, %v10358_v7  ;;  %v370_v53 = vrot.slane %v354_v49, %v10358_v7 }
  0x31   :  { %v171_v16 = vrot.slane %v93_v13, %v10368_v11  ;;  %v399_v17 = vrot.slane %v321_v14, %v10368_v11  ;;  %v335_v18 = vrot.slane %v313_v15, %v10358_v7  ;;  %v343_v20 = vcombine.high %v321_v14, %v321_v14  ;;  %v9244_v14 = vld [vmem:[#allocation3 + $0x294] ss:$8 sps:$4 sm:$0xff]   ;;  %p10249_p5 = por %p10248_p4, %p10247_p3 }
  0x32   :  { %v107_v28 = vrot.slane %v85_v24, %v10358_v7  ;;  %v10400_v36 = vrot.slane %v86_v32, %v10358_v7  ;;  %v115_v39 = vcombine.high %v93_v13, %v93_v13  ;;  %v187_v40 = vrot.slane %v10397_v35, %v10368_v11  ;;  %2599 = vmatpush1.bf16.msra.mxu1 %v9220_v51 }
  0x33   :  { %233 = vperm.xlu1 %9159, %v171_v16   ;;  %589 = vperm.xlu0 %9158, %v399_v17   ;;  %v403_v19 = vrot.slane %v335_v18, %v10368_v11  ;;  %v10380_v22 = vrot.slane %v343_v20, %v10368_v11  ;;  %v345_v23 = vcombine.high %v335_v18, %v335_v18  ;;  %v9246_v16 = vld [vmem:[#allocation3 + $0x290] ss:$8 sps:$4 sm:$0xff]   ;;  %p10250_p6 = pnand %p10249_p5, %p10243_p2 }
  0x34   :  { %v175_v30 = vrot.slane %v107_v28, %v10368_v11  ;;  %v117_v31 = vcombine.high %v107_v28, %v107_v28  ;;  %v118_v41 = vcombine.high %v10400_v36, %v10400_v36  ;;  %v179_v45 = vrot.slane %v115_v39, %v10368_v11  ;;  %2600 = vmatprep.subr.bf16.mxu1 %v9221_v54  ;;  %v9258_v28 = vld [vmem:[#allocation3 + $0x2b0] ss:$8 sps:$4 sm:$0xff]  }
  0x35   :  { %v10386_v26 = vrot.slane %v345_v23, %v10368_v11  ;;  %v415_v52 = vrot.slane %v328_v48, %v10368_v11  ;;  %v10425_v56 = vrot.slane %v370_v53, %v10368_v11  ;;  %v314_v58 = vcombine.high %v312_v43, %v312_v43  ;;  %2778 = vmatprep.subr.bf16.mxu0 %v9244_v14 }
  0x36   :  { %v183_v34 = vrot.slane %v117_v31, %v10368_v11  ;;  %v199_v47 = vrot.slane %v118_v41, %v10368_v11  ;;  %2601 = vmatpush1.bf16.msra.mxu1 %v9224_v55  ;;  %v344_v62 = vcombine.high %v328_v48, %v328_v48  ;;  %v362_v63 = vcombine.high %v354_v49, %v354_v49 }
  0x37   :  { %9160 = vset.pattern.permute.xlu1 %v10277_v21  ;;  %9164 = vset.pattern.permute.xlu0 %v10277_v21  ;;  %v342_v59 = vrot.slane %v314_v58, %v10358_v7  ;;  %v392_v8 = vcombine.high %v370_v53, %v370_v53  ;;  %v126_v15 = vrot.slane %v65_v10, %v10358_v7 }
  0x38   :  { %813 = vperm.xlu1 %9160, %v399_v17   ;;  %817 = vperm.xlu0 %9164, %v403_v19   ;;  %v10445_v6 = vrot.slane %v344_v62, %v10368_v11  ;;  %v10451_v9 = vrot.slane %v362_v63, %v10358_v7  ;;  %v191_v18 = vrot.slane %v10400_v36, %v10368_v11  ;;  %v10573_v62 = vld [vmem:[%s12094_s1 + $0x8] sm:$0xff] }
  0x39   :  { %2685 = vmatprep.subr.bf16.mxu1 %v9227_v57  ;;  %v346_v60 = vcombine.high %v342_v59, %v342_v59  ;;  %v419_v3 = vrot.slane %v342_v59, %v10368_v11  ;;  %v10458_v12 = vrot.slane %v392_v8, %v10368_v11  ;;  %2779 = vmatpush1.bf16.msra.mxu0 %v9246_v16  ;;  %v10558_v59 = vld [vmem:[%s12093_s0] sm:$0xf] }
  0x3a   :  { %v394_v13 = vcombine.high %v10451_v9, %v10451_v9  ;;  %v10471_v23 = vrot.slane %v126_v15, %v10358_v7  ;;  %v119_v24 = vcombine.high %v65_v10, %v65_v10  ;;  %v347_v32 = vcombine.high %v10410_v42, %v10410_v42 }
  0x3b   :  { %v10437_v61 = vrot.slane %v346_v60, %v10368_v11  ;;  %v116_v38 = vcombine.high %v10397_v35, %v10397_v35  ;;  %v10563_v60 = vld [vmem:[%s12093_s0 + $0x4] sm:$0xf] }
  0x3c   :  { %9161 = vset.pattern.permute.xlu1 %v12104_v25  ;;  %9167 = vset.pattern.permute.xlu0 %v12102_v1  ;;  %v10468_v20 = vrot.slane %v394_v13, %v10368_v11  ;;  %v203_v29 = vrot.slane %v10471_v23, %v10368_v11  ;;  %v133_v31 = vrot.slane %v119_v24, %v10358_v7 }
  0x3d   :  { %1037 = vperm.xlu1 %9161, %v399_v17   ;;  %597 = vperm.xlu0 %9167, %v10380_v22   ;;  %v361_v36 = vrot.slane %v347_v32, %v10358_v7  ;;  %v195_v41 = vrot.slane %v116_v38, %v10368_v11  ;;  %v164_v4 = vcombine.high %v10471_v23, %v10471_v23 }
  0x3e   :  { %v135_v44 = vcombine.high %v133_v31, %v133_v31 }
  0x3f   :  { %v377_v39 = vrot.slane %v361_v36, %v10358_v7  ;;  %v363_v35 = vcombine.high %v361_v36, %v361_v36  ;;  %v211_v16 = vrot.slane %v164_v4, %v10368_v11 }
  0x40   :  { %v10522_v48 = vrot.slane %v135_v44, %v10358_v7 }
  0x41   :  { %9162 = vset.pattern.permute.xlu1 %v12102_v1  ;;  %601 = vperm.xlu0 %9167, %v10386_v26   ;;  %v10502_v42 = vrot.slane %v377_v39, %v10368_v11  ;;  %v10511_v43 = vrot.slane %v363_v35, %v10358_v7 }
  0x42   :  { %593 = vperm.xlu1 %9162, %v403_v19   ;;  %v167_v50 = vcombine.high %v10522_v48, %v10522_v48 }
  0x43   :  { %v395_v46 = vcombine.high %v10511_v43, %v10511_v43 }
  0x44   :  { %v231_v51 = vrot.slane %v167_v50, %v10368_v11 }
  0x45   :  { %9168 = vset.pattern.permute.xlu0 %v12106_v2  ;;  %v10527_v49 = vrot.slane %v395_v46, %v10368_v11 }
  0x46   :  { %9163 = vset.pattern.permute.xlu1 %v12106_v2  ;;  %461 = vperm.xlu0 %9168, %v399_v17   ;;  %v9250_v17 = vld [vmem:[#allocation3 + $0x2a4] ss:$8 sps:$4 sm:$0xff]  }
  0x47   :  { %237 = vperm.xlu1 %9163, %v175_v30   ;;  %2780 = vmatprep.subr.bf16.mxu0 %v9250_v17 }
  0x4a   :  { %465 = vperm.xlu0 %9168, %v403_v19  }
  0x4b   :  { %9165 = vset.pattern.permute.xlu1 %v12104_v25 }
  0x4c   :  { %1041 = vperm.xlu1 %9165, %v403_v19   ;;  %v134_v19 = vcombine.high %v126_v15, %v126_v15 }
  0x4e   :  { %245 = vperm.xlu0 %9168, %v183_v34   ;;  %v10475_v27 = vrot.slane %v134_v19, %v10358_v7  ;;  %v10489_v34 = vrot.slane %v133_v31, %v10358_v7  ;;  %v435_v7 = vrot.slane %v10451_v9, %v10368_v11 }
  0x50   :  { %9166 = vset.pattern.permute.xlu1 %v12106_v2  ;;  %v166_v30 = vcombine.high %v10475_v27, %v10475_v27  ;;  %v219_v37 = vrot.slane %v10489_v34, %v10368_v11  ;;  %v207_v57 = vrot.slane %v10475_v27, %v10368_v11 }
  0x51   :  { %469 = vperm.xlu1 %9166, %v10380_v22  }
  0x52   :  { %249 = vperm.xlu0 %9168, %v187_v40   ;;  %v215_v33 = vrot.slane %v166_v30, %v10368_v11  ;;  %v9264_v40 = vld [vmem:[#allocation3 + $0x504] ss:$8 sps:$4 sm:$0xff]  }
  0x55   :  { %241 = vperm.xlu1 %9166, %v179_v45   ;;  %v393_v45 = vcombine.high %v377_v39, %v377_v39 }
  0x56   :  { %261 = vperm.xlu0 %9168, %v199_v47  }
  0x57   :  { %v10518_v47 = vrot.slane %v393_v45, %v10368_v11 }
  0x59   :  { %473 = vperm.xlu1 %9166, %v10386_v26  }
  0x5a   :  { %9180 = vset.pattern.permute.xlu0 %v10277_v21 }
  0x5b   :  { %829 = vperm.xlu0 %9180, %v415_v52  }
  0x5d   :  { %9169 = vset.pattern.permute.xlu1 %v10277_v21 }
  0x5e   :  { %821 = vperm.xlu1 %9169, %v10380_v22  }
  0x5f   :  { %845 = vperm.xlu0 %9180, %v10425_v56  }
  0x62   :  { %825 = vperm.xlu1 %9169, %v10386_v26  }
  0x63   :  { %9186 = vset.pattern.permute.xlu0 %v12104_v25 }
  0x64   :  { %1049 = vperm.xlu0 %9186, %v10386_v26   ;;  %v9256_v26 = vld [vmem:[#allocation3 + $0x2b4] ss:$8 sps:$4 sm:$0xff]  }
  0x66   :  { %9170 = vset.pattern.permute.xlu1 %v12104_v25 }
  0x67   :  { %1045 = vperm.xlu1 %9170, %v10380_v22   ;;  %v9252_v22 = vld [vmem:[#allocation3 + $0x2a0] ss:$8 sps:$4 sm:$0xff]  }
  0x68   :  { %1053 = vperm.xlu0 %9186, %v415_v52   ;;  %2781 = vmatpush1.bf16.msra.mxu0 %v9252_v22 }
  0x69   :  { %2782 = vmatprep.subr.bf16.mxu0 %v9256_v26 }
  0x6b   :  { %9171 = vset.pattern.permute.xlu1 %v12106_v2 }
  0x6c   :  { %477 = vperm.xlu1 %9171, %v415_v52   ;;  %1065 = vperm.xlu0 %9186, %v10437_v61  }
  0x6d   :  { %2783 = vmatpush1.bf16.msra.mxu0 %v9258_v28 }
  0x6e   :  { %2958 = vmatprep.subr.bf16.mxu0 %v9264_v40 }
  0x70   :  { %9172 = vset.pattern.permute.xlu1 %v12102_v1  ;;  %1069 = vperm.xlu0 %9186, %v10425_v56  }
  0x71   :  { %605 = vperm.xlu1 %9172, %v415_v52  }
  0x74   :  { %9189 = vset.pattern.permute.xlu0 %v12102_v1 }
  0x75   :  { %9173 = vset.pattern.permute.xlu1 %v12106_v2  ;;  %613 = vperm.xlu0 %9189, %v10445_v6  }
  0x76   :  { %481 = vperm.xlu1 %9173, %v419_v3  }
  0x79   :  { %617 = vperm.xlu0 %9189, %v10437_v61  }
  0x7a   :  { %9174 = vset.pattern.permute.xlu1 %v12102_v1 }
  0x7b   :  { %609 = vperm.xlu1 %9174, %v419_v3  }
  0x7d   :  { %629 = vperm.xlu0 %9189, %v10458_v12  }
  0x7f   :  { %9175 = vset.pattern.permute.xlu1 %v12106_v2 }
  0x80   :  { %253 = vperm.xlu1 %9175, %v191_v18  }
  0x81   :  { %633 = vperm.xlu0 %9189, %v10468_v20  }
  0x84   :  { %9176 = vset.pattern.permute.xlu1 %v10277_v21 }
  0x85   :  { %833 = vperm.xlu1 %9176, %v419_v3   ;;  %9192 = vset.pattern.permute.xlu0 %v12106_v2 }
  0x86   :  { %265 = vperm.xlu0 %9192, %v203_v29  }
  0x89   :  { %9177 = vset.pattern.permute.xlu1 %v12104_v25 }
  0x8a   :  { %1057 = vperm.xlu1 %9177, %v419_v3   ;;  %277 = vperm.xlu0 %9192, %v215_v33  }
  0x8e   :  { %9178 = vset.pattern.permute.xlu1 %v12106_v2  ;;  %281 = vperm.xlu0 %9192, %v219_v37  }
  0x8f   :  { %485 = vperm.xlu1 %9178, %v10445_v6  }
  0x92   :  { %9199 = vset.pattern.permute.xlu0 %v10277_v21 }
  0x93   :  { %257 = vperm.xlu1 %9178, %v195_v41   ;;  %861 = vperm.xlu0 %9199, %v10502_v42  }
  0x97   :  { %489 = vperm.xlu1 %9178, %v10437_v61   ;;  %9200 = vset.pattern.permute.xlu0 %v12104_v25 }
  0x98   :  { %1081 = vperm.xlu0 %9200, %v10468_v20  }
  0x9b   :  { %9179 = vset.pattern.permute.xlu1 %v10277_v21 }
  0x9c   :  { %837 = vperm.xlu1 %9179, %v10445_v6   ;;  %1085 = vperm.xlu0 %9200, %v10502_v42  }
  0xa0   :  { %841 = vperm.xlu1 %9179, %v10437_v61   ;;  %9205 = vset.pattern.permute.xlu0 %v12102_v1  ;;  %v10568_v61 = vld [vmem:[%s12094_s1] sm:$0xff] }
  0xa1   :  { %645 = vperm.xlu0 %9205, %v10518_v47  }
  0xa4   :  { %9181 = vset.pattern.permute.xlu1 %v12104_v25 }
  0xa5   :  { %1061 = vperm.xlu1 %9181, %v10445_v6   ;;  %649 = vperm.xlu0 %9205, %v10527_v49  }
  0xa9   :  { %9182 = vset.pattern.permute.xlu1 %v12106_v2  ;;  %9207 = vset.pattern.permute.xlu0 %v12106_v2 }
  0xaa   :  { %493 = vperm.xlu1 %9182, %v10425_v56   ;;  %293 = vperm.xlu0 %9207, %v231_v51  }
  0xae   :  { %9183 = vset.pattern.permute.xlu1 %v12102_v1  ;;  %9209 = vset.pattern.permute.xlu0 %v12104_v25 }
  0xaf   :  { %621 = vperm.xlu1 %9183, %v10425_v56   ;;  %1097 = vperm.xlu0 %9209, %v10527_v49  }
  0xb2   :  { %v234_v52 = vpop.permute.xlu1 %233  ;;  %v590_v53 = vpop.permute.xlu0 %589 }
  0xb3   :  { %9184 = vset.pattern.permute.xlu1 %v12106_v2  ;;  %v10576_v63 = vmul.f32 %v590_v53, %v10558_v59  ;;  %v1390_v0 = vmul.f32 %v10568_v61, %v590_v53  ;;  %v1391_v6 = vmul.f32 %v10573_v62, %v590_v53  ;;  %v653_v9 = vmul.f32 %v590_v53, %v10563_v60 }
  0xb4   :  { %497 = vperm.xlu1 %9184, %v435_v7  }
  0xb5   :  { %v716_v14 = vrot.slane %v10576_v63, 1  ;;  %v8355_v15 = vrot.slane %v1390_v0, 9  ;;  %v8356_v17 = vrot.slane %v1391_v6, 9  ;;  %v717_v30 = vrot.slane %v653_v9, 1 }
  0xb7   :  { %v10545_v54 = vpop.permute.xlu1 %813  ;;  %v818_v55 = vpop.permute.xlu0 %817 }
  0xb8   :  { %9185 = vset.pattern.permute.xlu1 %v12102_v1  ;;  %v10588_v10 = vmul.f32 %v10545_v54, %v10558_v59  ;;  %v10592_v13 = vmul.f32 %v10545_v54, %v10563_v60  ;;  %v10597_v18 = vmul.f32 %v818_v55, %v10558_v59  ;;  %v10600_v19 = vmul.f32 %v818_v55, %v10563_v60 }
  0xb9   :  { %625 = vperm.xlu1 %9185, %v435_v7   ;;  %v1584_v22 = vmul.f32 %v10568_v61, %v818_v55  ;;  %v1585_v24 = vmul.f32 %v10573_v62, %v818_v55 }
  0xba   :  { %v940_v31 = vrot.slane %v10588_v10, 2  ;;  %v941_v32 = vrot.slane %v10592_v13, 2  ;;  %v942_v40 = vrot.slane %v10597_v18, 2  ;;  %v943_v41 = vrot.slane %v10600_v19, 2 }
  0xbb   :  { %v8389_v35 = vrot.slane %v1584_v22, 10  ;;  %v8390_v46 = vrot.slane %v1585_v24, 10 }
  0xbc   :  { %v10550_v56 = vpop.permute.xlu1 %1037  ;;  %v10552_v58 = vpop.permute.xlu0 %597 }
  0xbd   :  { %9187 = vset.pattern.permute.xlu1 %v12106_v2  ;;  %v1101_v4 = vmul.f32 %v10550_v56, %v10563_v60  ;;  %v1394_v6 = vmul.f32 %v10568_v61, %v10552_v58  ;;  %v1395_v22 = vmul.f32 %v10573_v62, %v10552_v58 }
  0xbe   :  { %269 = vperm.xlu1 %9187, %v207_v57  }
  0xbf   :  { %v8359_v1 = vrot.slane %v1394_v6, 9 }
  0xc0   :  { %v10579_v3 = vpop.permute.xlu0 %601 }
  0xc1   :  { %v594_v8 = vpop.permute.xlu1 %593  ;;  %v1397_v6 = vmul.f32 %v10573_v62, %v10579_v3 }
  0xc2   :  { %9188 = vset.pattern.permute.xlu1 %v10277_v21  ;;  %v1392_v36 = vmul.f32 %v10568_v61, %v594_v8  ;;  %v1393_v37 = vmul.f32 %v10573_v62, %v594_v8  ;;  %v655_v50 = vmul.f32 %v594_v8, %v10563_v60 }
  0xc3   :  { %849 = vperm.xlu1 %9188, %v435_v7  }
  0xc4   :  { %v8357_v9 = vrot.slane %v1392_v36, 9  ;;  %v8358_v10 = vrot.slane %v1393_v37, 9  ;;  %v1100_v36 = vmul.f32 %v10550_v56, %v10558_v59  ;;  %v1165_v37 = vrot.slane %v1101_v4, 3 }
  0xc5   :  { %v462_v23 = vpop.permute.xlu0 %461 }
  0xc6   :  { %v525_v26 = vmul.f32 %v462_v23, %v10563_v60  ;;  %v1326_v27 = vmul.f32 %v10568_v61, %v462_v23  ;;  %v1327_v28 = vmul.f32 %v10573_v62, %v462_v23  ;;  %v238_v29 = vpop.permute.xlu1 %237  ;;  %v524_v33 = vmul.f32 %v462_v23, %v10558_v59 }
  0xc7   :  { %9190 = vset.pattern.permute.xlu1 %v12104_v25  ;;  %v719_v23 = vrot.slane %v655_v50, 1 }
  0xc8   :  { %v1358_v38 = vadd.f32 %v1326_v27, %v234_v52  ;;  %v1359_v39 = vadd.f32 %v1327_v28, %v234_v52  ;;  %1073 = vperm.xlu1 %9190, %v435_v7   ;;  %v557_v44 = vadd.f32 %v525_v26, %v234_v52  ;;  %v556_v55 = vadd.f32 %v524_v33, %v234_v52 }
  0xc9   :  { %v466_v45 = vpop.permute.xlu0 %465  ;;  %v654_v27 = vmul.f32 %v594_v8, %v10558_v59 }
  0xca   :  { %v10616_v51 = vadd.f32 %v8355_v15, %v1358_v38  ;;  %v10618_v53 = vadd.f32 %v8356_v17, %v1359_v39  ;;  %v527_v57 = vmul.f32 %v466_v45, %v10563_v60  ;;  %v1328_v63 = vmul.f32 %v10568_v61, %v466_v45 }
  0xcb   :  { %v1329_v7 = vmul.f32 %v10573_v62, %v466_v45  ;;  %v1042_v0 = vpop.permute.xlu1 %1041  ;;  %v781_v13 = vadd.f32 %v717_v30, %v557_v44  ;;  %v526_v24 = vmul.f32 %v466_v45, %v10558_v59  ;;  %v780_v28 = vadd.f32 %v716_v14, %v556_v55 }
  0xcc   :  { %9191 = vset.pattern.permute.xlu1 %v12106_v2  ;;  %v559_v15 = vadd.f32 %v527_v57, %v238_v29  ;;  %v1360_v52 = vadd.f32 %v1328_v63, %v238_v29  ;;  %v1776_v26 = vmul.f32 %v10568_v61, %v1042_v0  ;;  %v1777_v39 = vmul.f32 %v10573_v62, %v1042_v0 }
  0xcd   :  { %v1361_v17 = vadd.f32 %v1329_v7, %v238_v29  ;;  %501 = vperm.xlu1 %9191, %v10458_v12   ;;  %v10629_v19 = vpop.permute.xlu0 %245  ;;  %v1005_v57 = vadd.f32 %v941_v32, %v781_v13  ;;  %v558_v8 = vadd.f32 %v526_v24, %v238_v29  ;;  %v1103_v14 = vmul.f32 %v1042_v0, %v10563_v60 }
  0xce   :  { %v1552_v33 = vadd.f32 %v8357_v9, %v1360_v52  ;;  %v783_v38 = vadd.f32 %v719_v23, %v559_v15  ;;  %v8421_v7 = vrot.slane %v1776_v26, 11  ;;  %v8422_v55 = vrot.slane %v1777_v39, 11 }
  0xcf   :  { %v1553_v30 = vadd.f32 %v8358_v10, %v1361_v17  ;;  %v8360_v9 = vrot.slane %v1395_v22, 9  ;;  %v718_v10 = vrot.slane %v654_v27, 1  ;;  %v1004_v52 = vadd.f32 %v940_v31, %v780_v28 }
  0xd0   :  { %v470_v44 = vpop.permute.xlu1 %469  ;;  %v1744_v63 = vadd.f32 %v8389_v35, %v1552_v33  ;;  %v1007_v15 = vadd.f32 %v943_v41, %v783_v38  ;;  %v1396_v29 = vmul.f32 %v10568_v61, %v10579_v3  ;;  %v1229_v13 = vadd.f32 %v1165_v37, %v1005_v57 }
  0xd1   :  { %v1745_v50 = vadd.f32 %v8390_v46, %v1553_v30  ;;  %273 = vperm.xlu1 %9191, %v211_v16   ;;  %v10639_v45 = vpop.permute.xlu0 %249  ;;  %v1330_v32 = vmul.f32 %v10568_v61, %v470_v44  ;;  %v1331_v35 = vmul.f32 %v10573_v62, %v470_v44  ;;  %v1164_v46 = vrot.slane %v1100_v36, 3 }
  0xd2   :  { %v10642_v4 = vadd.f32 %v8421_v7, %v1744_v63  ;;  %v782_v41 = vadd.f32 %v718_v10, %v558_v8  ;;  %v1167_v22 = vrot.slane %v1103_v14, 3  ;;  %v1102_v26 = vmul.f32 %v1042_v0, %v10558_v59 }
  0xd3   :  { %v10644_v17 = vadd.f32 %v8422_v55, %v1745_v50  ;;  %v1228_v27 = vadd.f32 %v1164_v46, %v1004_v52  ;;  %v656_v37 = vmul.f32 %v10552_v58, %v10558_v59  ;;  %v657_v38 = vmul.f32 %v10552_v58, %v10563_v60 }
  0xd4   :  { %v242_v16 = vpop.permute.xlu1 %241  ;;  %v1231_v28 = vadd.f32 %v1167_v22, %v1007_v15  ;;  %v8361_v39 = vrot.slane %v1396_v29, 9  ;;  %v1261_v57 = vmax.f32 %v1229_v13, 0.0  ;;  %v8362_v63 = vrot.slane %v1397_v6, 9 }
  0xd5   :  { %505 = vperm.xlu1 %9191, %v10468_v20   ;;  %v10653_v31 = vpop.permute.xlu0 %261  ;;  %v1362_v23 = vadd.f32 %v1330_v32, %v242_v16  ;;  %v1363_v24 = vadd.f32 %v1331_v35, %v242_v16  ;;  %v1006_v0 = vadd.f32 %v942_v40, %v782_v41  ;;  %v658_v8 = vmul.f32 %v10579_v3, %v10558_v59 }
  0xd6   :  { %v659_v58 = vmul.f32 %v10579_v3, %v10563_v60  ;;  %v1166_v14 = vrot.slane %v1102_v26, 3  ;;  %v1260_v55 = vmax.f32 %v1228_v27, 0.0  ;;  %v528_v52 = vmul.f32 %v470_v44, %v10558_v59 }
  0xd7   :  { %v10656_v33 = vadd.f32 %v8359_v1, %v1362_v23  ;;  %v10658_v30 = vadd.f32 %v8360_v9, %v1363_v24  ;;  %v1263_v9 = vmax.f32 %v1231_v28, 0.0  ;;  %v529_v15 = vmul.f32 %v470_v44, %v10563_v60 }
  0xd8   :  { %v474_v36 = vpop.permute.xlu1 %473  ;;  %v1292_v32 = vpack.c.bf16 %v1260_v55, %v1260_v55  ;;  %v1293_v35 = vpack.c.bf16 %v1261_v57, %v1261_v57  ;;  %v10681_v29 = vadd.f32 %v1166_v14, %v1006_v0  ;;  %v720_v22 = vrot.slane %v656_v37, 1  ;;  %v9225_v0 = vld [vmem:[#allocation3 + $0x140] ss:$8 sps:$4 sm:$0xff]  }
  0xd9   :  { %9193 = vset.pattern.permute.xlu1 %v10277_v21  ;;  %v1332_v1 = vmul.f32 %v10568_v61, %v474_v36  ;;  %v1333_v50 = vmul.f32 %v10573_v62, %v474_v36  ;;  %v530_v18 = vmul.f32 %v474_v36, %v10558_v59  ;;  %v531_v3 = vmul.f32 %v474_v36, %v10563_v60 }
  0xda   :  { %853 = vperm.xlu1 %9193, %v10458_v12   ;;  %v10670_v7 = vpop.permute.xlu0 %829  ;;  %v721_v23 = vrot.slane %v657_v38, 1  ;;  %v722_v24 = vrot.slane %v658_v8, 1  ;;  %v2545_v26 = vunpack.c.l.b16 %v1293_v35  ;;  %v10691_v44 = vpack.c.bf16 %v1263_v9, %v1263_v9  ;;  %v9231_v8 = vld [vmem:[#allocation3 + $0x154] ss:$8 sps:$4 sm:$0xff]  }
  0xdb   :  { %v1364_v40 = vadd.f32 %v1332_v1, %v10629_v19  ;;  %v1365_v10 = vadd.f32 %v1333_v50, %v10629_v19  ;;  %v560_v27 = vadd.f32 %v528_v52, %v242_v16  ;;  %v561_v28 = vadd.f32 %v529_v15, %v242_v16 }
  0xdc   :  { %v562_v57 = vadd.f32 %v530_v18, %v10629_v19  ;;  %v2544_v36 = vunpack.c.l.b16 %v1292_v32  ;;  %v723_v50 = vrot.slane %v659_v58, 1  ;;  %v1262_v37 = vmax.f32 %v10681_v29, 0.0 }
  0xdd   :  { %v822_v46 = vpop.permute.xlu1 %821  ;;  %v10684_v6 = vadd.f32 %v8361_v39, %v1364_v40  ;;  %v10686_v13 = vadd.f32 %v8362_v63, %v1365_v10  ;;  %v2546_v39 = vrot.slane %v2545_v26, 7  ;;  %v563_v38 = vadd.f32 %v531_v3, %v10629_v19  ;;  %v9229_v3 = vld [vmem:[#allocation3 + $0x150] ss:$8 sps:$4 sm:$0xff]  }
  0xde   :  { %857 = vperm.xlu1 %9193, %v10468_v20   ;;  %v10689_v41 = vpop.permute.xlu0 %845  ;;  %v1586_v63 = vmul.f32 %v10568_v61, %v822_v46  ;;  %v1587_v1 = vmul.f32 %v10573_v62, %v822_v46  ;;  %v10701_v16 = vrot.slane %v10511_v43, %v10368_v11  ;;  %v10705_v55 = vmul.f32 %v822_v46, %v10558_v59 }
  0xdf   :  { %v2548_v14 = vsel %vm2547_vm0, %v2546_v39, %v2544_v36  ;;  %v784_v58 = vadd.f32 %v720_v22, %v560_v27  ;;  %v785_v40 = vadd.f32 %v721_v23, %v561_v28  ;;  %v881_v19 = vmul.f32 %v822_v46, %v10563_v60  ;;  %v9234_v23 = vld [vmem:[#allocation3 + $0x164] ss:$8 sps:$4 sm:$0xff]  }
  0xe0   :  { %v8391_v9 = vrot.slane %v1586_v63, 10  ;;  %v8392_v18 = vrot.slane %v1587_v1, 10  ;;  %v2549_v10 = vpack.c.b16 %v2548_v14, %v2548_v14  ;;  %v2638_v15 = vunpack.c.l.b16 %v10691_v44  ;;  %v9232_v1 = vld [vmem:[#allocation3 + $0x160] ss:$8 sps:$4 sm:$0xff]  }
  0xe1   :  { %v826_v20 = vpop.permute.xlu1 %825  ;;  %v786_v32 = vadd.f32 %v722_v24, %v562_v57  ;;  %v787_v26 = vadd.f32 %v723_v50, %v563_v38  ;;  %v944_v24 = vrot.slane %v10705_v55, 2  ;;  %v945_v28 = vrot.slane %v881_v19, 2 }
  0xe2   :  { %9194 = vset.pattern.permute.xlu1 %v12104_v25  ;;  %v10711_v43 = vadd.f32 %v8391_v9, %v10656_v33  ;;  %v10714_v35 = vadd.f32 %v8392_v18, %v10658_v30  ;;  %8459 = vmatmul.mubr.msk.bf16.vlgmr.msra.gmra.mrb[0].mxu1 %vm2590_vm1, %v2549_v10  ;;  %v883_v22 = vmul.f32 %v826_v20, %v10563_v60 }
  0xe3   :  { %1077 = vperm.xlu1 %9194, %v10458_v12   ;;  %v1050_v52 = vpop.permute.xlu0 %1049  ;;  %v882_v12 = vmul.f32 %v826_v20, %v10558_v59  ;;  %v1588_v46 = vmul.f32 %v10568_v61, %v826_v20  ;;  %2686 = vmatpush1.bf16.msra.mxu1 %v9225_v0  ;;  %v1589_v33 = vmul.f32 %v10573_v62, %v826_v20 }
  0xe4   :  { %v1106_v30 = vmul.f32 %v1050_v52, %v10558_v59  ;;  %v1107_v44 = vmul.f32 %v1050_v52, %v10563_v60  ;;  %2687 = vmatprep.subr.bf16.mxu1 %v9231_v8  ;;  %v947_v36 = vrot.slane %v883_v22, 2  ;;  %v1780_v38 = vmul.f32 %v10568_v61, %v1050_v52  ;;  %2717 = vmatprep.mubr.bf16.mxu1 %v12106_v2  ;;  %v9237_v8 = vld [vmem:[#allocation3 + $0x174] ss:$8 sps:$4 sm:$0xff]  }
  0xe5   :  { %v946_v57 = vrot.slane %v882_v12, 2  ;;  %v8393_v39 = vrot.slane %v1588_v46, 10  ;;  %v8394_v63 = vrot.slane %v1589_v33, 10  ;;  %v1781_v9 = vmul.f32 %v10573_v62, %v1050_v52 }
  0xe6   :  { %v1046_v27 = vpop.permute.xlu1 %1045  ;;  %v1170_v0 = vrot.slane %v1106_v30, 3  ;;  %v1171_v50 = vrot.slane %v1107_v44, 3  ;;  %v1011_v14 = vadd.f32 %v947_v36, %v787_v26  ;;  %v8425_v10 = vrot.slane %v1780_v38, 11 }
  0xe7   :  { %9195 = vset.pattern.permute.xlu1 %v12106_v2  ;;  %v1010_v20 = vadd.f32 %v946_v57, %v786_v32  ;;  %v1748_v55 = vadd.f32 %v8393_v39, %v10684_v6  ;;  %2688 = vmatpush1.bf16.msra.mxu1 %v9229_v3  ;;  %v1749_v18 = vadd.f32 %v8394_v63, %v10686_v13  ;;  %v8426_v32 = vrot.slane %v1781_v9, 11  ;;  %v9235_v3 = vld [vmem:[#allocation3 + $0x170] ss:$8 sps:$4 sm:$0xff]  }
  0xe8   :  { %509 = vperm.xlu1 %9195, %v10502_v42   ;;  %v1104_v19 = vmul.f32 %v1046_v27, %v10558_v59  ;;  %v1105_v12 = vmul.f32 %v1046_v27, %v10563_v60  ;;  %v1009_v46 = vadd.f32 %v945_v28, %v785_v40  ;;  %2689 = vmatprep.subr.bf16.mxu1 %v9234_v23  ;;  %v12130_v6 = vmov 1  }
  0xe9   :  { %v1235_v33 = vadd.f32 %v1171_v50, %v1011_v14  ;;  %v1778_v26 = vmul.f32 %v10568_v61, %v1046_v27  ;;  %v10737_v52 = vadd.f32 %v8425_v10, %v1748_v55  ;;  %v1779_v44 = vmul.f32 %v10573_v62, %v1046_v27 }
  0xea   :  { %v1168_v30 = vrot.slane %v1104_v19, 3  ;;  %v1169_v13 = vrot.slane %v1105_v12, 3  ;;  %v1294_v40 = vpack.c.bf16 %v1262_v37, %v1262_v37  ;;  %v1008_v23 = vadd.f32 %v944_v24, %v784_v58 }
  0xeb   :  { %v10733_v22 = vpop.permute.xlu1 %477  ;;  %12131 = vst [vmem:[#allocation13_spill] sm:$0xff] %v10737_v52  ;;  %v10744_v28 = vadd.f32 %v8426_v32, %v1749_v18  ;;  %v8423_v57 = vrot.slane %v1778_v26, 11  ;;  %2690 = vmatpush1.bf16.msra.mxu1 %v9232_v1  ;;  %v1234_v36 = vadd.f32 %v1170_v0, %v1010_v20  ;;  %v1267_v39 = vmax.f32 %v1235_v33, 0.0  ;;  %v9241_v18 = vld [vmem:[#allocation3 + $0x3c0] ss:$8 sps:$4 sm:$0xff]  }
  0xec   :  { %9196 = vset.pattern.permute.xlu1 %v12130_v6  ;;  %v1233_v63 = vadd.f32 %v1169_v13, %v1009_v46  ;;  %v8424_v50 = vrot.slane %v1779_v44, 11  ;;  %v2639_v38 = vrot.slane %v2638_v15, 7  ;;  %2691 = vmatprep.subr.bf16.mxu1 %v9237_v8  ;;  %v1232_v14 = vadd.f32 %v1168_v30, %v1008_v23  ;;  %v9249_v30 = vld [vmem:[#allocation3 + $0x3d4] ss:$8 sps:$4 sm:$0xff]   ;;  %v9247_v23 = vld [vmem:[#allocation3 + $0x3d0] ss:$8 sps:$4 sm:$0xff]  }
  0xed   :  { %637 = vperm.xlu1 %9196, %v10502_v42   ;;  %12132 = vst [vmem:[#allocation14_spill] sm:$0xff] %v10744_v28  ;;  %v10747_v27 = vadd.f32 %v8423_v57, %v10711_v43  ;;  %v9243_v42 = vld [vmem:[#allocation3 + $0x3c4] ss:$8 sps:$4 sm:$0xff]   ;;  %v10751_v29 = vmul.f32 %v10670_v7, %v10558_v59  ;;  %v10755_v37 = vmul.f32 %v10670_v7, %v10563_v60  ;;  %v2637_v15 = vunpack.c.l.b16 %v1294_v40 }
  0xee   :  { %v1265_v58 = vmax.f32 %v1233_v63, 0.0  ;;  %v10758_v24 = vadd.f32 %v8424_v50, %v10714_v35  ;;  %v10763_v43 = vmul.f32 %v10568_v61, %v10670_v7  ;;  %v10767_v1 = vmul.f32 %v10573_v62, %v10670_v7  ;;  %v9255_v63 = vld [vmem:[#allocation3 + $0x3e4] ss:$8 sps:$4 sm:$0xff]   ;;  %v1054_v50 = vpop.permute.xlu0 %1053 }
  0xef   :  { %12133 = vst [vmem:[#allocation15_spill] sm:$0xff] %v10747_v27  ;;  %v1266_v0 = vmax.f32 %v1234_v36, 0.0  ;;  %v10770_v20 = vpack.c.bf16 %v1267_v39, %v1267_v39  ;;  %2692 = vmatpush1.bf16.msra.mxu1 %v9235_v3  ;;  %v1264_v35 = vmax.f32 %v1232_v14, 0.0  ;;  %v2640_v8 = vsel %vm2547_vm0, %v2639_v38, %v2637_v15 }
  0xf0   :  { %v606_v55 = vpop.permute.xlu1 %605  ;;  %v1297_v9 = vpack.c.bf16 %v1265_v58, %v1265_v58  ;;  %2867 = vmatprep.subr.bf16.mxu1 %v9243_v42  ;;  %v948_v10 = vrot.slane %v10751_v29, 2  ;;  %v949_v19 = vrot.slane %v10755_v37, 2  ;;  %v223_v7 = vrot.slane %v10522_v48, %v10368_v11 }
  0xf1   :  { %9197 = vset.pattern.permute.xlu1 %v12106_v2  ;;  %v8395_v33 = vrot.slane %v10763_v43, 10  ;;  %v8396_v32 = vrot.slane %v10767_v1, 10  ;;  %v2641_v26 = vpack.c.b16 %v2640_v8, %v2640_v8  ;;  %v532_v3 = vmul.f32 %v10733_v22, %v10558_v59 }
  0xf2   :  { %513 = vperm.xlu1 %9197, %v10701_v16   ;;  %v2729_v12 = vunpack.c.l.b16 %v1297_v9  ;;  %v10784_v13 = vpack.c.bf16 %v1266_v0, %v1266_v0  ;;  %v2820_v44 = vunpack.c.l.b16 %v10770_v20  ;;  %v533_v40 = vmul.f32 %v10733_v22, %v10563_v60  ;;  %v9253_v0 = vld [vmem:[#allocation3 + $0x3e0] ss:$8 sps:$4 sm:$0xff]  }
  0xf3   :  { %v1334_v48 = vmul.f32 %v10568_v61, %v10733_v22  ;;  %v1296_v57 = vpack.c.bf16 %v1264_v35, %v1264_v35  ;;  %8468 = vmatmul.mubr.msk.bf16.vlgmr.msra.gmra.mrb[4].mxu1 %vm2590_vm1, %v2641_v26  ;;  %v564_v36 = vadd.f32 %v532_v3, %v10639_v45  ;;  %v660_v39 = vmul.f32 %v606_v55, %v10558_v59  ;;  %v9261_v26 = vld [vmem:[#allocation3 + $0x3f4] ss:$8 sps:$4 sm:$0xff]  }
  0xf4   :  { %v2730_v38 = vrot.slane %v2729_v12, 7  ;;  %2868 = vmatpush1.bf16.msra.mxu1 %v9241_v18  ;;  %v565_v14 = vadd.f32 %v533_v40, %v10639_v45  ;;  %v661_v29 = vmul.f32 %v606_v55, %v10563_v60  ;;  %2899 = vmatprep.mubr.bf16.mxu1 %v12106_v2  ;;  %v1399_v15 = vmul.f32 %v10573_v62, %v606_v55 }
  0xf5   :  { %v10775_v46 = vpop.permute.xlu1 %481  ;;  %v1366_v42 = vadd.f32 %v1334_v48, %v10639_v45  ;;  %2869 = vmatprep.subr.bf16.mxu1 %v9249_v30  ;;  %v724_v58 = vrot.slane %v660_v39, 1  ;;  %v1108_v20 = vmul.f32 %v1054_v50, %v10558_v59  ;;  %v1109_v9 = vmul.f32 %v1054_v50, %v10563_v60 }
  0xf6   :  { %9198 = vset.pattern.permute.xlu1 %v12130_v6  ;;  %v1335_v6 = vmul.f32 %v10573_v62, %v10733_v22  ;;  %v1398_v22 = vmul.f32 %v10568_v61, %v606_v55  ;;  %v725_v1 = vrot.slane %v661_v29, 1  ;;  %v1782_v35 = vmul.f32 %v10568_v61, %v1054_v50 }
  0xf7   :  { %641 = vperm.xlu1 %9198, %v10701_v16   ;;  %v788_v8 = vadd.f32 %v724_v58, %v564_v36  ;;  %v8364_v18 = vrot.slane %v1399_v15, 9  ;;  %v1783_v12 = vmul.f32 %v10573_v62, %v1054_v50  ;;  %v1172_v3 = vrot.slane %v1108_v20, 3  ;;  %v9259_v36 = vld [vmem:[#allocation3 + $0x3f0] ss:$8 sps:$4 sm:$0xff]   ;;  %v9262_v58 = vld [vmem:[#allocation3 + $0x500] ss:$8 sps:$4 sm:$0xff]  }
  0xf8   :  { %v1367_v37 = vadd.f32 %v1335_v6, %v10639_v45  ;;  %v8363_v45 = vrot.slane %v1398_v22, 9  ;;  %2870 = vmatpush1.bf16.msra.mxu1 %v9247_v23  ;;  %v789_v55 = vadd.f32 %v725_v1, %v565_v14  ;;  %v1173_v30 = vrot.slane %v1109_v9, 3 }
  0xf9   :  { %v8427_v40 = vrot.slane %v1782_v35, 11  ;;  %2871 = vmatprep.subr.bf16.mxu1 %v9255_v63  ;;  %v1012_v60 = vadd.f32 %v948_v10, %v788_v8  ;;  %v8428_v39 = vrot.slane %v1783_v12, 11  ;;  %v2821_v29 = vrot.slane %v2820_v44, 7  ;;  %v9276_v35 = vld [vmem:[#allocation3 + $0x644] ss:$8 sps:$4 sm:$0xff]  }
  0xfa   :  { %v10804_v43 = vpop.permute.xlu1 %609  ;;  %v1558_v48 = vadd.f32 %v8363_v45, %v1366_v42  ;;  %v1559_v6 = vadd.f32 %v8364_v18, %v1367_v37  ;;  %v2728_v25 = vunpack.c.l.b16 %v1296_v57  ;;  %v2819_v23 = vunpack.c.l.b16 %v10784_v13  ;;  %v9267_v57 = vld [vmem:[#allocation3 + $0x514] ss:$8 sps:$4 sm:$0xff]   ;;  %v9265_v13 = vld [vmem:[#allocation3 + $0x510] ss:$8 sps:$4 sm:$0xff]   ;;  %v9274_v37 = vld [vmem:[#allocation3 + $0x640] ss:$8 sps:$4 sm:$0xff]  }
  0xfb   :  { %9201 = vset.pattern.permute.xlu1 %v12106_v2  ;;  %v1013_v2 = vadd.f32 %v949_v19, %v789_v55  ;;  %v1236_v50 = vadd.f32 %v1172_v3, %v1012_v60  ;;  %v165_v1 = vcombine.high %v10489_v34, %v10489_v34  ;;  %v534_v20 = vmul.f32 %v10775_v46, %v10558_v59  ;;  %v9279_v8 = vld [vmem:[#allocation3 + $0x654] ss:$8 sps:$4 sm:$0xff]  }
  0xfc   :  { %285 = vperm.xlu1 %9201, %v223_v7   ;;  %v1750_v15 = vadd.f32 %v8395_v33, %v1558_v48  ;;  %v1751_v7 = vadd.f32 %v8396_v32, %v1559_v6  ;;  %2872 = vmatpush1.bf16.msra.mxu1 %v9253_v0  ;;  %v2731_v63 = vsel %vm2547_vm0, %v2730_v38, %v2728_v25  ;;  %v9270_v25 = vld [vmem:[#allocation3 + $0x524] ss:$8 sps:$4 sm:$0xff]   ;;  %v12135_v34 = vmov 3   ;;  %v10839_v59 = vld [vmem:[%s12093_s0] sm:$0xf] }
  0xfd   :  { %v1237_v14 = vadd.f32 %v1173_v30, %v1013_v2  ;;  %2873 = vmatprep.subr.bf16.mxu1 %v9261_v26  ;;  %v2732_v19 = vpack.c.b16 %v2731_v63, %v2731_v63  ;;  %v1268_v42 = vmax.f32 %v1236_v50, 0.0  ;;  %v2822_v32 = vsel %vm2547_vm0, %v2821_v29, %v2819_v23  ;;  %v9268_v30 = vld [vmem:[#allocation3 + $0x520] ss:$8 sps:$4 sm:$0xff]   ;;  %v9273_v29 = vld [vmem:[#allocation3 + $0x534] ss:$8 sps:$4 sm:$0xff]  }
  0xfe   :  { %v10816_v10 = vadd.f32 %v8427_v40, %v1750_v15  ;;  %v10818_v44 = vadd.f32 %v8428_v39, %v1751_v7  ;;  %v1400_v2 = vmul.f32 %v10568_v61, %v10804_v43  ;;  %v1401_v9 = vmul.f32 %v10573_v62, %v10804_v43  ;;  %v9282_v23 = vld [vmem:[#allocation3 + $0x664] ss:$8 sps:$4 sm:$0xff]  }
  0xff   :  { %v10811_v22 = vpop.permute.xlu1 %253  ;;  %v1269_v33 = vmax.f32 %v1237_v14, 0.0  ;;  %8477 = vmatmul.mubr.msk.bf16.vlgmr.msra.gmra.mrb[0].mxu0 %vm2590_vm1, %v2732_v19  ;;  %v1336_v45 = vmul.f32 %v10568_v61, %v10775_v46  ;;  %v1337_v18 = vmul.f32 %v10573_v62, %v10775_v46  ;;  %v2823_v12 = vpack.c.b16 %v2822_v32, %v2822_v32  ;;  %v10846_v61 = vld [vmem:[%s12093_s0 + $0x4] sm:$0xf] }
 0x100   :  { %9202 = vset.pattern.permute.xlu1 %v10277_v21  ;;  %12134 = vst [vmem:[#allocation16_spill] sm:$0xff] %v10818_v44  ;;  %2874 = vmatpush1.bf16.msra.mxu1 %v9259_v36  ;;  %v1300_v26 = vpack.c.bf16 %v1268_v42, %v1268_v42  ;;  %v662_v3 = vmul.f32 %v10839_v59, %v10804_v43  ;;  %v12136_v40 = vmov 0   ;;  %v8365_v48 = vrot.slane %v1400_v2, 9  ;;  %v10855_v36 = vpop.permute.xlu0 %1065  ;;  %v10872_v2 = vld [vmem:[%s12094_s1 + $0x8] sm:$0xff] }
 0x101   :  { %865 = vperm.xlu1 %9202, %v10701_v16   ;;  %v1301_v0 = vpack.c.bf16 %v1269_v33, %v1269_v33  ;;  %2959 = vmatpush1.bf16.msra.mxu0 %v9262_v58  ;;  %v663_v62 = vmul.f32 %v10846_v61, %v10804_v43  ;;  %v8366_v6 = vrot.slane %v1401_v9, 9  ;;  %v1368_v60 = vadd.f32 %v1336_v45, %v10811_v22  ;;  %v9277_v58 = vld [vmem:[#allocation3 + $0x650] ss:$8 sps:$4 sm:$0xff]  }
 0x102   :  { %2960 = vmatprep.subr.bf16.mxu0 %v9267_v57  ;;  %2990 = vmatprep.mubr.bf16.mxu0 %v12136_v40  ;;  %v1369_v39 = vadd.f32 %v1337_v18, %v10811_v22  ;;  %v535_v43 = vmul.f32 %v10846_v61, %v10775_v46  ;;  %v566_v15 = vadd.f32 %v534_v20, %v10811_v22  ;;  %v2910_v57 = vunpack.c.l.b16 %v1300_v26  ;;  %v9271_v33 = vld [vmem:[#allocation3 + $0x530] ss:$8 sps:$4 sm:$0xff]   ;;  %v10866_v46 = vld [vmem:[%s12094_s1] sm:$0xff]  ;;  %v9291_v20 = vld [vmem:[#allocation3 + $0x784] ss:$8 sps:$4 sm:$0xff]  }
 0x103   :  { %v2911_v55 = vunpack.c.l.b16 %v1301_v0  ;;  %8486 = vmatmul.mubr.msk.bf16.vlgmr.msra.gmra.mrb[8].mxu1 %vm2590_vm1, %v2823_v12  ;;  %3049 = vmatprep.subr.bf16.mxu1 %v9276_v35  ;;  %v1560_v14 = vadd.f32 %v8365_v48, %v1368_v60  ;;  %v9280_v0 = vld [vmem:[#allocation3 + $0x660] ss:$8 sps:$4 sm:$0xff]   ;;  %v9285_v12 = vld [vmem:[#allocation3 + $0x674] ss:$8 sps:$4 sm:$0xff]  }
 0x104   :  { %v834_v38 = vpop.permute.xlu1 %833  ;;  %v1561_v63 = vadd.f32 %v8366_v6, %v1369_v39  ;;  %3050 = vmatpush1.bf16.msra.mxu1 %v9274_v37  ;;  %v567_v42 = vadd.f32 %v535_v43, %v10811_v22  ;;  %v727_v22 = vrot.slane %v663_v62, 1  ;;  %v227_v37 = vrot.slane %v165_v1, %v10368_v11  ;;  %3081 = vmatprep.mubr.bf16.mxu1 %v12136_v40  ;;  %v9289_v60 = vld [vmem:[#allocation3 + $0x780] ss:$8 sps:$4 sm:$0xff]   ;;  %v9283_v43 = vld [vmem:[#allocation3 + $0x670] ss:$8 sps:$4 sm:$0xff]  }
 0x105   :  { %9203 = vset.pattern.permute.xlu1 %v12135_v34  ;;  %v2912_v50 = vrot.slane %v2911_v55, 7  ;;  %2961 = vmatpush1.bf16.msra.mxu0 %v9265_v13  ;;  %v887_v19 = vmul.f32 %v10846_v61, %v834_v38  ;;  %v1592_v32 = vmul.f32 %v10866_v46, %v834_v38  ;;  %v1593_v13 = vmul.f32 %v10872_v2, %v834_v38  ;;  %v10886_v55 = vpop.permute.xlu0 %1069 }
 0x106   :  { %1089 = vperm.xlu1 %9203, %v10701_v16   ;;  %v886_v16 = vmul.f32 %v10839_v59, %v834_v38  ;;  %2962 = vmatprep.subr.bf16.mxu0 %v9270_v25  ;;  %v726_v25 = vrot.slane %v662_v3, 1  ;;  %v1582_v38 = vmul.f32 %v10866_v46, %v10545_v54  ;;  %v791_v62 = vadd.f32 %v727_v22, %v567_v42 }
 0x107   :  { %3051 = vmatprep.subr.bf16.mxu1 %v9279_v8  ;;  %v8397_v35 = vrot.slane %v1592_v32, 10  ;;  %v8398_v45 = vrot.slane %v1593_v13, 10  ;;  %v2913_v18 = vsel %vm2547_vm0, %v2912_v50, %v2910_v57  ;;  %v10884_v8 = vmul.f32 %v10872_v2, %v10545_v54 }
 0x108   :  { %v950_v9 = vrot.slane %v886_v16, 2  ;;  %v790_v26 = vadd.f32 %v726_v25, %v566_v15  ;;  %v951_v1 = vrot.slane %v887_v19, 2  ;;  %3052 = vmatpush1.bf16.msra.mxu1 %v9277_v58  ;;  %v2914_v39 = vpack.c.b16 %v2913_v18, %v2913_v18  ;;  %v9297_v15 = vld [vmem:[#allocation3 + $0x794] ss:$8 sps:$4 sm:$0xff]  }
 0x109   :  { %v1058_v7 = vpop.permute.xlu1 %1057  ;;  %2963 = vmatpush1.bf16.msra.mxu0 %v9268_v30  ;;  %v1752_v30 = vadd.f32 %v8397_v35, %v1560_v14  ;;  %v1753_v48 = vadd.f32 %v8398_v45, %v1561_v63  ;;  %3053 = vmatprep.subr.bf16.mxu1 %v9282_v23  ;;  %v10896_v58 = vmul.f32 %v10866_v46, %v10550_v56  ;;  %v9288_v63 = vld [vmem:[#allocation3 + $0x8c4] ss:$8 sps:$4 sm:$0xff]   ;;  %v9295_v45 = vld [vmem:[#allocation3 + $0x790] ss:$8 sps:$4 sm:$0xff]  }
 0x10a   :  { %9204 = vset.pattern.permute.xlu1 %v12136_v40  ;;  %2964 = vmatprep.subr.bf16.mxu0 %v9273_v29  ;;  %v1110_v6 = vmul.f32 %v10839_v59, %v1058_v7  ;;  %v1111_v50 = vmul.f32 %v10846_v61, %v1058_v7  ;;  %v1784_v54 = vmul.f32 %v10866_v46, %v1058_v7 }
 0x10b   :  { %517 = vperm.xlu1 %9204, %v10518_v47   ;;  %v1785_v29 = vmul.f32 %v10872_v2, %v1058_v7  ;;  %12137 = vst [vmem:[#allocation17_spill] sm:$0xff] %v10896_v58  ;;  %v10900_v16 = vmul.f32 %v10872_v2, %v10550_v56  ;;  %v1014_v23 = vadd.f32 %v950_v9, %v790_v26  ;;  %v10909_v56 = vsub.s32 4, %v10353_v5  ;;  %v614_v9 = vpop.permute.xlu0 %613 }
 0x10c   :  { %v1174_v14 = vrot.slane %v1110_v6, 3  ;;  %v1015_v19 = vadd.f32 %v951_v1, %v791_v62  ;;  %v1175_v57 = vrot.slane %v1111_v50, 3  ;;  %v8429_v42 = vrot.slane %v1784_v54, 11  ;;  %3054 = vmatpush1.bf16.msra.mxu1 %v9280_v0 }
 0x10d   :  { %12138 = vst [vmem:[#allocation18_spill] sm:$0xff] %v10900_v16  ;;  %2965 = vmatpush1.bf16.msra.mxu0 %v9271_v33  ;;  %v8430_v32 = vrot.slane %v1785_v29, 11  ;;  %v10906_v13 = vmul.f32 %v10839_v59, %v10855_v36  ;;  %3055 = vmatprep.subr.bf16.mxu1 %v9285_v12  ;;  %12139 = vst [vmem:[#allocation19_spill] sm:$0xff] %v10909_v56  ;;  %v8387_v0 = vrot.slane %v1582_v38, 10  ;;  %v9303_v38 = vld [vmem:[#allocation3 + $0x7a4] ss:$8 sps:$4 sm:$0xff]  }
 0x10e   :  { %v10888_v3 = vpop.permute.xlu1 %485  ;;  %3140 = vmatprep.subr.bf16.mxu0 %v9291_v20  ;;  %v1238_v25 = vadd.f32 %v1174_v14, %v1014_v23  ;;  %v1239_v33 = vadd.f32 %v1175_v57, %v1015_v19  ;;  %v10912_v22 = vadd.f32 %v8429_v42, %v1752_v30  ;;  %v10923_v26 = vmul.f32 %v10846_v61, %v10855_v36  ;;  %v9309_v14 = vld [vmem:[#allocation3 + $0x7b4] ss:$8 sps:$4 sm:$0xff]  }
 0x10f   :  { %289 = vperm.xlu1 %9204, %v227_v37   ;;  %v10914_v37 = vadd.f32 %v8430_v32, %v1753_v48  ;;  %v10926_v30 = vadd.f32 %v8387_v0, %v10616_v51  ;;  %v10930_v48 = vmul.f32 %v10866_v46, %v10855_v36  ;;  %v10934_v6 = vmul.f32 %v10872_v2, %v10855_v36  ;;  %v9301_v51 = vld [vmem:[#allocation3 + $0x7a0] ss:$8 sps:$4 sm:$0xff]   ;;  %v618_v42 = vpop.permute.xlu0 %617 }
 0x110   :  { %8495 = vmatmul.mubr.msk.bf16.vlgmr.msra.gmra.mrb[4].mxu0 %vm2590_vm1, %v2914_v39  ;;  %v1270_v35 = vmax.f32 %v1238_v25, 0.0  ;;  %v1271_v1 = vmax.f32 %v1239_v33, 0.0  ;;  %3056 = vmatpush1.bf16.msra.mxu1 %v9283_v43  ;;  %v1403_v29 = vmul.f32 %v10872_v2, %v614_v9  ;;  %v1339_v36 = vmul.f32 %v10872_v2, %v10888_v3 }
 0x111   :  { %3141 = vmatpush1.bf16.msra.mxu0 %v9289_v60  ;;  %3172 = vmatprep.mubr.bf16.mxu0 %v12136_v40  ;;  %v1402_v60 = vmul.f32 %v10866_v46, %v614_v9  ;;  %v10948_v57 = vmul.f32 %v10839_v59, %v614_v9  ;;  %v666_v18 = vmul.f32 %v10839_v59, %v618_v42 }
 0x112   :  { %v10902_v7 = vpop.permute.xlu1 %257  ;;  %3142 = vmatprep.subr.bf16.mxu0 %v9297_v15  ;;  %3231 = vmatprep.subr.bf16.mxu1 %v9288_v63  ;;  %v1303_v54 = vpack.c.bf16 %v1271_v1, %v1271_v1  ;;  %v1302_v43 = vpack.c.bf16 %v1270_v35, %v1270_v35  ;;  %v1338_v15 = vmul.f32 %v10866_v46, %v10888_v3 }
 0x113   :  { %521 = vperm.xlu1 %9204, %v10527_v49   ;;  %v8367_v23 = vrot.slane %v1402_v60, 9  ;;  %v1371_v0 = vadd.f32 %v1339_v36, %v10902_v7  ;;  %v536_v1 = vmul.f32 %v10839_v59, %v10888_v3  ;;  %v537_v60 = vmul.f32 %v10846_v61, %v10888_v3 }
 0x114   :  { %v3002_v19 = vunpack.c.l.b16 %v1303_v54  ;;  %v1370_v33 = vadd.f32 %v1338_v15, %v10902_v7  ;;  %v10959_v54 = vmul.f32 %v10846_v61, %v614_v9  ;;  %v9307_v15 = vld [vmem:[#allocation3 + $0x7b0] ss:$8 sps:$4 sm:$0xff]   ;;  %v1404_v25 = vmul.f32 %v10866_v46, %v618_v42  ;;  %v9312_v9 = vld [vmem:[#allocation3 + $0xa04] ss:$8 sps:$4 sm:$0xff]  }
 0x115   :  { %3143 = vmatpush1.bf16.msra.mxu0 %v9295_v45  ;;  %v1405_v3 = vmul.f32 %v10872_v2, %v618_v42 }
 0x116   :  { %v490_v62 = vpop.permute.xlu1 %489  ;;  %3144 = vmatprep.subr.bf16.mxu0 %v9303_v38  ;;  %v3003_v45 = vrot.slane %v3002_v19, 7  ;;  %v3001_v38 = vunpack.c.l.b16 %v1302_v43  ;;  %v667_v19 = vmul.f32 %v10846_v61, %v618_v42  ;;  %v729_v32 = vrot.slane %v10959_v54, 1  ;;  %v9294_v42 = vld [vmem:[#allocation3 + $0x8d4] ss:$8 sps:$4 sm:$0xff]  }
 0x117   :  { %9206 = vset.pattern.permute.xlu1 %v10277_v21  ;;  %v8368_v21 = vrot.slane %v1403_v29, 9  ;;  %v1562_v29 = vadd.f32 %v8367_v23, %v1370_v33  ;;  %v538_v43 = vmul.f32 %v10839_v59, %v490_v62  ;;  %v539_v23 = vmul.f32 %v10846_v61, %v490_v62 }
 0x118   :  { %869 = vperm.xlu1 %9206, %v10518_v47   ;;  %v1341_v33 = vmul.f32 %v10872_v2, %v490_v62  ;;  %v8369_v63 = vrot.slane %v1404_v25, 9  ;;  %v8370_v50 = vrot.slane %v1405_v3, 9  ;;  %v3004_v36 = vsel %vm2547_vm0, %v3003_v45, %v3001_v38 }
 0x119   :  { %v10961_v12 = vadd.f32 %v8368_v21, %v1371_v0  ;;  %3145 = vmatpush1.bf16.msra.mxu0 %v9301_v51  ;;  %v1340_v21 = vmul.f32 %v10866_v46, %v490_v62  ;;  %v9286_v0 = vld [vmem:[#allocation3 + $0x8c0] ss:$8 sps:$4 sm:$0xff]   ;;  %v730_v51 = vrot.slane %v666_v18, 1  ;;  %v731_v39 = vrot.slane %v667_v19, 1  ;;  %v9292_v19 = vld [vmem:[#allocation3 + $0x8d0] ss:$8 sps:$4 sm:$0xff]  }
 0x11a   :  { %3146 = vmatprep.subr.bf16.mxu0 %v9309_v14  ;;  %v1373_v5 = vadd.f32 %v1341_v33, %v10653_v31  ;;  %v570_v62 = vadd.f32 %v538_v43, %v10653_v31  ;;  %v571_v16 = vadd.f32 %v539_v23, %v10653_v31  ;;  %v3005_v14 = vpack.c.b16 %v3004_v36, %v3004_v36  ;;  %v9300_v23 = vld [vmem:[#allocation3 + $0x8e4] ss:$8 sps:$4 sm:$0xff]   ;;  %v9298_v33 = vld [vmem:[#allocation3 + $0x8e0] ss:$8 sps:$4 sm:$0xff]  }
 0x11b   :  { %v838_v35 = vpop.permute.xlu1 %837  ;;  %v1372_v20 = vadd.f32 %v1340_v21, %v10653_v31  ;;  %v568_v25 = vadd.f32 %v536_v1, %v10902_v7  ;;  %v569_v18 = vadd.f32 %v537_v60, %v10902_v7 }
 0x11c   :  { %873 = vperm.xlu1 %9206, %v10527_v49   ;;  %v1594_v54 = vmul.f32 %v10866_v46, %v838_v35  ;;  %v1565_v38 = vadd.f32 %v8370_v50, %v1373_v5  ;;  %8504 = vmatmul.mubr.msk.bf16.vlgmr.msra.gmra.mrb[12].mxu1 %vm2590_vm1, %v3005_v14  ;;  %v889_v3 = vmul.f32 %v10846_v61, %v838_v35  ;;  %v12113_v14 = vmax.f32 %v10644_v17, 0.0 }
 0x11d   :  { %v1564_v45 = vadd.f32 %v8369_v63, %v1372_v20  ;;  %3147 = vmatpush1.bf16.msra.mxu0 %v9307_v15  ;;  %v1595_v31 = vmul.f32 %v10872_v2, %v838_v35  ;;  %3232 = vmatpush1.bf16.msra.mxu1 %v9286_v0  ;;  %v794_v50 = vadd.f32 %v730_v51, %v570_v62  ;;  %v12140_v62 = vrot.slane %v10884_v8, 10 }
 0x11e   :  { %v8399_v36 = vrot.slane %v1594_v54, 10  ;;  %3322 = vmatprep.subr.bf16.mxu0 %v9312_v9  ;;  %v795_v63 = vadd.f32 %v731_v39, %v571_v16  ;;  %3233 = vmatprep.subr.bf16.mxu1 %v9294_v42  ;;  %v953_v56 = vrot.slane %v889_v3, 2  ;;  %v12145_v8 = vrot.slane %v10930_v48, 11 }
 0x11f   :  { %v842_v49 = vpop.permute.xlu1 %841  ;;  %v8400_v1 = vrot.slane %v1595_v31, 10  ;;  %3263 = vmatprep.mubr.bf16.mxu1 %v12136_v40  ;;  %v11002_v31 = vadd.f32 %v12140_v62, %v10618_v53  ;;  %v11033_v48 = vmul.f32 %v10839_v59, %v10689_v41 }
 0x120   :  { %9208 = vset.pattern.permute.xlu1 %v12135_v34  ;;  %v888_v34 = vmul.f32 %v10839_v59, %v838_v35  ;;  %v891_v7 = vmul.f32 %v10846_v61, %v842_v49  ;;  %v1596_v5 = vmul.f32 %v10866_v46, %v842_v49  ;;  %v1597_v20 = vmul.f32 %v10872_v2, %v842_v49 }
 0x121   :  { %1093 = vperm.xlu1 %9208, %v10518_v47   ;;  %v890_v47 = vmul.f32 %v10839_v59, %v842_v49  ;;  %v1754_v60 = vadd.f32 %v8399_v36, %v1562_v29  ;;  %v1755_v58 = vadd.f32 %v8400_v1, %v10961_v12  ;;  %v9306_v49 = vld [vmem:[#allocation3 + $0x8f4] ss:$8 sps:$4 sm:$0xff]   ;;  %v10995_v29 = vpop.permute.xlu0 %629  ;;  %3234 = vmatpush1.bf16.msra.mxu1 %v9292_v19  ;;  %v12142_v12 = vrot.slane %v10948_v57, 1 }
 0x122   :  { %v955_v15 = vrot.slane %v891_v7, 2  ;;  %v8401_v21 = vrot.slane %v1596_v5, 10  ;;  %v8402_v9 = vrot.slane %v1597_v20, 10  ;;  %v952_v54 = vrot.slane %v888_v34, 2  ;;  %3235 = vmatprep.subr.bf16.mxu1 %v9300_v23  ;;  %v9304_v23 = vld [vmem:[#allocation3 + $0x8f0] ss:$8 sps:$4 sm:$0xff]  }
 0x123   :  { %v954_v35 = vrot.slane %v890_v47, 2  ;;  %v12141_v34 = vmax.f32 %v10642_v4, 0.0  ;;  %v792_v36 = vadd.f32 %v12142_v12, %v568_v25  ;;  %v12144_v47 = vrot.slane %v10923_v26, 3 }
 0x124   :  { %v1062_v43 = vpop.permute.xlu1 %1061  ;;  %v1019_v51 = vadd.f32 %v955_v15, %v795_v63  ;;  %v1756_v16 = vadd.f32 %v8401_v21, %v1564_v45  ;;  %v1757_v39 = vadd.f32 %v8402_v9, %v1565_v38  ;;  %v793_v45 = vadd.f32 %v729_v32, %v569_v18  ;;  %v9324_v21 = vld [vmem:[#allocation3 + $0xb44] ss:$8 sps:$4 sm:$0xff]  }
 0x125   :  { %v1018_v0 = vadd.f32 %v954_v35, %v794_v50  ;;  %v11007_v3 = vrot.slane %v12141_v34, %v10368_v11  ;;  %v12143_v38 = vrot.slane %v10906_v13, 3  ;;  %v12147_v5 = vrot.slane %v10934_v6, 11  ;;  %3236 = vmatpush1.bf16.msra.mxu1 %v9298_v33  ;;  %v11044_v33 = vpop.permute.xlu0 %633 }
 0x126   :  { %v1243_v7 = vadd.f32 %v12144_v47, %v1019_v51  ;;  %v11017_v53 = vadd.f32 %v12145_v8, %v1756_v16  ;;  %v11026_v57 = vrot.slane %v12113_v14, %v10368_v11  ;;  %v1112_v32 = vmul.f32 %v10839_v59, %v1062_v43  ;;  %3237 = vmatprep.subr.bf16.mxu1 %v9306_v49 }
 0x127   :  { %v1242_v19 = vadd.f32 %v12143_v38, %v1018_v0  ;;  %v11021_v20 = vadd.f32 %v12147_v5, %v1757_v39  ;;  %v1113_v13 = vmul.f32 %v10846_v61, %v1062_v43  ;;  %v1786_v26 = vmul.f32 %v10866_v46, %v1062_v43 }
 0x128   :  { %12146 = vst [vmem:[#allocation20_spill] sm:$0xff] %v11017_v53  ;;  %v1016_v25 = vadd.f32 %v952_v54, %v792_v36  ;;  %v1017_v18 = vadd.f32 %v953_v56, %v793_v45  ;;  %v1275_v6 = vmax.f32 %v1243_v7, 0.0  ;;  %v1176_v50 = vrot.slane %v1112_v32, 3 }
 0x129   :  { %v10997_v42 = vpop.permute.xlu1 %493  ;;  %12148 = vst [vmem:[#allocation21_spill] sm:$0xff] %v11021_v20  ;;  %v1177_v63 = vrot.slane %v1113_v13, 3  ;;  %v1787_v1 = vmul.f32 %v10872_v2, %v1062_v43  ;;  %v8431_v35 = vrot.slane %v1786_v26, 11  ;;  %v11038_v9 = vmul.f32 %v10846_v61, %v10689_v41  ;;  %3238 = vmatpush1.bf16.msra.mxu1 %v9304_v23 }
 0x12a   :  { %v11042_v0 = vmul.f32 %v10866_v46, %v10689_v41  ;;  %v1274_v56 = vmax.f32 %v1242_v19, 0.0  ;;  %v1307_v54 = vpack.c.bf16 %v1275_v6, %v1275_v6  ;;  %v1240_v51 = vadd.f32 %v1176_v50, %v1016_v25  ;;  %3413 = vmatprep.subr.bf16.mxu1 %v9324_v21  ;;  %v266_v6 = vpop.permute.xlu0 %265  ;;  %v9322_v25 = vld [vmem:[#allocation3 + $0xb40] ss:$8 sps:$4 sm:$0xff]   ;;  %v9325_v21 = vld [vmem:[#allocation3 + $0xb50] ss:$8 sps:$4 sm:$0xff]  }
 0x12b   :  { %v1241_v16 = vadd.f32 %v1177_v63, %v1017_v18  ;;  %v8432_v39 = vrot.slane %v1787_v1, 11  ;;  %v11046_v43 = vadd.f32 %v8431_v35, %v1754_v60  ;;  %v11054_v34 = vmul.f32 %v10872_v2, %v10689_v41 }
 0x12c   :  { %v11058_v12 = vmul.f32 %v10839_v59, %v10886_v55  ;;  %v3184_v36 = vunpack.c.l.b16 %v1307_v54  ;;  %v1272_v45 = vmax.f32 %v1240_v51, 0.0  ;;  %v956_v19 = vrot.slane %v11033_v48, 2 }
 0x12d   :  { %v1273_v38 = vmax.f32 %v1241_v16, 0.0  ;;  %v11060_v60 = vadd.f32 %v8432_v39, %v1755_v58  ;;  %v957_v47 = vrot.slane %v11038_v9, 2  ;;  %v11066_v7 = vmul.f32 %v10846_v61, %v10886_v55 }
 0x12e   :  { %v622_v15 = vpop.permute.xlu1 %621  ;;  %v11070_v41 = vmul.f32 %v10872_v2, %v10886_v55  ;;  %v8403_v5 = vrot.slane %v11042_v0, 10  ;;  %v1306_v32 = vpack.c.bf16 %v1274_v56, %v1274_v56  ;;  %v1304_v13 = vpack.c.bf16 %v1272_v45, %v1272_v45 }
 0x12f   :  { %v1305_v58 = vpack.c.bf16 %v1273_v38, %v1273_v38  ;;  %v8404_v26 = vrot.slane %v11054_v34, 10  ;;  %v540_v18 = vmul.f32 %v10839_v59, %v10997_v42  ;;  %v1180_v23 = vrot.slane %v11058_v12, 3 }
 0x130   :  { %v3185_v50 = vrot.slane %v3184_v36, 7  ;;  %v541_v1 = vmul.f32 %v10846_v61, %v10997_v42  ;;  %v1181_v35 = vrot.slane %v11066_v7, 3  ;;  %v1342_v9 = vmul.f32 %v10866_v46, %v10997_v42 }
 0x131   :  { %v3093_v63 = vunpack.c.l.b16 %v1305_v58  ;;  %v1343_v0 = vmul.f32 %v10872_v2, %v10997_v42  ;;  %v3183_v56 = vunpack.c.l.b16 %v1306_v32  ;;  %v3092_v54 = vunpack.c.l.b16 %v1304_v13  ;;  %v9327_v42 = vld [vmem:[#allocation3 + $0xb54] ss:$8 sps:$4 sm:$0xff]  }
 0x132   :  { %v572_v16 = vadd.f32 %v540_v18, %v266_v6  ;;  %v1374_v34 = vadd.f32 %v1342_v9, %v266_v6  ;;  %v668_v36 = vmul.f32 %v10839_v59, %v622_v15  ;;  %v669_v45 = vmul.f32 %v10846_v61, %v622_v15 }
 0x133   :  { %v498_v8 = vpop.permute.xlu1 %497  ;;  %v3094_v51 = vrot.slane %v3093_v63, 7  ;;  %v1375_v12 = vadd.f32 %v1343_v0, %v266_v6  ;;  %v573_v38 = vadd.f32 %v541_v1, %v266_v6  ;;  %v1406_v7 = vmul.f32 %v10866_v46, %v622_v15 }
 0x134   :  { %v1407_v58 = vmul.f32 %v10872_v2, %v622_v15  ;;  %v3186_v14 = vsel %vm2547_vm0, %v3185_v50, %v3183_v56  ;;  %v732_v32 = vrot.slane %v668_v36, 1  ;;  %v733_v13 = vrot.slane %v669_v45, 1  ;;  %v9310_v50 = vld [vmem:[#allocation3 + $0xa00] ss:$8 sps:$4 sm:$0xff]  }
 0x135   :  { %v3187_v63 = vpack.c.b16 %v3186_v14, %v3186_v14  ;;  %v542_v18 = vmul.f32 %v10839_v59, %v498_v8  ;;  %v8371_v9 = vrot.slane %v1406_v7, 9  ;;  %v543_v62 = vmul.f32 %v10846_v61, %v498_v8 }
 0x136   :  { %v8372_v0 = vrot.slane %v1407_v58, 9  ;;  %v1344_v49 = vmul.f32 %v10866_v46, %v498_v8  ;;  %v796_v6 = vadd.f32 %v732_v32, %v572_v16  ;;  %v797_v1 = vadd.f32 %v733_v13, %v573_v38  ;;  %v9315_v58 = vld [vmem:[#allocation3 + $0xa14] ss:$8 sps:$4 sm:$0xff]   ;;  %v9313_v32 = vld [vmem:[#allocation3 + $0xa10] ss:$8 sps:$4 sm:$0xff]  }
 0x137   :  { %8522 = vmatmul.mubr.msk.bf16.vlgmr.msra.gmra.mrb[16].mxu1 %vm2590_vm1, %v3187_v63  ;;  %v1345_v15 = vmul.f32 %v10872_v2, %v498_v8  ;;  %v3095_v56 = vsel %vm2547_vm0, %v3094_v51, %v3092_v54  ;;  %v1566_v45 = vadd.f32 %v8371_v9, %v1374_v34  ;;  %v9330_v8 = vld [vmem:[#allocation3 + $0xb64] ss:$8 sps:$4 sm:$0xff]  }
 0x138   :  { %v626_v39 = vpop.permute.xlu1 %625  ;;  %v1567_v14 = vadd.f32 %v8372_v0, %v1375_v12  ;;  %v3096_v48 = vpack.c.b16 %v3095_v56, %v3095_v56  ;;  %3414 = vmatpush1.bf16.msra.mxu1 %v9322_v25  ;;  %v1020_v20 = vadd.f32 %v956_v19, %v796_v6  ;;  %v1021_v53 = vadd.f32 %v957_v47, %v797_v1  ;;  %v9318_v12 = vld [vmem:[#allocation3 + $0xa24] ss:$8 sps:$4 sm:$0xff]   ;;  %v9328_v25 = vld [vmem:[#allocation3 + $0xb60] ss:$8 sps:$4 sm:$0xff]  }
 0x139   :  { %v670_v7 = vmul.f32 %v10839_v59, %v626_v39  ;;  %v671_v16 = vmul.f32 %v10846_v61, %v626_v39  ;;  %v1408_v38 = vmul.f32 %v10866_v46, %v626_v39  ;;  %3415 = vmatprep.subr.bf16.mxu1 %v9327_v42  ;;  %v11101_v13 = vadd.f32 %v8403_v5, %v1566_v45  ;;  %v11107_v42 = vpop.permute.xlu0 %277  ;;  %v9333_v5 = vld [vmem:[#allocation3 + $0xb74] ss:$8 sps:$4 sm:$0xff]  }
 0x13a   :  { %v1759_v54 = vadd.f32 %v8404_v26, %v1567_v14  ;;  %8513 = vmatmul.mubr.msk.bf16.vlgmr.msra.gmra.mrb[8].mxu0 %vm2590_vm1, %v3096_v48  ;;  %v1409_v34 = vmul.f32 %v10872_v2, %v626_v39  ;;  %3445 = vmatprep.mubr.bf16.mxu1 %v12136_v40  ;;  %v1244_v19 = vadd.f32 %v1180_v23, %v1020_v20  ;;  %v12150_v26 = vrot.slane %v11070_v41, 11  ;;  %v9316_v23 = vld [vmem:[#allocation3 + $0xa20] ss:$8 sps:$4 sm:$0xff]   ;;  %v9321_v14 = vld [vmem:[#allocation3 + $0xa34] ss:$8 sps:$4 sm:$0xff]  }
 0x13b   :  { %12149 = vst [vmem:[#allocation22_spill] sm:$0xff] %v11101_v13  ;;  %v734_v51 = vrot.slane %v670_v7, 1  ;;  %v1245_v47 = vadd.f32 %v1181_v35, %v1021_v53  ;;  %3323 = vmatpush1.bf16.msra.mxu0 %v9310_v50  ;;  %v735_v63 = vrot.slane %v671_v16, 1  ;;  %v8373_v9 = vrot.slane %v1408_v38, 9  ;;  %3354 = vmatprep.mubr.bf16.mxu0 %v12136_v40  ;;  %v9331_v16 = vld [vmem:[#allocation3 + $0xb70] ss:$8 sps:$4 sm:$0xff]  }
 0x13c   :  { %v11111_v48 = vadd.f32 %v12150_v26, %v1759_v54  ;;  %v8374_v0 = vrot.slane %v1409_v34, 9  ;;  %3324 = vmatprep.subr.bf16.mxu0 %v9315_v58  ;;  %3416 = vmatpush1.bf16.msra.mxu1 %v9325_v21  ;;  %v1276_v20 = vmax.f32 %v1244_v19, 0.0  ;;  %v9336_v21 = vld [vmem:[#allocation3 + $0xdc4] ss:$8 sps:$4 sm:$0xff]  }
 0x13d   :  { %v270_v36 = vpop.permute.xlu1 %269  ;;  %v1277_v53 = vmax.f32 %v1245_v47, 0.0  ;;  %3417 = vmatprep.subr.bf16.mxu1 %v9330_v8  ;;  %v11126_v19 = vpop.permute.xlu0 %281 }
 0x13e   :  { %12151 = vst [vmem:[#allocation23_spill] sm:$0xff] %v11111_v48  ;;  %v574_v39 = vadd.f32 %v542_v18, %v270_v36  ;;  %v575_v6 = vadd.f32 %v543_v62, %v270_v36  ;;  %v1376_v35 = vadd.f32 %v1344_v49, %v270_v36  ;;  %v1377_v50 = vadd.f32 %v1345_v15, %v270_v36  ;;  %v9355_v48 = vld [vmem:[#allocation3 + $0xcb0] ss:$8 sps:$4 sm:$0xff]  }
 0x13f   :  { %v1308_v38 = vpack.c.bf16 %v1276_v20, %v1276_v20  ;;  %v1309_v58 = vpack.c.bf16 %v1277_v53, %v1277_v53  ;;  %3325 = vmatpush1.bf16.msra.mxu0 %v9313_v32  ;;  %v12153_v20 = vpack.c.bf16 %v11007_v3, %v11007_v3  ;;  %v1411_v3 = vmul.f32 %v10872_v2, %v10995_v29 }
 0x140   :  { %v798_v56 = vadd.f32 %v734_v51, %v574_v39  ;;  %v799_v45 = vadd.f32 %v735_v63, %v575_v6  ;;  %v1568_v62 = vadd.f32 %v8373_v9, %v1376_v35  ;;  %v1569_v18 = vadd.f32 %v8374_v0, %v1377_v50  ;;  %3326 = vmatprep.subr.bf16.mxu0 %v9318_v12  ;;  %v9319_v51 = vld [vmem:[#allocation3 + $0xa30] ss:$8 sps:$4 sm:$0xff]   ;;  %v11131_v0 = vld [vmem:[%s12093_s0] sm:$0xf]  ;;  %v11137_v6 = vld [vmem:[%s12093_s0 + $0x4] sm:$0xf] }
 0x141   :  { %3418 = vmatpush1.bf16.msra.mxu1 %v9328_v25  ;;  %v3274_v32 = vunpack.c.l.b16 %v1308_v38  ;;  %v3275_v8 = vunpack.c.l.b16 %v1309_v58  ;;  %v11144_v53 = vunpack.c.l.b16 %v12153_v20 }
 0x142   :  { %v850_v1 = vpop.permute.xlu1 %849  ;;  %3419 = vmatprep.subr.bf16.mxu1 %v9333_v5 }
 0x143   :  { %v894_v7 = vmul.f32 %v10839_v59, %v850_v1  ;;  %v895_v41 = vmul.f32 %v10846_v61, %v850_v1  ;;  %v1600_v49 = vmul.f32 %v10866_v46, %v850_v1  ;;  %v1601_v15 = vmul.f32 %v10872_v2, %v850_v1  ;;  %3327 = vmatpush1.bf16.msra.mxu0 %v9316_v23 }
 0x144   :  { %v12152_v59 = vmax.f32 %v10737_v52, 0.0  ;;  %v11124_v61 = vmul.f32 %v10866_v46, %v10995_v29  ;;  %v3276_v26 = vrot.slane %v3275_v8, 7  ;;  %12154 = vst [vmem:[#allocation24_spill] sm:$0xff] %v11144_v53  ;;  %3328 = vmatprep.subr.bf16.mxu0 %v9321_v14 }
 0x145   :  { %v958_v54 = vrot.slane %v894_v7, 2  ;;  %v959_v34 = vrot.slane %v895_v41, 2  ;;  %v8405_v9 = vrot.slane %v1600_v49, 10  ;;  %v8406_v25 = vrot.slane %v1601_v15, 10  ;;  %3420 = vmatpush1.bf16.msra.mxu1 %v9331_v16  ;;  %v11162_v15 = vpop.permute.xlu0 %861 }
 0x146   :  { %v11120_v36 = vrot.slane %v12152_v59, %v10368_v11  ;;  %3595 = vmatprep.subr.bf16.mxu1 %v9336_v21  ;;  %v12156_v16 = vmax.f32 %v10744_v28, 0.0 }
 0x147   :  { %v1074_v12 = vpop.permute.xlu1 %1073  ;;  %v1022_v47 = vadd.f32 %v958_v54, %v798_v56  ;;  %v1023_v63 = vadd.f32 %v959_v34, %v799_v45  ;;  %v1760_v23 = vadd.f32 %v8405_v9, %v1568_v62  ;;  %v1761_v35 = vadd.f32 %v8406_v25, %v1569_v18  ;;  %v9339_v56 = vld [vmem:[#allocation3 + $0xc84] ss:$8 sps:$4 sm:$0xff]   ;;  %3329 = vmatpush1.bf16.msra.mxu0 %v9319_v51  ;;  %v9345_v51 = vld [vmem:[#allocation3 + $0xc94] ss:$8 sps:$4 sm:$0xff]  }
 0x148   :  { %v1118_v39 = vmul.f32 %v11131_v0, %v1074_v12  ;;  %v1119_v5 = vmul.f32 %v11137_v6, %v1074_v12  ;;  %v1792_v1 = vmul.f32 %v10866_v46, %v1074_v12  ;;  %v1793_v50 = vmul.f32 %v10872_v2, %v1074_v12  ;;  %3504 = vmatprep.subr.bf16.mxu0 %v9339_v56  ;;  %v9343_v56 = vld [vmem:[#allocation3 + $0xc90] ss:$8 sps:$4 sm:$0xff]  }
 0x149   :  { %v3277_v45 = vsel %vm2547_vm0, %v3276_v26, %v3274_v32  ;;  %v12155_v46 = vpack.c.bf16 %v11026_v57, %v11026_v57  ;;  %v11158_v54 = vrot.slane %v12156_v16, %v10368_v11  ;;  %v9337_v57 = vld [vmem:[#allocation3 + $0xc80] ss:$8 sps:$4 sm:$0xff]   ;;  %v12116_v2 = vmax.f32 %v10747_v27, 0.0 }
 0x14a   :  { %v1182_v7 = vrot.slane %v1118_v39, 3  ;;  %v1183_v41 = vrot.slane %v1119_v5, 3  ;;  %v8437_v38 = vrot.slane %v1792_v1, 11  ;;  %v3278_v14 = vpack.c.b16 %v3277_v45, %v3277_v45  ;;  %v11181_v26 = vld [vmem:[%s12094_s1] sm:$0xff] }
 0x14b   :  { %v11151_v58 = vunpack.c.l.b16 %v12155_v46  ;;  %v8438_v62 = vrot.slane %v1793_v50, 11  ;;  %v11169_v32 = vmul.f32 %v11131_v0, %v10995_v29  ;;  %v11175_v12 = vmul.f32 %v11137_v6, %v10995_v29  ;;  %v11190_v29 = vld [vmem:[%s12094_s1 + $0x8] sm:$0xff] }
 0x14c   :  { %v502_v18 = vpop.permute.xlu1 %501  ;;  %v1246_v34 = vadd.f32 %v1182_v7, %v1022_v47  ;;  %v1247_v49 = vadd.f32 %v1183_v41, %v1023_v63  ;;  %v11160_v21 = vadd.f32 %v8437_v38, %v1760_v23  ;;  %v8375_v47 = vrot.slane %v11124_v61, 9  ;;  %8531 = vmatmul.mubr.msk.bf16.vlgmr.msra.gmra.mrb[12].mxu0 %vm2590_vm1, %v3278_v14  ;;  %v9351_v46 = vld [vmem:[#allocation3 + $0xca4] ss:$8 sps:$4 sm:$0xff]  }
 0x14d   :  { %v11171_v8 = vadd.f32 %v8438_v62, %v1761_v35  ;;  %v8376_v25 = vrot.slane %v1411_v3, 9  ;;  %v1412_v39 = vmul.f32 %v11181_v26, %v11044_v33  ;;  %v1346_v5 = vmul.f32 %v11181_v26, %v502_v18  ;;  %3505 = vmatpush1.bf16.msra.mxu0 %v9337_v57  ;;  %3536 = vmatprep.mubr.bf16.mxu0 %v12136_v40 }
 0x14e   :  { %12157 = vst [vmem:[#allocation25_spill] sm:$0xff] %v11160_v21  ;;  %v1278_v63 = vmax.f32 %v1246_v34, 0.0  ;;  %v1279_v9 = vmax.f32 %v1247_v49, 0.0  ;;  %v1347_v61 = vmul.f32 %v11190_v29, %v502_v18  ;;  %v736_v45 = vrot.slane %v11169_v32, 1  ;;  %3506 = vmatprep.subr.bf16.mxu0 %v9345_v51  ;;  %v1082_v34 = vpop.permute.xlu0 %1081 }
 0x14f   :  { %12158 = vst [vmem:[#allocation26_spill] sm:$0xff] %v11171_v8  ;;  %v1413_v7 = vmul.f32 %v11190_v29, %v11044_v33  ;;  %v737_v3 = vrot.slane %v11175_v12, 1  ;;  %v11202_v14 = vmul.f32 %v11131_v0, %v11044_v33  ;;  %v544_v16 = vmul.f32 %v11131_v0, %v502_v18 }
 0x150   :  { %v274_v1 = vpop.permute.xlu1 %273  ;;  %v1310_v35 = vpack.c.bf16 %v1278_v63, %v1278_v63  ;;  %v1311_v50 = vpack.c.bf16 %v1279_v9, %v1279_v9  ;;  %v11208_v49 = vmul.f32 %v11137_v6, %v11044_v33  ;;  %v8377_v57 = vrot.slane %v1412_v39, 9 }
 0x151   :  { %v1378_v41 = vadd.f32 %v1346_v5, %v274_v1  ;;  %v1379_v38 = vadd.f32 %v1347_v61, %v274_v1  ;;  %v545_v5 = vmul.f32 %v11137_v6, %v502_v18  ;;  %v576_v61 = vadd.f32 %v544_v16, %v274_v1  ;;  %3507 = vmatpush1.bf16.msra.mxu0 %v9343_v56  ;;  %v9334_v18 = vld [vmem:[#allocation3 + $0xdc0] ss:$8 sps:$4 sm:$0xff]   ;;  %v9357_v56 = vld [vmem:[#allocation3 + $0xcb4] ss:$8 sps:$4 sm:$0xff]  }
 0x152   :  { %v3366_v62 = vunpack.c.l.b16 %v1311_v50  ;;  %v3365_v63 = vunpack.c.l.b16 %v1310_v35  ;;  %v9349_v50 = vld [vmem:[#allocation3 + $0xca0] ss:$8 sps:$4 sm:$0xff]   ;;  %v8378_v20 = vrot.slane %v1413_v7, 9  ;;  %v11218_v33 = vmul.f32 %v11131_v0, %v1082_v34  ;;  %3508 = vmatprep.subr.bf16.mxu0 %v9351_v46  ;;  %v9342_v16 = vld [vmem:[#allocation3 + $0xdd4] ss:$8 sps:$4 sm:$0xff]  }
 0x153   :  { %v11210_v32 = vadd.f32 %v8375_v47, %v1378_v41  ;;  %v11212_v51 = vadd.f32 %v8376_v25, %v1379_v38  ;;  %v577_v47 = vadd.f32 %v545_v5, %v274_v1  ;;  %v11223_v35 = vmul.f32 %v11137_v6, %v1082_v34 }
 0x154   :  { %v506_v12 = vpop.permute.xlu1 %505  ;;  %v3367_v9 = vrot.slane %v3366_v62, 7  ;;  %v11231_v1 = vrot.slane %v12116_v2, %v10368_v11  ;;  %v739_v2 = vrot.slane %v11208_v49, 1 }
 0x155   :  { %v1348_v23 = vmul.f32 %v11181_v26, %v506_v12  ;;  %v1349_v59 = vmul.f32 %v11190_v29, %v506_v12  ;;  %v546_v25 = vmul.f32 %v11131_v0, %v506_v12  ;;  %v547_v7 = vmul.f32 %v11137_v6, %v506_v12  ;;  %3509 = vmatpush1.bf16.msra.mxu0 %v9349_v50 }
 0x156   :  { %v3368_v39 = vsel %vm2547_vm0, %v3367_v9, %v3365_v63  ;;  %v738_v63 = vrot.slane %v11202_v14, 1  ;;  %v800_v9 = vadd.f32 %v736_v45, %v576_v61  ;;  %v801_v27 = vadd.f32 %v737_v3, %v577_v47  ;;  %v9340_v45 = vld [vmem:[#allocation3 + $0xdd0] ss:$8 sps:$4 sm:$0xff]   ;;  %3510 = vmatprep.subr.bf16.mxu0 %v9357_v56 }
 0x157   :  { %v1380_v41 = vadd.f32 %v1348_v23, %v11107_v42  ;;  %v1381_v38 = vadd.f32 %v1349_v59, %v11107_v42  ;;  %v3369_v62 = vpack.c.b16 %v3368_v39, %v3368_v39  ;;  %v9360_v39 = vld [vmem:[#allocation3 + $0xf04] ss:$8 sps:$4 sm:$0xff]   ;;  %v1186_v61 = vrot.slane %v11218_v33, 3 }
 0x158   :  { %v1187_v50 = vrot.slane %v11223_v35, 3 }
 0x159   :  { %v854_v5 = vpop.permute.xlu1 %853  ;;  %v1572_v12 = vadd.f32 %v8377_v57, %v1380_v41  ;;  %v1573_v13 = vadd.f32 %v8378_v20, %v1381_v38  ;;  %8540 = vmatmul.mubr.msk.bf16.vlgmr.msra.gmra.mrb[20].mxu1 %vm2590_vm1, %v3369_v62  ;;  %v578_v57 = vadd.f32 %v546_v25, %v11107_v42  ;;  %v579_v20 = vadd.f32 %v547_v7, %v11107_v42  ;;  %v9348_v41 = vld [vmem:[#allocation3 + $0xde4] ss:$8 sps:$4 sm:$0xff]  }
 0x15a   :  { %v896_v59 = vmul.f32 %v11131_v0, %v854_v5  ;;  %v897_v23 = vmul.f32 %v11137_v6, %v854_v5  ;;  %v1602_v46 = vmul.f32 %v11181_v26, %v854_v5  ;;  %v1603_v14 = vmul.f32 %v11190_v29, %v854_v5  ;;  %3596 = vmatpush1.bf16.msra.mxu1 %v9334_v18 }
 0x15b   :  { %3597 = vmatprep.subr.bf16.mxu1 %v9342_v16  ;;  %3627 = vmatprep.mubr.bf16.mxu1 %v12136_v40  ;;  %v1796_v38 = vmul.f32 %v11181_v26, %v1082_v34  ;;  %v1797_v18 = vmul.f32 %v11190_v29, %v1082_v34  ;;  %v802_v5 = vadd.f32 %v738_v63, %v578_v57 }
 0x15c   :  { %v8407_v3 = vrot.slane %v1602_v46, 10  ;;  %v8408_v49 = vrot.slane %v1603_v14, 10  ;;  %3511 = vmatpush1.bf16.msra.mxu0 %v9355_v48  ;;  %v960_v56 = vrot.slane %v896_v59, 2  ;;  %v961_v25 = vrot.slane %v897_v23, 2  ;;  %v9346_v46 = vld [vmem:[#allocation3 + $0xde0] ss:$8 sps:$4 sm:$0xff]  }
 0x15d   :  { %v858_v47 = vpop.permute.xlu1 %857  ;;  %3686 = vmatprep.subr.bf16.mxu0 %v9360_v39  ;;  %v803_v34 = vadd.f32 %v739_v2, %v579_v20  ;;  %v9354_v23 = vld [vmem:[#allocation3 + $0xdf4] ss:$8 sps:$4 sm:$0xff]   ;;  %v8441_v52 = vrot.slane %v1796_v38, 11  ;;  %v8442_v39 = vrot.slane %v1797_v18, 11  ;;  %v9352_v2 = vld [vmem:[#allocation3 + $0xdf0] ss:$8 sps:$4 sm:$0xff]  }
 0x15e   :  { %v898_v42 = vmul.f32 %v11131_v0, %v858_v47  ;;  %v899_v33 = vmul.f32 %v11137_v6, %v858_v47  ;;  %v1762_v35 = vadd.f32 %v8407_v3, %v11210_v32  ;;  %v1763_v7 = vadd.f32 %v8408_v49, %v11212_v51  ;;  %3598 = vmatpush1.bf16.msra.mxu1 %v9340_v45 }
 0x15f   :  { %v1604_v62 = vmul.f32 %v11181_v26, %v858_v47  ;;  %v1605_v16 = vmul.f32 %v11190_v29, %v858_v47  ;;  %3599 = vmatprep.subr.bf16.mxu1 %v9348_v41  ;;  %v1024_v8 = vadd.f32 %v960_v56, %v800_v9  ;;  %v1025_v32 = vadd.f32 %v961_v25, %v801_v27  ;;  %v9372_v9 = vld [vmem:[#allocation3 + $0x1044] ss:$8 sps:$4 sm:$0xff]  }
 0x160   :  { %v962_v48 = vrot.slane %v898_v42, 2  ;;  %v963_v59 = vrot.slane %v899_v33, 2 }
 0x161   :  { %v8409_v14 = vrot.slane %v1604_v62, 10  ;;  %v8410_v28 = vrot.slane %v1605_v16, 10 }
 0x162   :  { %v1026_v3 = vadd.f32 %v962_v48, %v802_v5  ;;  %v1027_v51 = vadd.f32 %v963_v59, %v803_v34  ;;  %v1078_v49 = vpop.permute.xlu1 %1077  ;;  %3600 = vmatpush1.bf16.msra.mxu1 %v9346_v46  ;;  %v1086_v46 = vpop.permute.xlu0 %1085  ;;  %v11277_v5 = vmul.f32 %v11181_v26, %v11162_v15  ;;  %v11281_v34 = vmul.f32 %v11190_v29, %v11162_v15 }
 0x163   :  { %v1764_v21 = vadd.f32 %v8409_v14, %v1572_v12  ;;  %v1765_v53 = vadd.f32 %v8410_v28, %v1573_v13  ;;  %v1120_v45 = vmul.f32 %v11131_v0, %v1078_v49  ;;  %v1121_v63 = vmul.f32 %v11137_v6, %v1078_v49  ;;  %3601 = vmatprep.subr.bf16.mxu1 %v9354_v23 }
 0x164   :  { %v1250_v57 = vadd.f32 %v1186_v61, %v1026_v3  ;;  %v1251_v20 = vadd.f32 %v1187_v50, %v1027_v51  ;;  %v1794_v41 = vmul.f32 %v11181_v26, %v1078_v49  ;;  %v1795_v47 = vmul.f32 %v11190_v29, %v1078_v49 }
 0x165   :  { %v11258_v27 = vadd.f32 %v8441_v52, %v1764_v21  ;;  %v11260_v38 = vadd.f32 %v8442_v39, %v1765_v53  ;;  %v1184_v12 = vrot.slane %v1120_v45, 3  ;;  %v1185_v28 = vrot.slane %v1121_v63, 3 }
 0x166   :  { %v12122_v13 = vmax.f32 %v10818_v44, 0.0  ;;  %v1283_v18 = vmax.f32 %v1251_v20, 0.0  ;;  %v8439_v56 = vrot.slane %v1794_v41, 11  ;;  %v8440_v25 = vrot.slane %v1795_v47, 11  ;;  %3602 = vmatpush1.bf16.msra.mxu1 %v9352_v2 }
 0x167   :  { %v11265_v61 = vmul.f32 %v11131_v0, %v11162_v15  ;;  %v11269_v50 = vmul.f32 %v11137_v6, %v11162_v15  ;;  %v1248_v42 = vadd.f32 %v1184_v12, %v1024_v8  ;;  %v1249_v52 = vadd.f32 %v1185_v28, %v1025_v32  ;;  %v510_v21 = vpop.permute.xlu1 %509  ;;  %3777 = vmatprep.subr.bf16.mxu1 %v9372_v9 }
 0x168   :  { %v1282_v53 = vmax.f32 %v1250_v57, 0.0  ;;  %v1315_v33 = vpack.c.bf16 %v1283_v18, %v1283_v18  ;;  %v11271_v62 = vadd.f32 %v8439_v56, %v1762_v35  ;;  %v11273_v16 = vadd.f32 %v8440_v25, %v1763_v7 }
 0x169   :  { %v1280_v8 = vmax.f32 %v1248_v42, 0.0  ;;  %v1281_v48 = vmax.f32 %v1249_v52, 0.0  ;;  %v12161_v59 = vpack.c.bf16 %v11120_v36, %v11120_v36  ;;  %v12162_v35 = vmax.f32 %v10758_v24, 0.0 }
 0x16a   :  { %12159 = vst [vmem:[#allocation27_spill] sm:$0xff] %v11271_v62  ;;  %12160 = vst [vmem:[#allocation28_spill] sm:$0xff] %v11273_v16  ;;  %v3548_v39 = vunpack.c.l.b16 %v1315_v33  ;;  %v12163_v15 = vmax.f32 %v10816_v10, 0.0  ;;  %v11303_v36 = vrot.slane %v12122_v13, %v10368_v11  ;;  %v1124_v51 = vmul.f32 %v11131_v0, %v1086_v46  ;;  %v9375_v13 = vld [vmem:[#allocation3 + $0x1054] ss:$8 sps:$4 sm:$0xff]  }
 0x16b   :  { %v11286_v23 = vunpack.c.l.b16 %v12161_v59  ;;  %v11291_v7 = vrot.slane %v12162_v35, %v10368_v11  ;;  %v1313_v3 = vpack.c.bf16 %v1281_v48, %v1281_v48  ;;  %v964_v49 = vrot.slane %v11265_v61, 2 }
 0x16c   :  { %v11298_v32 = vrot.slane %v12163_v15, %v10368_v11  ;;  %v965_v45 = vrot.slane %v11269_v50, 2  ;;  %v1314_v63 = vpack.c.bf16 %v1282_v53, %v1282_v53  ;;  %v1312_v2 = vpack.c.bf16 %v1280_v8, %v1280_v8  ;;  %v638_v57 = vpop.permute.xlu1 %637 }
 0x16d   :  { %v8411_v20 = vrot.slane %v11277_v5, 10  ;;  %v8412_v41 = vrot.slane %v11281_v34, 10  ;;  %v3457_v47 = vunpack.c.l.b16 %v1313_v3  ;;  %v548_v9 = vmul.f32 %v11131_v0, %v510_v21 }
 0x16e   :  { %v3549_v12 = vrot.slane %v3548_v39, 7  ;;  %v549_v28 = vmul.f32 %v11137_v6, %v510_v21  ;;  %v1125_v18 = vmul.f32 %v11137_v6, %v1086_v46  ;;  %v1798_v56 = vmul.f32 %v11181_v26, %v1086_v46 }
 0x16f   :  { %v1350_v25 = vmul.f32 %v11181_v26, %v510_v21  ;;  %v676_v61 = vmul.f32 %v11131_v0, %v638_v57  ;;  %v1188_v50 = vrot.slane %v1124_v51, 3  ;;  %v1799_v42 = vmul.f32 %v11190_v29, %v1086_v46  ;;  %v9370_v51 = vld [vmem:[#allocation3 + $0x1040] ss:$8 sps:$4 sm:$0xff]  }
 0x170   :  { %v3547_v52 = vunpack.c.l.b16 %v1314_v63  ;;  %v3456_v53 = vunpack.c.l.b16 %v1312_v2  ;;  %v1351_v33 = vmul.f32 %v11190_v29, %v510_v21  ;;  %v677_v5 = vmul.f32 %v11137_v6, %v638_v57 }
 0x171   :  { %v3458_v34 = vrot.slane %v3457_v47, 7  ;;  %v580_v8 = vadd.f32 %v548_v9, %v11126_v19  ;;  %v740_v48 = vrot.slane %v676_v61, 1  ;;  %v1414_v59 = vmul.f32 %v11181_v26, %v638_v57  ;;  %v11321_v35 = vpop.permute.xlu1 %513 }
 0x172   :  { %v581_v39 = vadd.f32 %v549_v28, %v11126_v19  ;;  %v741_v15 = vrot.slane %v677_v5, 1  ;;  %v1415_v3 = vmul.f32 %v11190_v29, %v638_v57  ;;  %v3550_v46 = vsel %vm2547_vm0, %v3549_v12, %v3547_v52  ;;  %v9358_v57 = vld [vmem:[#allocation3 + $0xf00] ss:$8 sps:$4 sm:$0xff]  }
 0x173   :  { %v1382_v21 = vadd.f32 %v1350_v25, %v11126_v19  ;;  %v804_v63 = vadd.f32 %v740_v48, %v580_v8  ;;  %v8379_v2 = vrot.slane %v1414_v59, 9  ;;  %v3551_v47 = vpack.c.b16 %v3550_v46, %v3550_v46  ;;  %v9363_v59 = vld [vmem:[#allocation3 + $0xf14] ss:$8 sps:$4 sm:$0xff]  }
 0x174   :  { %v1383_v9 = vadd.f32 %v1351_v33, %v11126_v19  ;;  %v805_v61 = vadd.f32 %v741_v15, %v581_v39  ;;  %v8380_v14 = vrot.slane %v1415_v3, 9  ;;  %v1189_v16 = vrot.slane %v1125_v18, 3  ;;  %v9373_v19 = vld [vmem:[#allocation3 + $0x1050] ss:$8 sps:$4 sm:$0xff]  }
 0x175   :  { %v1574_v44 = vadd.f32 %v8379_v2, %v1382_v21  ;;  %v1028_v62 = vadd.f32 %v964_v49, %v804_v63  ;;  %v8443_v28 = vrot.slane %v1798_v56, 11  ;;  %8558 = vmatmul.mubr.msk.bf16.vlgmr.msra.gmra.mrb[24].mxu1 %vm2590_vm1, %v3551_v47  ;;  %v3459_v12 = vsel %vm2547_vm0, %v3458_v34, %v3456_v53  ;;  %v11370_v63 = vpop.permute.xlu0 %645  ;;  %v9381_v2 = vld [vmem:[#allocation3 + $0x1074] ss:$8 sps:$4 sm:$0xff]  }
 0x176   :  { %v1575_v52 = vadd.f32 %v8380_v14, %v1383_v9  ;;  %v1029_v5 = vadd.f32 %v965_v45, %v805_v61  ;;  %v8444_v25 = vrot.slane %v1799_v42, 11  ;;  %v3460_v8 = vpack.c.b16 %v3459_v12, %v3459_v12  ;;  %v11330_v48 = vpop.permute.xlu1 %641  ;;  %3778 = vmatpush1.bf16.msra.mxu1 %v9370_v51  ;;  %3809 = vmatprep.mubr.bf16.mxu1 %v12136_v40  ;;  %v9378_v45 = vld [vmem:[#allocation3 + $0x1064] ss:$8 sps:$4 sm:$0xff]   ;;  %v9364_v12 = vld [vmem:[#allocation3 + $0xf20] ss:$8 sps:$4 sm:$0xff]  }
 0x177   :  { %v12164_v49 = vpack.c.bf16 %v11158_v54, %v11158_v54  ;;  %v2360_v56 = vpack.c.bf16 %v11291_v7, %v11291_v7  ;;  %v1252_v53 = vadd.f32 %v1188_v50, %v1028_v62  ;;  %v1766_v14 = vadd.f32 %v8411_v20, %v1574_v44  ;;  %3779 = vmatprep.subr.bf16.mxu1 %v9375_v13  ;;  %v9361_v13 = vld [vmem:[#allocation3 + $0xf10] ss:$8 sps:$4 sm:$0xff]   ;;  %v9376_v50 = vld [vmem:[#allocation3 + $0x1060] ss:$8 sps:$4 sm:$0xff]  }
 0x178   :  { %v12127_v42 = vmax.f32 %v10912_v22, 0.0  ;;  %v1253_v33 = vadd.f32 %v1189_v16, %v1029_v5  ;;  %v1767_v34 = vadd.f32 %v8412_v41, %v1575_v52  ;;  %8549 = vmatmul.mubr.msk.bf16.vlgmr.msra.gmra.mrb[16].mxu0 %vm2590_vm1, %v3460_v8  ;;  %v1416_v39 = vmul.f32 %v11181_v26, %v11330_v48  ;;  %v9366_v41 = vld [vmem:[#allocation3 + $0xf24] ss:$8 sps:$4 sm:$0xff]  }
 0x179   :  { %v11336_v18 = vunpack.c.l.b16 %v12164_v49  ;;  %v12165_v54 = vpack.c.bf16 %v11231_v1, %v11231_v1  ;;  %v1284_v3 = vmax.f32 %v1252_v53, 0.0  ;;  %v11349_v7 = vadd.f32 %v8443_v28, %v1766_v14  ;;  %3687 = vmatpush1.bf16.msra.mxu0 %v9358_v57  ;;  %3718 = vmatprep.mubr.bf16.mxu0 %v12136_v40  ;;  %v9369_v49 = vld [vmem:[#allocation3 + $0xf34] ss:$8 sps:$4 sm:$0xff]  }
 0x17a   :  { %v1417_v44 = vmul.f32 %v11190_v29, %v11330_v48  ;;  %v2366_v62 = vpack.c.bf16 %v11298_v32, %v11298_v32  ;;  %v2368_v16 = vpack.c.bf16 %v11303_v36, %v11303_v36  ;;  %v1285_v20 = vmax.f32 %v1253_v33, 0.0  ;;  %3688 = vmatprep.subr.bf16.mxu0 %v9363_v59  ;;  %3780 = vmatpush1.bf16.msra.mxu1 %v9373_v19 }
 0x17b   :  { %v11347_v15 = vunpack.c.l.b16 %v12165_v54  ;;  %12166 = vst [vmem:[#allocation29_spill] sm:$0xff] %v11349_v7  ;;  %v11358_v1 = vadd.f32 %v8444_v25, %v1767_v34  ;;  %v11360_v46 = vunpack.c.l.b16 %v2360_v56  ;;  %v11364_v51 = vmul.f32 %v11181_v26, %v10886_v55  ;;  %v286_v36 = vpop.permute.xlu1 %285  ;;  %3781 = vmatprep.subr.bf16.mxu1 %v9378_v45  ;;  %v9379_v56 = vld [vmem:[#allocation3 + $0x1070] ss:$8 sps:$4 sm:$0xff]   ;;  %v9384_v34 = vld [vmem:[#allocation3 + $0x12c4] ss:$8 sps:$4 sm:$0xff]  }
 0x17c   :  { %v1352_v21 = vmul.f32 %v11181_v26, %v11321_v35  ;;  %v1353_v32 = vmul.f32 %v11190_v29, %v11321_v35  ;;  %v12126_v47 = vmax.f32 %v10914_v37, 0.0  ;;  %v11376_v9 = vrot.slane %v12127_v42, %v10368_v11 }
 0x17d   :  { %12167 = vst [vmem:[#allocation30_spill] sm:$0xff] %v11358_v1  ;;  %12168 = vst [vmem:[#allocation31_spill] sm:$0xff] %v11364_v51  ;;  %v1317_v55 = vpack.c.bf16 %v1285_v20, %v1285_v20  ;;  %v8381_v61 = vrot.slane %v1416_v39, 9  ;;  %v1316_v28 = vpack.c.bf16 %v1284_v3, %v1284_v3  ;;  %v8382_v57 = vrot.slane %v1417_v44, 9  ;;  %3689 = vmatpush1.bf16.msra.mxu0 %v9361_v13  ;;  %v9367_v20 = vld [vmem:[#allocation3 + $0xf30] ss:$8 sps:$4 sm:$0xff]  }
 0x17e   :  { %v1384_v52 = vadd.f32 %v1352_v21, %v286_v36  ;;  %v1385_v5 = vadd.f32 %v1353_v32, %v286_v36  ;;  %v11378_v25 = vunpack.c.l.b16 %v2366_v62  ;;  %v11380_v8 = vunpack.c.l.b16 %v2368_v16  ;;  %3690 = vmatprep.subr.bf16.mxu0 %v9366_v41  ;;  %3782 = vmatpush1.bf16.msra.mxu1 %v9376_v50  ;;  %v650_v50 = vpop.permute.xlu0 %649  ;;  %v9390_v51 = vld [vmem:[#allocation3 + $0x12d4] ss:$8 sps:$4 sm:$0xff]  }
 0x17f   :  { %v3639_v59 = vunpack.c.l.b16 %v1317_v55  ;;  %v550_v19 = vmul.f32 %v11131_v0, %v11321_v35  ;;  %v551_v53 = vmul.f32 %v11137_v6, %v11321_v35  ;;  %v678_v14 = vmul.f32 %v11131_v0, %v11330_v48  ;;  %3783 = vmatprep.subr.bf16.mxu1 %v9381_v2 }
 0x180   :  { %12169 = vst [vmem:[#allocation32_spill] sm:$0xff] %v11378_v25  ;;  %v1576_v45 = vadd.f32 %v8381_v61, %v1384_v52  ;;  %v1577_v33 = vadd.f32 %v8382_v57, %v1385_v5  ;;  %v11391_v39 = vrot.slane %v12126_v47, %v10368_v11  ;;  %v679_v44 = vmul.f32 %v11137_v6, %v11330_v48  ;;  %v866_v41 = vpop.permute.xlu1 %865  ;;  %v9387_v48 = vld [vmem:[#allocation3 + $0x1184] ss:$8 sps:$4 sm:$0xff]  }
 0x181   :  { %v3640_v3 = vrot.slane %v3639_v59, 7  ;;  %v3638_v13 = vunpack.c.l.b16 %v1316_v28  ;;  %v582_v62 = vadd.f32 %v550_v19, %v286_v36  ;;  %v583_v16 = vadd.f32 %v551_v53, %v286_v36  ;;  %3691 = vmatpush1.bf16.msra.mxu0 %v9364_v12 }
 0x182   :  { %3692 = vmatprep.subr.bf16.mxu0 %v9369_v49  ;;  %v902_v32 = vmul.f32 %v11131_v0, %v866_v41  ;;  %v903_v2 = vmul.f32 %v11137_v6, %v866_v41  ;;  %v1608_v55 = vmul.f32 %v11181_v26, %v866_v41  ;;  %3784 = vmatpush1.bf16.msra.mxu1 %v9379_v56  ;;  %v742_v61 = vrot.slane %v678_v14, 1  ;;  %v9385_v14 = vld [vmem:[#allocation3 + $0x1180] ss:$8 sps:$4 sm:$0xff]  }
 0x183   :  { %v1609_v28 = vmul.f32 %v11190_v29, %v866_v41  ;;  %v3641_v36 = vsel %vm2547_vm0, %v3640_v3, %v3638_v13  ;;  %v11406_v57 = vmul.f32 %v11131_v0, %v11370_v63  ;;  %3959 = vmatprep.subr.bf16.mxu1 %v9384_v34  ;;  %v743_v12 = vrot.slane %v679_v44, 1 }
 0x184   :  { %v966_v52 = vrot.slane %v902_v32, 2  ;;  %v8413_v5 = vrot.slane %v1608_v55, 10  ;;  %v3642_v59 = vpack.c.b16 %v3641_v36, %v3641_v36  ;;  %v967_v19 = vrot.slane %v903_v2, 2  ;;  %v11423_v36 = vpop.permute.xlu0 %293 }
 0x185   :  { %3693 = vmatpush1.bf16.msra.mxu0 %v9367_v20  ;;  %v8414_v49 = vrot.slane %v1609_v28, 10  ;;  %v11410_v56 = vmul.f32 %v11137_v6, %v11370_v63  ;;  %v11414_v53 = vmul.f32 %v11181_v26, %v11370_v63  ;;  %v806_v3 = vadd.f32 %v742_v61, %v582_v62  ;;  %v1090_v34 = vpop.permute.xlu1 %1089  ;;  %v9393_v20 = vld [vmem:[#allocation3 + $0x1194] ss:$8 sps:$4 sm:$0xff]  }
 0x186   :  { %v807_v13 = vadd.f32 %v743_v12, %v583_v16  ;;  %v1768_v41 = vadd.f32 %v8413_v5, %v1576_v45  ;;  %v11418_v44 = vmul.f32 %v11190_v29, %v11370_v63  ;;  %3868 = vmatprep.subr.bf16.mxu0 %v9387_v48  ;;  %v1126_v2 = vmul.f32 %v11131_v0, %v1090_v34  ;;  %v9391_v12 = vld [vmem:[#allocation3 + $0x1190] ss:$8 sps:$4 sm:$0xff]  }
 0x187   :  { %v1769_v32 = vadd.f32 %v8414_v49, %v1577_v33  ;;  %v1127_v55 = vmul.f32 %v11137_v6, %v1090_v34  ;;  %v1800_v28 = vmul.f32 %v11181_v26, %v1090_v34  ;;  %v1030_v54 = vadd.f32 %v966_v52, %v806_v3  ;;  %v9399_v3 = vld [vmem:[#allocation3 + $0x11a4] ss:$8 sps:$4 sm:$0xff]   ;;  %v12174_v52 = vld [vmem:[#allocation19_spill] sm:$0xff] }
 0x188   :  { %8567 = vmatmul.mubr.msk.bf16.vlgmr.msra.gmra.mrb[20].mxu0 %vm2590_vm1, %v3642_v59  ;;  %v1801_v45 = vmul.f32 %v11190_v29, %v1090_v34  ;;  %v11428_v62 = vmul.f32 %v11131_v0, %v650_v50  ;;  %v11431_v63 = vmul.f32 %v11137_v6, %v650_v50  ;;  %v1031_v33 = vadd.f32 %v967_v19, %v807_v13 }
 0x189   :  { %v1190_v16 = vrot.slane %v1126_v2, 3  ;;  %v1191_v48 = vrot.slane %v1127_v55, 3  ;;  %v8445_v61 = vrot.slane %v1800_v28, 11  ;;  %3869 = vmatpush1.bf16.msra.mxu0 %v9385_v14  ;;  %3900 = vmatprep.mubr.bf16.mxu0 %v12136_v40  ;;  %v744_v59 = vrot.slane %v11406_v57, 1  ;;  %v1098_v14 = vpop.permute.xlu0 %1097 }
 0x18a   :  { %v8446_v5 = vrot.slane %v1801_v45, 11  ;;  %3870 = vmatprep.subr.bf16.mxu0 %v9393_v20  ;;  %v518_v19 = vpop.permute.xlu1 %517  ;;  %v8384_v55 = vrot.slane %v11418_v44, 9  ;;  %v11444_v28 = vmul.f32 %v11181_v26, %v650_v50  ;;  %v11447_v57 = vmul.f32 %v11190_v29, %v650_v50  ;;  %v12172_v50 = vld [vmem:[#allocation17_spill] sm:$0xff] }
 0x18b   :  { %v1254_v34 = vadd.f32 %v1190_v16, %v1030_v54  ;;  %v1255_v47 = vadd.f32 %v1191_v48, %v1031_v33  ;;  %v11437_v42 = vadd.f32 %v8445_v61, %v1768_v41  ;;  %v9397_v33 = vld [vmem:[#allocation3 + $0x11a0] ss:$8 sps:$4 sm:$0xff]   ;;  %v1354_v16 = vmul.f32 %v11181_v26, %v518_v19  ;;  %v9405_v48 = vld [vmem:[#allocation3 + $0x11b4] ss:$8 sps:$4 sm:$0xff]  }
 0x18c   :  { %v11440_v2 = vadd.f32 %v8446_v5, %v1769_v32  ;;  %v1355_v32 = vmul.f32 %v11190_v29, %v518_v19  ;;  %v11454_v44 = vmul.f32 %v11131_v0, %v1098_v14  ;;  %v12173_v61 = vrot.slane %v12172_v50, 11  ;;  %v12176_v41 = vld [vmem:[#allocation18_spill] sm:$0xff] }
 0x18d   :  { %12170 = vst [vmem:[#allocation33_spill] sm:$0xff] %v11437_v42  ;;  %v1286_v20 = vmax.f32 %v1254_v34, 0.0  ;;  %v1287_v45 = vmax.f32 %v1255_v47, 0.0  ;;  %3871 = vmatpush1.bf16.msra.mxu0 %v9391_v12  ;;  %v12175_v12 = vmax.f32 %v10644_v17, 0.0  ;;  %v12177_v54 = vrot.slane %v12176_v41, 11 }
 0x18e   :  { %12171 = vst [vmem:[#allocation34_spill] sm:$0xff] %v11440_v2  ;;  %3872 = vmatprep.subr.bf16.mxu0 %v9399_v3  ;;  %v11459_v5 = vadd.f32 %v12173_v61, %v10926_v30  ;;  %v290_v35 = vpop.permute.xlu1 %289  ;;  %v552_v3 = vmul.f32 %v11131_v0, %v518_v19  ;;  %v11471_v42 = vmul.f32 %v11137_v6, %v1098_v14  ;;  %v12178_v30 = vmax.f32 %v10642_v4, 0.0  ;;  %v9403_v41 = vld [vmem:[#allocation3 + $0x11b0] ss:$8 sps:$4 sm:$0xff]   ;;  %v9411_v2 = vld [vmem:[#allocation3 + $0x44] ss:$8 sps:$4 sm:$0xff]  }
 0x18f   :  { %v1318_v47 = vpack.c.bf16 %v1286_v20, %v1286_v20  ;;  %v1319_v34 = vpack.c.bf16 %v1287_v45, %v1287_v45  ;;  %v2061_v21 = vrot.slane %v12175_v12, %v12174_v52  ;;  %v11467_v13 = vadd.f32 %v12177_v54, %v11002_v31 }
 0x190   :  { %v1386_v49 = vadd.f32 %v1354_v16, %v290_v35  ;;  %v2053_v20 = vrot.slane %v12178_v30, %v12174_v52  ;;  %v553_v50 = vmul.f32 %v11137_v6, %v518_v19  ;;  %v1387_v17 = vadd.f32 %v1355_v32, %v290_v35 }
 0x191   :  { %v3730_v45 = vunpack.c.l.b16 %v1319_v34  ;;  %3873 = vmatpush1.bf16.msra.mxu0 %v9397_v33  ;;  %v584_v31 = vadd.f32 %v552_v3, %v290_v35  ;;  %v11481_v12 = vmul.f32 %v11181_v26, %v1098_v14  ;;  %v3729_v4 = vunpack.c.l.b16 %v1318_v47 }
 0x192   :  { %3874 = vmatprep.subr.bf16.mxu0 %v9405_v48  ;;  %v585_v34 = vadd.f32 %v553_v50, %v290_v35  ;;  %v522_v7 = vpop.permute.xlu1 %521  ;;  %v2357_v19 = vpack.c.bf16 %v2061_v21, %v2061_v21  ;;  %v2355_v61 = vpack.c.bf16 %v2053_v20, %v2053_v20  ;;  %v11489_v1 = vmul.f32 %v11190_v29, %v1098_v14  ;;  %v9382_v48 = vld [vmem:[#allocation3 + $0x12c0] ss:$8 sps:$4 sm:$0xff]  }
 0x193   :  { %v3731_v30 = vrot.slane %v3730_v45, 7  ;;  %v554_v32 = vmul.f32 %v11131_v0, %v522_v7  ;;  %v555_v33 = vmul.f32 %v11137_v6, %v522_v7  ;;  %v1356_v54 = vmul.f32 %v11181_v26, %v522_v7 }
 0x194   :  { %v4736_v47 = vunpack.c.l.b16 %v2357_v19  ;;  %v808_v35 = vadd.f32 %v744_v59, %v584_v31  ;;  %v1357_v21 = vmul.f32 %v11190_v29, %v522_v7  ;;  %v12179_v20 = vrot.slane %v11410_v56, 1 }
 0x195   :  { %v3732_v16 = vsel %vm2547_vm0, %v3731_v30, %v3729_v4  ;;  %3875 = vmatpush1.bf16.msra.mxu0 %v9403_v41  ;;  %v586_v25 = vadd.f32 %v554_v32, %v11423_v36  ;;  %v587_v4 = vadd.f32 %v555_v33, %v11423_v36  ;;  %v12180_v30 = vrot.slane %v11414_v53, 9  ;;  %v9388_v32 = vld [vmem:[#allocation3 + $0x12d0] ss:$8 sps:$4 sm:$0xff]  }
 0x196   :  { %v3733_v45 = vpack.c.b16 %v3732_v16, %v3732_v16  ;;  %4688 = vmatprep.subr.bf16.mxu0 %v9411_v2  ;;  %v809_v3 = vadd.f32 %v12179_v20, %v585_v34  ;;  %v4739_v14 = vrot.slane %v4736_v47, 7  ;;  %v1579_v19 = vadd.f32 %v8384_v55, %v1387_v17  ;;  %v9396_v17 = vld [vmem:[#allocation3 + $0x12e4] ss:$8 sps:$4 sm:$0xff]  }
 0x197   :  { %v1578_v41 = vadd.f32 %v12180_v30, %v1386_v49  ;;  %v870_v7 = vpop.permute.xlu1 %869  ;;  %v4734_v59 = vunpack.c.l.b16 %v2355_v61  ;;  %v4737_v31 = vrot.slane %v11151_v58, 7  ;;  %v1388_v2 = vadd.f32 %v1356_v54, %v11423_v36 }
 0x198   :  { %8576 = vmatmul.mubr.msk.bf16.vlgmr.msra.gmra.mrb[28].mxu1 %vm2590_vm1, %v3733_v45  ;;  %v904_v56 = vmul.f32 %v11131_v0, %v870_v7  ;;  %v905_v16 = vmul.f32 %v11137_v6, %v870_v7  ;;  %v1610_v34 = vmul.f32 %v11181_v26, %v870_v7  ;;  %v1389_v53 = vadd.f32 %v1357_v21, %v11423_v36 }
 0x199   :  { %3960 = vmatpush1.bf16.msra.mxu1 %v9382_v48  ;;  %v1611_v49 = vmul.f32 %v11190_v29, %v870_v7  ;;  %v8450_v55 = vrot.slane %v11489_v1, 11  ;;  %3991 = vmatprep.mubr.bf16.mxu1 %v12136_v40  ;;  %v11510_v58 = vsel %vm2547_vm0, %v4739_v14, %v4734_v59  ;;  %v12181_v61 = vrot.slane %v11428_v62, 1 }
 0x19a   :  { %3961 = vmatprep.subr.bf16.mxu1 %v9390_v51  ;;  %v12182_v33 = vrot.slane %v11431_v63, 1  ;;  %v8415_v47 = vrot.slane %v1610_v34, 10  ;;  %v968_v21 = vrot.slane %v904_v56, 2  ;;  %v969_v45 = vrot.slane %v905_v16, 2  ;;  %v12183_v51 = vld [vmem:[#allocation24_spill] sm:$0xff] }
 0x19b   :  { %v810_v54 = vadd.f32 %v12181_v61, %v586_v25  ;;  %v8416_v20 = vrot.slane %v1611_v49, 10  ;;  %v874_v1 = vpop.permute.xlu1 %873  ;;  %v11519_v30 = vsel %vm2547_vm0, %v4737_v31, %v12183_v51  ;;  %v9394_v63 = vld [vmem:[#allocation3 + $0x12e0] ss:$8 sps:$4 sm:$0xff]   ;;  %v12185_v59 = vrot.slane %v11447_v57, 9  ;;  %v9402_v31 = vld [vmem:[#allocation3 + $0x12f4] ss:$8 sps:$4 sm:$0xff]  }
 0x19c   :  { %v811_v48 = vadd.f32 %v12182_v33, %v587_v4  ;;  %v906_v40 = vmul.f32 %v11131_v0, %v874_v1  ;;  %v907_v14 = vmul.f32 %v11137_v6, %v874_v1  ;;  %v1612_v25 = vmul.f32 %v11181_v26, %v874_v1 }
 0x19d   :  { %v1613_v62 = vmul.f32 %v11190_v29, %v874_v1  ;;  %3962 = vmatpush1.bf16.msra.mxu1 %v9388_v32  ;;  %v12184_v4 = vrot.slane %v11444_v28, 9  ;;  %v1581_v56 = vadd.f32 %v12185_v59, %v1389_v53  ;;  %v1770_v16 = vadd.f32 %v8415_v47, %v1578_v41 }
 0x19e   :  { %v1771_v34 = vadd.f32 %v8416_v20, %v1579_v19  ;;  %3963 = vmatprep.subr.bf16.mxu1 %v9396_v17  ;;  %v970_v49 = vrot.slane %v906_v40, 2  ;;  %v971_v61 = vrot.slane %v907_v14, 2  ;;  %v8417_v33 = vrot.slane %v1612_v25, 10  ;;  %v9400_v19 = vld [vmem:[#allocation3 + $0x12f0] ss:$8 sps:$4 sm:$0xff]  }
 0x19f   :  { %v1580_v7 = vadd.f32 %v12184_v4, %v1388_v2  ;;  %v8418_v51 = vrot.slane %v1613_v62, 10  ;;  %v1032_v50 = vadd.f32 %v968_v21, %v808_v35  ;;  %v1033_v36 = vadd.f32 %v969_v45, %v809_v3  ;;  %v9408_v21 = vld [vmem:[#allocation3 + $0x184] ss:$8 sps:$4 sm:$0xff]  }
 0x1a0   :  { %v1966_v1 = vmax.f32 %v11459_v5, 0.0  ;;  %v12186_v32 = vmax.f32 %v11467_v13, 0.0  ;;  %v1034_v2 = vadd.f32 %v970_v49, %v810_v54  ;;  %v1035_v4 = vadd.f32 %v971_v61, %v811_v48  ;;  %v1094_v41 = vpop.permute.xlu1 %1093  ;;  %v9415_v5 = vld [vmem:[#allocation3 + $0x50] ss:$8 sps:$4 sm:$0xff]  }
 0x1a1   :  { %v1772_v57 = vadd.f32 %v8417_v33, %v1580_v7  ;;  %v1773_v53 = vadd.f32 %v8418_v51, %v1581_v56  ;;  %3964 = vmatpush1.bf16.msra.mxu1 %v9394_v63  ;;  %v1128_v17 = vmul.f32 %v11131_v0, %v1094_v41  ;;  %v1129_v47 = vmul.f32 %v11137_v6, %v1094_v41  ;;  %v12192_v51 = vld [vmem:[#allocation25_spill] sm:$0xff] }
 0x1a2   :  { %v2045_v28 = vrot.slane %v12186_v32, %v12174_v52  ;;  %v1802_v35 = vmul.f32 %v11181_v26, %v1094_v41  ;;  %v1803_v3 = vmul.f32 %v11190_v29, %v1094_v41  ;;  %3965 = vmatprep.subr.bf16.mxu1 %v9402_v31  ;;  %v12187_v45 = vrot.slane %v11454_v44, 3 }
 0x1a3   :  { %v12188_v54 = vrot.slane %v11471_v42, 3  ;;  %v12189_v40 = vrot.slane %v11481_v12, 11  ;;  %v11545_v25 = vadd.f32 %v8450_v55, %v1773_v53  ;;  %v1192_v0 = vrot.slane %v1128_v17, 3  ;;  %v12195_v53 = vld [vmem:[#allocation26_spill] sm:$0xff] }
 0x1a4   :  { %v1258_v20 = vadd.f32 %v12187_v45, %v1034_v2  ;;  %v1193_v6 = vrot.slane %v1129_v47, 3  ;;  %v8447_v62 = vrot.slane %v1802_v35, 11  ;;  %v8448_v26 = vrot.slane %v1803_v3, 11 }
 0x1a5   :  { %v1259_v48 = vadd.f32 %v12188_v54, %v1035_v4  ;;  %v11543_v14 = vadd.f32 %v12189_v40, %v1772_v57  ;;  %v2372_v29 = vpack.c.bf16 %v11391_v39, %v11391_v39  ;;  %v12190_v44 = vmax.f32 %v11046_v43, 0.0  ;;  %3966 = vmatpush1.bf16.msra.mxu1 %v9400_v19 }
 0x1a6   :  { %v1290_v7 = vmax.f32 %v1258_v20, 0.0  ;;  %v1256_v59 = vadd.f32 %v1192_v0, %v1032_v50  ;;  %v1257_v12 = vadd.f32 %v1193_v6, %v1033_v36  ;;  %v11552_v56 = vadd.f32 %v8447_v62, %v1770_v16  ;;  %4905 = vmatprep.subr.bf16.mxu1 %v9408_v21  ;;  %v12193_v16 = vld [vmem:[#allocation20_spill] sm:$0xff] }
 0x1a7   :  { %v2129_v63 = vrot.slane %v12190_v44, %v10368_v11  ;;  %v1291_v42 = vmax.f32 %v1259_v48, 0.0  ;;  %v11554_v55 = vadd.f32 %v8448_v26, %v1771_v34  ;;  %v12191_v31 = vmax.f32 %v11060_v60, 0.0  ;;  %v12194_v34 = vld [vmem:[#allocation21_spill] sm:$0xff]  ;;  %v9406_v44 = vld [vmem:[#allocation3 + $0x180] ss:$8 sps:$4 sm:$0xff]  }
 0x1a8   :  { %v1322_v61 = vpack.c.bf16 %v1290_v7, %v1290_v7  ;;  %v2037_v33 = vrot.slane %v1966_v1, %v12174_v52  ;;  %v1984_v32 = vmax.f32 %v12192_v51, 0.0  ;;  %v1288_v2 = vmax.f32 %v1256_v59, 0.0  ;;  %v9414_v59 = vld [vmem:[#allocation3 + $0x194] ss:$8 sps:$4 sm:$0xff]  }
 0x1a9   :  { %v2137_v49 = vrot.slane %v12191_v31, %v10368_v11  ;;  %v1323_v39 = vpack.c.bf16 %v1291_v42, %v1291_v42  ;;  %v1289_v50 = vmax.f32 %v1257_v12, 0.0  ;;  %v2353_v36 = vpack.c.bf16 %v2045_v28, %v2045_v28  ;;  %v12197_v12 = vld [vmem:[#allocation13_spill] sm:$0xff] }
 0x1aa   :  { %v1980_v4 = vmax.f32 %v12193_v16, 0.0  ;;  %v1981_v57 = vmax.f32 %v12194_v34, 0.0  ;;  %v1985_v41 = vmax.f32 %v12195_v53, 0.0  ;;  %v12196_v17 = vpack.c.bf16 %v11376_v9, %v11376_v9 }
 0x1ab   :  { %v3912_v19 = vunpack.c.l.b16 %v1323_v39  ;;  %v11571_v35 = vunpack.c.l.b16 %v2372_v29  ;;  %v1320_v3 = vpack.c.bf16 %v1288_v2, %v1288_v2  ;;  %v1321_v21 = vpack.c.bf16 %v1289_v50, %v1289_v50 }
 0x1ac   :  { %v11569_v47 = vunpack.c.l.b16 %v12196_v17  ;;  %v2374_v45 = vpack.c.bf16 %v2129_v63, %v2129_v63  ;;  %v3911_v20 = vunpack.c.l.b16 %v1322_v61  ;;  %v2351_v28 = vpack.c.bf16 %v2037_v33, %v2037_v33  ;;  %v9409_v17 = vld [vmem:[#allocation3 + $0x40] ss:$8 sps:$4 sm:$0xff]  }
 0x1ad   :  { %v3913_v54 = vrot.slane %v3912_v19, 7  ;;  %v2376_v48 = vpack.c.bf16 %v2137_v49, %v2137_v49  ;;  %v11576_v40 = vrot.slane %v1984_v32, %v10368_v11  ;;  %v3821_v0 = vunpack.c.l.b16 %v1321_v21 }
 0x1ae   :  { %v4519_v6 = vunpack.c.l.b16 %v2353_v36  ;;  %v11581_v9 = vrot.slane %v1980_v4, %v10368_v11  ;;  %v11586_v62 = vrot.slane %v1981_v57, %v10368_v11  ;;  %v2185_v26 = vrot.slane %v1985_v41, %v10368_v11 }
 0x1af   :  { %v3914_v29 = vsel %vm2547_vm0, %v3913_v54, %v3911_v20  ;;  %v3820_v63 = vunpack.c.l.b16 %v1320_v3  ;;  %v3822_v7 = vrot.slane %v3821_v0, 7  ;;  %v12198_v31 = vmax.f32 %v12197_v12, 0.0  ;;  %v12199_v3 = vld [vmem:[#allocation14_spill] sm:$0xff]  ;;  %v12202_v12 = vld [vmem:[#allocation15_spill] sm:$0xff] }
 0x1b0   :  { %v3915_v42 = vpack.c.b16 %v3914_v29, %v3914_v29  ;;  %v11595_v61 = vunpack.c.l.b16 %v2374_v45  ;;  %v4742_v39 = vpack.c.b16 %v11510_v58, %v11510_v58  ;;  %v4517_v33 = vunpack.c.l.b16 %v2351_v28  ;;  %v9412_v28 = vld [vmem:[#allocation3 + $0x190] ss:$8 sps:$4 sm:$0xff]   ;;  %v9417_v0 = vld [vmem:[#allocation3 + $0x54] ss:$8 sps:$4 sm:$0xff]  }
 0x1b1   :  { %v2085_v49 = vrot.slane %v12198_v31, %v12174_v52  ;;  %v4522_v2 = vrot.slane %v4519_v6, 7  ;;  %v11599_v50 = vunpack.c.l.b16 %v2376_v48  ;;  %v2386_v36 = vpack.c.bf16 %v11576_v40, %v11576_v40  ;;  %v9420_v6 = vld [vmem:[#allocation3 + $0x1a4] ss:$8 sps:$4 sm:$0xff]  }
 0x1b2   :  { %v3823_v19 = vsel %vm2547_vm0, %v3822_v7, %v3820_v63  ;;  %8594 = vmatmul.mubr.msk.bf16.vlgmr.msra.gmra.mrb[32].mxu1 %vm2590_vm1, %v3915_v42  ;;  %v12200_v21 = vmax.f32 %v12199_v3, 0.0  ;;  %v2388_v20 = vpack.c.bf16 %v2185_v26, %v2185_v26  ;;  %v1988_v54 = vmax.f32 %v11258_v27, 0.0  ;;  %v9418_v3 = vld [vmem:[#allocation3 + $0x1a0] ss:$8 sps:$4 sm:$0xff]  }
 0x1b3   :  { %4906 = vmatpush1.bf16.msra.mxu1 %v9406_v44  ;;  %4937 = vmatprep.mubr.bf16.mxu1 %v4742_v39  ;;  %v3824_v58 = vpack.c.b16 %v3823_v19, %v3823_v19  ;;  %v4523_v48 = vsel %vm2547_vm0, %v4522_v2, %v4517_v33  ;;  %v2363_v29 = vpack.c.bf16 %v2085_v49, %v2085_v49  ;;  %v1989_v26 = vmax.f32 %v11260_v38, 0.0  ;;  %v9459_v38 = vld [vmem:[#allocation3 + $0xc4] ss:$8 sps:$4 sm:$0xff]  }
 0x1b4   :  { %v2093_v45 = vrot.slane %v12200_v21, %v12174_v52  ;;  %4907 = vmatprep.subr.bf16.mxu1 %v9414_v59  ;;  %v4525_v40 = vpack.c.b16 %v4523_v48, %v4523_v48  ;;  %v2033_v7 = vrot.slane %v1966_v1, %v10368_v11  ;;  %v12201_v44 = vmax.f32 %v11467_v13, 0.0  ;;  %v9423_v21 = vld [vmem:[#allocation3 + $0x64] ss:$8 sps:$4 sm:$0xff]  }
 0x1b5   :  { %8585 = vmatmul.mubr.msk.bf16.vlgmr.msra.gmra.mrb[24].mxu0 %vm2590_vm1, %v3824_v58  ;;  %v12203_v31 = vmax.f32 %v12202_v12, 0.0  ;;  %v12204_v49 = vmax.f32 %v10758_v24, 0.0  ;;  %v5171_v2 = vrot.slane %v11336_v18, 7  ;;  %v12205_v19 = vmax.f32 %v10912_v22, 0.0 }
 0x1b6   :  { %v2365_v63 = vpack.c.bf16 %v2093_v45, %v2093_v45  ;;  %v2041_v42 = vrot.slane %v12201_v44, %v10368_v11  ;;  %4689 = vmatpush1.bf16.msra.mxu0 %v9409_v17  ;;  %4720 = vmatprep.mubr.bf16.mxu0 %v4525_v40  ;;  %v2350_v33 = vpack.c.bf16 %v2033_v7, %v2033_v7  ;;  %v4954_v24 = vrot.slane %v11360_v46, 7  ;;  %v9426_v17 = vld [vmem:[#allocation3 + $0x1b4] ss:$8 sps:$4 sm:$0xff]   ;;  %v9421_v46 = vld [vmem:[#allocation3 + $0x60] ss:$8 sps:$4 sm:$0xff]  }
 0x1b7   :  { %v2069_v59 = vrot.slane %v12203_v31, %v12174_v52  ;;  %v2077_v39 = vrot.slane %v12204_v49, %v12174_v52  ;;  %v2117_v13 = vrot.slane %v12205_v19, %v12174_v52  ;;  %4908 = vmatpush1.bf16.msra.mxu1 %v9412_v28  ;;  %4690 = vmatprep.subr.bf16.mxu0 %v9417_v0  ;;  %v5168_v40 = vunpack.c.l.b16 %v2363_v29 }
 0x1b8   :  { %v5170_v1 = vunpack.c.l.b16 %v2365_v63  ;;  %v2352_v45 = vpack.c.bf16 %v2041_v42, %v2041_v42  ;;  %4909 = vmatprep.subr.bf16.mxu1 %v9420_v6  ;;  %v11631_v18 = vsel %vm2547_vm0, %v5171_v2, %v11286_v23  ;;  %v12206_v22 = vmax.f32 %v10914_v37, 0.0  ;;  %v9424_v6 = vld [vmem:[#allocation3 + $0x1b0] ss:$8 sps:$4 sm:$0xff]   ;;  %v11647_v37 = vpop.f32.mrb[0].mxu1  ;;  %v9432_v2 = vld [vmem:[#allocation3 + $0x1c4] ss:$8 sps:$4 sm:$0xff]  }
 0x1b9   :  { %v2359_v58 = vpack.c.bf16 %v2069_v59, %v2069_v59  ;;  %v2361_v48 = vpack.c.bf16 %v2077_v39, %v2077_v39  ;;  %v11636_v0 = vunpack.c.l.b16 %v2386_v36  ;;  %v11638_v7 = vunpack.c.l.b16 %v2388_v20  ;;  %v9429_v36 = vld [vmem:[#allocation3 + $0x74] ss:$8 sps:$4 sm:$0xff]  }
 0x1ba   :  { %v5173_v63 = vrot.slane %v5170_v1, 7  ;;  %v2125_v28 = vrot.slane %v12206_v22, %v12174_v52  ;;  %v4518_v44 = vunpack.c.l.b16 %v2352_v45  ;;  %4691 = vmatpush1.bf16.msra.mxu0 %v9415_v5  ;;  %v2371_v12 = vpack.c.bf16 %v2117_v13, %v2117_v13 }
 0x1bb   :  { %v4953_v42 = vunpack.c.l.b16 %v2361_v48  ;;  %v11645_v23 = vsel %vm2547_vm0, %v4954_v24, %v11347_v15  ;;  %4910 = vmatpush1.bf16.msra.mxu1 %v9418_v3  ;;  %4692 = vmatprep.subr.bf16.mxu0 %v9423_v21  ;;  %v4516_v20 = vunpack.c.l.b16 %v2350_v33  ;;  %v4951_v49 = vunpack.c.l.b16 %v2359_v58  ;;  %v11657_v15 = vpop.f32.mrb[1].mxu1  ;;  %v12208_v3 = vld [vmem:[#allocation27_spill] sm:$0xff]  ;;  %v12209_v24 = vld [vmem:[#allocation16_spill] sm:$0xff] }
 0x1bc   :  { %v11641_v29 = vsel %vm2547_vm0, %v5173_v63, %v5168_v40  ;;  %v2373_v31 = vpack.c.bf16 %v2125_v28, %v2125_v28  ;;  %v4520_v59 = vrot.slane %v4518_v44, 7  ;;  %v11652_v5 = vrot.slane %v1988_v54, %v10368_v11  ;;  %4911 = vmatprep.subr.bf16.mxu1 %v9426_v17  ;;  %v2632_v45 = vpop.f32.mrb[2].mxu1  ;;  %v12211_v17 = vld [vmem:[#allocation28_spill] sm:$0xff]  ;;  %v9427_v44 = vld [vmem:[#allocation3 + $0x70] ss:$8 sps:$4 sm:$0xff]  }
 0x1bd   :  { %v4956_v39 = vrot.slane %v4953_v42, 7  ;;  %v2217_v1 = vrot.slane %v1989_v26, %v10368_v11  ;;  %v12207_v33 = vmax.f32 %v10816_v10, 0.0  ;;  %v1986_v21 = vmax.f32 %v12208_v3, 0.0  ;;  %v2633_v28 = vpop.f32.mrb[3].mxu1 }
 0x1be   :  { %v5604_v19 = vunpack.c.l.b16 %v2373_v31  ;;  %v11664_v58 = vsel %vm2547_vm0, %v4520_v59, %v4516_v20  ;;  %v12210_v40 = vmax.f32 %v12209_v24, 0.0  ;;  %v1987_v22 = vmax.f32 %v12211_v17, 0.0  ;;  %4693 = vmatpush1.bf16.msra.mxu0 %v9421_v46  ;;  %v9435_v20 = vld [vmem:[#allocation3 + $0x84] ss:$8 sps:$4 sm:$0xff]   ;;  %v9441_v28 = vld [vmem:[#allocation3 + $0x94] ss:$8 sps:$4 sm:$0xff]  }
 0x1bf   :  { %v2101_v13 = vrot.slane %v12207_v33, %v12174_v52  ;;  %v11667_v48 = vsel %vm2547_vm0, %v4956_v39, %v4951_v49  ;;  %v5602_v10 = vunpack.c.l.b16 %v2371_v12  ;;  %4912 = vmatpush1.bf16.msra.mxu1 %v9424_v6  ;;  %4694 = vmatprep.subr.bf16.mxu0 %v9429_v36  ;;  %v9430_v33 = vld [vmem:[#allocation3 + $0x1c0] ss:$8 sps:$4 sm:$0xff]   ;;  %v5605_v49 = vrot.slane %v11571_v35, 7  ;;  %v9438_v12 = vld [vmem:[#allocation3 + $0x1d4] ss:$8 sps:$4 sm:$0xff]  }
 0x1c0   :  { %v2109_v63 = vrot.slane %v12210_v40, %v12174_v52  ;;  %v5607_v42 = vrot.slane %v5604_v19, 7  ;;  %v2149_v39 = vrot.slane %v1980_v4, %v12174_v52  ;;  %v2157_v45 = vrot.slane %v1981_v57, %v12174_v52  ;;  %4913 = vmatprep.subr.bf16.mxu1 %v9432_v2 }
 0x1c1   :  { %v2367_v31 = vpack.c.bf16 %v2101_v13, %v2101_v13  ;;  %v2396_v46 = vpack.c.bf16 %v2217_v1, %v2217_v1  ;;  %v5388_v6 = vrot.slane %v11380_v8, 7  ;;  %v12212_v36 = vmax.f32 %v11046_v43, 0.0  ;;  %v9433_v1 = vld [vmem:[#allocation3 + $0x80] ss:$8 sps:$4 sm:$0xff]  }
 0x1c2   :  { %v2369_v59 = vpack.c.bf16 %v2109_v63, %v2109_v63  ;;  %v11681_v19 = vsel %vm2547_vm0, %v5607_v42, %v5602_v10  ;;  %v2394_v16 = vpack.c.bf16 %v11652_v5, %v11652_v5  ;;  %v11692_v4 = vrot.slane %v1986_v21, %v10368_v11  ;;  %4695 = vmatpush1.bf16.msra.mxu0 %v9427_v44  ;;  %v12213_v13 = vld [vmem:[#allocation32_spill] sm:$0xff]  ;;  %v12219_v5 = vld [vmem:[#allocation30_spill] sm:$0xff] }
 0x1c3   :  { %v2133_v35 = vrot.slane %v12212_v36, %v12174_v52  ;;  %v11696_v57 = vsel %vm2547_vm0, %v5605_v49, %v11569_v47  ;;  %v2379_v8 = vpack.c.bf16 %v2149_v39, %v2149_v39  ;;  %v2381_v2 = vpack.c.bf16 %v2157_v45, %v2157_v45  ;;  %4914 = vmatpush1.bf16.msra.mxu1 %v9430_v33  ;;  %v9436_v47 = vld [vmem:[#allocation3 + $0x1d0] ss:$8 sps:$4 sm:$0xff]   ;;  %v9444_v49 = vld [vmem:[#allocation3 + $0x1e4] ss:$8 sps:$4 sm:$0xff]  }
 0x1c4   :  { %v5387_v34 = vunpack.c.l.b16 %v2369_v59  ;;  %v11700_v43 = vsel %vm2547_vm0, %v5388_v6, %v12213_v13  ;;  %v12214_v24 = vmax.f32 %v11060_v60, 0.0  ;;  %v11708_v63 = vrot.slane %v1987_v22, %v10368_v11  ;;  %4696 = vmatprep.subr.bf16.mxu0 %v9435_v20  ;;  %4915 = vmatprep.subr.bf16.mxu1 %v9438_v12 }
 0x1c5   :  { %v5385_v44 = vunpack.c.l.b16 %v2367_v31  ;;  %v2375_v42 = vpack.c.bf16 %v2133_v35, %v2133_v35  ;;  %v11710_v59 = vunpack.c.l.b16 %v2396_v46  ;;  %v6038_v39 = vunpack.c.l.b16 %v2381_v2  ;;  %v9439_v46 = vld [vmem:[#allocation3 + $0x90] ss:$8 sps:$4 sm:$0xff]   ;;  %v9447_v2 = vld [vmem:[#allocation3 + $0xa4] ss:$8 sps:$4 sm:$0xff]  }
 0x1c6   :  { %v2141_v40 = vrot.slane %v12214_v24, %v12174_v52  ;;  %v5390_v10 = vrot.slane %v5387_v34, 7  ;;  %v2380_v60 = vpack.c.bf16 %v11586_v62, %v11586_v62  ;;  %v2378_v33 = vpack.c.bf16 %v11581_v9, %v11581_v9  ;;  %4697 = vmatpush1.bf16.msra.mxu0 %v9433_v1  ;;  %v9442_v34 = vld [vmem:[#allocation3 + $0x1e0] ss:$8 sps:$4 sm:$0xff]   ;;  %v12215_v1 = vld [vmem:[#allocation22_spill] sm:$0xff] }
 0x1c7   :  { %v2181_v31 = vrot.slane %v1984_v32, %v12174_v52  ;;  %v2189_v20 = vrot.slane %v1985_v41, %v12174_v52  ;;  %v6036_v12 = vunpack.c.l.b16 %v2379_v8  ;;  %v6041_v36 = vrot.slane %v6038_v39, 7  ;;  %4916 = vmatpush1.bf16.msra.mxu1 %v9436_v47  ;;  %4698 = vmatprep.subr.bf16.mxu0 %v9441_v28  ;;  %v9450_v32 = vld [vmem:[#allocation3 + $0x1f4] ss:$8 sps:$4 sm:$0xff]  }
 0x1c8   :  { %v2377_v45 = vpack.c.bf16 %v2141_v40, %v2141_v40  ;;  %v11715_v6 = vsel %vm2547_vm0, %v5390_v10, %v5385_v44  ;;  %v5819_v35 = vunpack.c.l.b16 %v2375_v42  ;;  %v6037_v13 = vunpack.c.l.b16 %v2380_v60  ;;  %4917 = vmatprep.subr.bf16.mxu1 %v9444_v49  ;;  %v12216_v8 = vld [vmem:[#allocation31_spill] sm:$0xff] }
 0x1c9   :  { %v2387_v9 = vpack.c.bf16 %v2181_v31, %v2181_v31  ;;  %v2389_v24 = vpack.c.bf16 %v2189_v20, %v2189_v20  ;;  %v5822_v51 = vrot.slane %v11599_v50, 7  ;;  %v11727_v53 = vsel %vm2547_vm0, %v6041_v36, %v6036_v12  ;;  %v12218_v10 = vld [vmem:[#allocation23_spill] sm:$0xff] }
 0x1ca   :  { %v5821_v62 = vunpack.c.l.b16 %v2377_v45  ;;  %v12217_v40 = vrot.slane %v12216_v8, 11  ;;  %v1983_v47 = vmax.f32 %v12218_v10, 0.0  ;;  %v6035_v28 = vunpack.c.l.b16 %v2378_v33  ;;  %4699 = vmatpush1.bf16.msra.mxu0 %v9439_v46  ;;  %v9445_v45 = vld [vmem:[#allocation3 + $0xa0] ss:$8 sps:$4 sm:$0xff]   ;;  %v9448_v33 = vld [vmem:[#allocation3 + $0x1f0] ss:$8 sps:$4 sm:$0xff]  }
 0x1cb   :  { %v6039_v42 = vrot.slane %v6037_v13, 7  ;;  %v6472_v39 = vunpack.c.l.b16 %v2389_v24  ;;  %v11738_v49 = vsel %vm2547_vm0, %v5822_v51, %v11595_v61  ;;  %v2390_v20 = vpack.c.bf16 %v11692_v4, %v11692_v4  ;;  %4918 = vmatpush1.bf16.msra.mxu1 %v9442_v34  ;;  %4700 = vmatprep.subr.bf16.mxu0 %v9447_v2  ;;  %v9453_v12 = vld [vmem:[#allocation3 + $0xb4] ss:$8 sps:$4 sm:$0xff]   ;;  %v9456_v13 = vld [vmem:[#allocation3 + $0x204] ss:$8 sps:$4 sm:$0xff]   ;;  %v2719_v34 = vpop.f32.mrb[4].mxu1 }
 0x1cc   :  { %v5824_v41 = vrot.slane %v5821_v62, 7  ;;  %v1950_v44 = vadd.f32 %v12217_v40, %v12215_v1  ;;  %v2173_v31 = vrot.slane %v1983_v47, %v12174_v52  ;;  %v6470_v36 = vunpack.c.l.b16 %v2387_v9  ;;  %4919 = vmatprep.subr.bf16.mxu1 %v9450_v32  ;;  %v9451_v1 = vld [vmem:[#allocation3 + $0xb0] ss:$8 sps:$4 sm:$0xff]  }
 0x1cd   :  { %v11744_v46 = vsel %vm2547_vm0, %v6039_v42, %v6035_v28  ;;  %v2392_v62 = vpack.c.bf16 %v11708_v63, %v11708_v63  ;;  %v7986_v61 = vsel %vm7985_vm2, %v11647_v37, 0.0  ;;  %v6473_v51 = vrot.slane %v11638_v7, 7 }
 0x1ce   :  { %v11734_v50 = vsel %vm2547_vm0, %v5824_v41, %v5819_v35  ;;  %v1982_v60 = vmax.f32 %v1950_v44, 0.0  ;;  %v6475_v35 = vrot.slane %v6472_v39, 7  ;;  %v2385_v4 = vpack.c.bf16 %v2173_v31, %v2173_v31  ;;  %v2721_v41 = vpop.f32.mrb[5].mxu1  ;;  %4701 = vmatpush1.bf16.msra.mxu0 %v9445_v45  ;;  %v9462_v39 = vld [vmem:[#allocation3 + $0x214] ss:$8 sps:$4 sm:$0xff]  }
 0x1cf   :  { %v2213_v9 = vrot.slane %v1988_v54, %v12174_v52  ;;  %v2221_v63 = vrot.slane %v1989_v26, %v12174_v52  ;;  %v8017_v37 = vsel %vm7985_vm2, %v11657_v15, 0.0  ;;  %v7987_v32 = vsel %vm7985_vm2, %v2719_v34, 0.0  ;;  %v2723_v27 = vpop.f32.mrb[6].mxu1  ;;  %4920 = vmatpush1.bf16.msra.mxu1 %v9448_v33  ;;  %4702 = vmatprep.subr.bf16.mxu0 %v9453_v12  ;;  %v9454_v54 = vld [vmem:[#allocation3 + $0x200] ss:$8 sps:$4 sm:$0xff]  }
 0x1d0   :  { %v2165_v24 = vrot.slane %v1982_v60, %v12174_v52  ;;  %v11752_v2 = vsel %vm2547_vm0, %v6475_v35, %v6470_v36  ;;  %v6255_v40 = vunpack.c.l.b16 %v2385_v4  ;;  %v11764_v44 = vadd.f32 %v7987_v32, %v7986_v61  ;;  %v2724_v42 = vpop.f32.mrb[7].mxu1  ;;  %4921 = vmatprep.subr.bf16.mxu1 %v9456_v13  ;;  %v9457_v61 = vld [vmem:[#allocation3 + $0xc0] ss:$8 sps:$4 sm:$0xff]  }
 0x1d1   :  { %v8018_v7 = vsel %vm7985_vm2, %v2721_v41, 0.0  ;;  %v11769_v26 = vsel %vm2547_vm0, %v6473_v51, %v11636_v0  ;;  %v2161_v15 = vrot.slane %v1982_v60, %v10368_v11  ;;  %v6688_v10 = vunpack.c.l.b16 %v2392_v62  ;;  %v9468_v51 = vld [vmem:[#allocation3 + $0x224] ss:$8 sps:$4 sm:$0xff]   ;;  %v9474_v42 = vld [vmem:[#allocation3 + $0x234] ss:$8 sps:$4 sm:$0xff]  }
 0x1d2   :  { %v2383_v8 = vpack.c.bf16 %v2165_v24, %v2165_v24  ;;  %v11772_v28 = vadd.f32 %v8018_v7, %v8017_v37  ;;  %v6258_v31 = vrot.slane %v6255_v40, 7  ;;  %v6903_v33 = vunpack.c.l.b16 %v2394_v16  ;;  %4703 = vmatpush1.bf16.msra.mxu0 %v9451_v1  ;;  %v9460_v24 = vld [vmem:[#allocation3 + $0x210] ss:$8 sps:$4 sm:$0xff]  }
 0x1d3   :  { %v2395_v12 = vpack.c.bf16 %v2213_v9, %v2213_v9  ;;  %v2397_v36 = vpack.c.bf16 %v2221_v63, %v2221_v63  ;;  %v2169_v35 = vrot.slane %v1983_v47, %v10368_v11  ;;  %v6686_v0 = vunpack.c.l.b16 %v2390_v20  ;;  %4922 = vmatpush1.bf16.msra.mxu1 %v9454_v54  ;;  %4704 = vmatprep.subr.bf16.mxu0 %v9459_v38  ;;  %v9465_v47 = vld [vmem:[#allocation3 + $0xd4] ss:$8 sps:$4 sm:$0xff]   ;;  %v9463_v1 = vld [vmem:[#allocation3 + $0xd0] ss:$8 sps:$4 sm:$0xff]   ;;  %v9471_v54 = vld [vmem:[#allocation3 + $0xe4] ss:$8 sps:$4 sm:$0xff]  }
 0x1d4   :  { %v6253_v45 = vunpack.c.l.b16 %v2383_v8  ;;  %v2197_v62 = vrot.slane %v1986_v21, %v12174_v52  ;;  %v2205_v13 = vrot.slane %v1987_v22, %v12174_v52  ;;  %v1991_v16 = vmax.f32 %v12219_v5, 0.0  ;;  %4923 = vmatprep.subr.bf16.mxu1 %v9462_v39  ;;  %v12220_v22 = vld [vmem:[#allocation29_spill] sm:$0xff] }
 0x1d5   :  { %v6906_v20 = vunpack.c.l.b16 %v2397_v36  ;;  %v2382_v4 = vpack.c.bf16 %v2161_v15, %v2161_v15  ;;  %v2384_v34 = vpack.c.bf16 %v2169_v35, %v2169_v35  ;;  %v6907_v3 = vrot.slane %v11710_v59, 7  ;;  %v9466_v59 = vld [vmem:[#allocation3 + $0x220] ss:$8 sps:$4 sm:$0xff]  }
 0x1d6   :  { %v11779_v60 = vsel %vm2547_vm0, %v6258_v31, %v6253_v45  ;;  %v2391_v9 = vpack.c.bf16 %v2197_v62, %v2197_v62  ;;  %v2393_v63 = vpack.c.bf16 %v2205_v13, %v2205_v13  ;;  %v6690_v21 = vrot.slane %v6688_v10, 7  ;;  %4705 = vmatpush1.bf16.msra.mxu0 %v9457_v61  ;;  %v2810_v31 = vpop.f32.mrb[0].mxu0 }
 0x1d7   :  { %v6904_v37 = vunpack.c.l.b16 %v2395_v12  ;;  %v6909_v32 = vrot.slane %v6906_v20, 7  ;;  %v6254_v17 = vunpack.c.l.b16 %v2384_v34  ;;  %v1990_v41 = vmax.f32 %v12220_v22, 0.0  ;;  %4924 = vmatpush1.bf16.msra.mxu1 %v9460_v24  ;;  %4706 = vmatprep.subr.bf16.mxu0 %v9465_v47  ;;  %v2812_v35 = vpop.f32.mrb[1].mxu0  ;;  %v9472_v47 = vld [vmem:[#allocation3 + $0x230] ss:$8 sps:$4 sm:$0xff]  }
 0x1d8   :  { %v6689_v8 = vunpack.c.l.b16 %v2393_v63  ;;  %v11791_v40 = vsel %vm2547_vm0, %v6907_v3, %v6903_v33  ;;  %v11794_v7 = vsel %vm2547_vm0, %v6690_v21, %v6686_v0  ;;  %v2233_v27 = vrot.slane %v1991_v16, %v10368_v11  ;;  %4925 = vmatprep.subr.bf16.mxu1 %v9468_v51  ;;  %v9469_v0 = vld [vmem:[#allocation3 + $0xe0] ss:$8 sps:$4 sm:$0xff]   ;;  %v2814_v24 = vpop.f32.mrb[2].mxu0  ;;  %v9477_v20 = vld [vmem:[#allocation3 + $0xf4] ss:$8 sps:$4 sm:$0xff]   ;;  %v2901_v3 = vpop.f32.mrb[8].mxu1 }
 0x1d9   :  { %v11798_v38 = vsel %vm2547_vm0, %v6909_v32, %v6904_v37  ;;  %v6252_v15 = vunpack.c.l.b16 %v2382_v4  ;;  %v6256_v10 = vrot.slane %v6254_v17, 7  ;;  %v6687_v39 = vunpack.c.l.b16 %v2391_v9  ;;  %v2815_v34 = vpop.f32.mrb[3].mxu0  ;;  %v9480_v51 = vld [vmem:[#allocation3 + $0x244] ss:$8 sps:$4 sm:$0xff]   ;;  %v2903_v37 = vpop.f32.mrb[9].mxu1  ;;  %v12221_v24 = vld [vmem:[#allocation34_spill] sm:$0xff] }
 0x1da   :  { %v6692_v45 = vrot.slane %v6689_v8, 7  ;;  %v2225_v12 = vrot.slane %v1990_v41, %v10368_v11  ;;  %v7989_v36 = vsel %vm7985_vm2, %v2810_v31, 0.0  ;;  %4707 = vmatpush1.bf16.msra.mxu0 %v9463_v1  ;;  %v2400_v62 = vpack.c.bf16 %v2233_v27, %v2233_v27  ;;  %v9475_v32 = vld [vmem:[#allocation3 + $0xf0] ss:$8 sps:$4 sm:$0xff]   ;;  %v9478_v27 = vld [vmem:[#allocation3 + $0x240] ss:$8 sps:$4 sm:$0xff]  }
 0x1db   :  { %v11801_v33 = vsel %vm2547_vm0, %v6256_v10, %v6252_v15  ;;  %v7990_v13 = vadd.f32 %v7989_v36, %v11764_v44  ;;  %v8020_v5 = vsel %vm7985_vm2, %v2812_v35, 0.0  ;;  %4926 = vmatpush1.bf16.msra.mxu1 %v9466_v59  ;;  %4708 = vmatprep.subr.bf16.mxu0 %v9471_v54  ;;  %v2229_v9 = vrot.slane %v1990_v41, %v12174_v52  ;;  %v9483_v59 = vld [vmem:[#allocation3 + $0x104] ss:$8 sps:$4 sm:$0xff]   ;;  %v9486_v15 = vld [vmem:[#allocation3 + $0x254] ss:$8 sps:$4 sm:$0xff]  }
 0x1dc   :  { %v11806_v61 = vsel %vm2547_vm0, %v6692_v45, %v6687_v39  ;;  %v8021_v4 = vadd.f32 %v8020_v5, %v11772_v28  ;;  %4927 = vmatprep.subr.bf16.mxu1 %v9474_v42  ;;  %v2237_v63 = vrot.slane %v1991_v16, %v12174_v52  ;;  %v2398_v21 = vpack.c.bf16 %v2225_v12, %v2225_v12  ;;  %v2905_v28 = vpop.f32.mrb[10].mxu1  ;;  %v9481_v42 = vld [vmem:[#allocation3 + $0x100] ss:$8 sps:$4 sm:$0xff]   ;;  %v9484_v45 = vld [vmem:[#allocation3 + $0x250] ss:$8 sps:$4 sm:$0xff]  }
 0x1dd   :  { %v7991_v44 = vsel %vm7985_vm2, %v2901_v3, 0.0  ;;  %v7122_v22 = vunpack.c.l.b16 %v2400_v62  ;;  %v8022_v8 = vsel %vm7985_vm2, %v2903_v37, 0.0  ;;  %v2399_v41 = vpack.c.bf16 %v2229_v9, %v2229_v9  ;;  %v2906_v16 = vpop.f32.mrb[11].mxu1  ;;  %v9489_v31 = vld [vmem:[#allocation3 + $0x114] ss:$8 sps:$4 sm:$0xff]   ;;  %v12222_v9 = vld [vmem:[#allocation33_spill] sm:$0xff] }
 0x1de   :  { %4709 = vmatpush1.bf16.msra.mxu0 %v9469_v0  ;;  %v2401_v17 = vpack.c.bf16 %v2237_v63, %v2237_v63  ;;  %v7992_v1 = vadd.f32 %v7991_v44, %v7990_v13  ;;  %v8023_v54 = vadd.f32 %v8022_v8, %v8021_v4  ;;  %v7120_v39 = vunpack.c.l.b16 %v2398_v21  ;;  %v9492_v0 = vld [vmem:[#allocation3 + $0x264] ss:$8 sps:$4 sm:$0xff]   ;;  %v9487_v5 = vld [vmem:[#allocation3 + $0x110] ss:$8 sps:$4 sm:$0xff]   ;;  %v9498_v34 = vld [vmem:[#allocation3 + $0x274] ss:$8 sps:$4 sm:$0xff]  }
 0x1df   :  { %4928 = vmatpush1.bf16.msra.mxu1 %v9472_v47  ;;  %4710 = vmatprep.subr.bf16.mxu0 %v9477_v20  ;;  %v7121_v12 = vunpack.c.l.b16 %v2399_v41  ;;  %v7124_v35 = vrot.slane %v7122_v22, 7  ;;  %v1993_v47 = vmax.f32 %v12221_v24, 0.0  ;;  %v9490_v20 = vld [vmem:[#allocation3 + $0x260] ss:$8 sps:$4 sm:$0xff]   ;;  %v9495_v4 = vld [vmem:[#allocation3 + $0x124] ss:$8 sps:$4 sm:$0xff]  }
 0x1e0   :  { %4929 = vmatprep.subr.bf16.mxu1 %v9480_v51  ;;  %v7123_v10 = vunpack.c.l.b16 %v2401_v17  ;;  %v1992_v63 = vmax.f32 %v12222_v9, 0.0  ;;  %v9493_v44 = vld [vmem:[#allocation3 + $0x120] ss:$8 sps:$4 sm:$0xff]   ;;  %v9496_v8 = vld [vmem:[#allocation3 + $0x270] ss:$8 sps:$4 sm:$0xff]  }
 0x1e1   :  { %v11819_v13 = vsel %vm2547_vm0, %v7124_v35, %v7120_v39  ;;  %v2249_v37 = vrot.slane %v1993_v47, %v10368_v11  ;;  %v9501_v28 = vld [vmem:[#allocation3 + $0x134] ss:$8 sps:$4 sm:$0xff]   ;;  %v9504_v41 = vld [vmem:[#allocation3 + $0x404] ss:$8 sps:$4 sm:$0xff]   ;;  %v9505_v35 = vld [vmem:[#allocation3 + $0x2c0] ss:$8 sps:$4 sm:$0xff]  }
 0x1e2   :  { %4711 = vmatpush1.bf16.msra.mxu0 %v9475_v32  ;;  %v7126_v36 = vrot.slane %v7123_v10, 7  ;;  %v2241_v16 = vrot.slane %v1992_v63, %v10368_v11  ;;  %v9507_v39 = vld [vmem:[#allocation3 + $0x2c4] ss:$8 sps:$4 sm:$0xff]   ;;  %v9513_v24 = vld [vmem:[#allocation3 + $0x2d4] ss:$8 sps:$4 sm:$0xff]  }
 0x1e3   :  { %4930 = vmatpush1.bf16.msra.mxu1 %v9478_v27  ;;  %4712 = vmatprep.subr.bf16.mxu0 %v9483_v59  ;;  %v2992_v51 = vpop.f32.mrb[4].mxu0  ;;  %v2404_v10 = vpack.c.bf16 %v2249_v37, %v2249_v37  ;;  %v9522_v37 = vld [vmem:[#allocation3 + $0x434] ss:$8 sps:$4 sm:$0xff]  }
 0x1e4   :  { %4931 = vmatprep.subr.bf16.mxu1 %v9486_v15  ;;  %v11816_v62 = vsel %vm2547_vm0, %v7126_v36, %v7121_v12  ;;  %v7993_v3 = vsel %vm7985_vm2, %v2992_v51, 0.0  ;;  %v2994_v21 = vpop.f32.mrb[5].mxu0  ;;  %v9499_v15 = vld [vmem:[#allocation3 + $0x130] ss:$8 sps:$4 sm:$0xff]   ;;  %v2253_v12 = vrot.slane %v1993_v47, %v12174_v52  ;;  %v2402_v36 = vpack.c.bf16 %v2241_v16, %v2241_v16  ;;  %v9516_v47 = vld [vmem:[#allocation3 + $0x424] ss:$8 sps:$4 sm:$0xff]  }
 0x1e5   :  { %v11825_v32 = vadd.f32 %v7993_v3, %v7992_v1  ;;  %v8024_v17 = vsel %vm7985_vm2, %v2994_v21, 0.0  ;;  %v2996_v22 = vpop.f32.mrb[6].mxu0  ;;  %v9502_v1 = vld [vmem:[#allocation3 + $0x400] ss:$8 sps:$4 sm:$0xff]   ;;  %v9511_v51 = vld [vmem:[#allocation3 + $0x2d0] ss:$8 sps:$4 sm:$0xff]  }
 0x1e6   :  { %4713 = vmatpush1.bf16.msra.mxu0 %v9481_v42  ;;  %v11828_v27 = vadd.f32 %v8024_v17, %v8023_v54  ;;  %v2997_v59 = vpop.f32.mrb[7].mxu0  ;;  %v4741_v42 = vpack.c.b16 %v11519_v30, %v11519_v30  ;;  %v5176_v54 = vpack.c.b16 %v11641_v29, %v11641_v29  ;;  %v4524_v30 = vpack.c.b16 %v11664_v58, %v11664_v58  ;;  %v9519_v58 = vld [vmem:[#allocation3 + $0x2e4] ss:$8 sps:$4 sm:$0xff]  }
 0x1e7   :  { %4932 = vmatpush1.bf16.msra.mxu1 %v9484_v45  ;;  %4714 = vmatprep.subr.bf16.mxu0 %v9489_v31  ;;  %v9510_v45 = vld [vmem:[#allocation3 + $0x414] ss:$8 sps:$4 sm:$0xff]   ;;  %v2245_v31 = vrot.slane %v1992_v63, %v12174_v52  ;;  %v4959_v29 = vpack.c.b16 %v11667_v48, %v11667_v48  ;;  %v7337_v9 = vunpack.c.l.b16 %v2402_v36  ;;  %v9514_v63 = vld [vmem:[#allocation3 + $0x420] ss:$8 sps:$4 sm:$0xff]   ;;  %v1995_v36 = vmax.f32 %v11554_v55, 0.0 }
 0x1e8   :  { %4933 = vmatprep.subr.bf16.mxu1 %v9492_v0  ;;  %v7339_v0 = vunpack.c.l.b16 %v2404_v10  ;;  %v9517_v59 = vld [vmem:[#allocation3 + $0x2e0] ss:$8 sps:$4 sm:$0xff]   ;;  %v9520_v10 = vld [vmem:[#allocation3 + $0x430] ss:$8 sps:$4 sm:$0xff]   ;;  %v1994_v55 = vmax.f32 %v11552_v56, 0.0 }
 0x1ea   :  { %4715 = vmatpush1.bf16.msra.mxu0 %v9487_v5  ;;  %v9508_v5 = vld [vmem:[#allocation3 + $0x410] ss:$8 sps:$4 sm:$0xff]   ;;  %v2261_v56 = vrot.slane %v1994_v55, %v12174_v52 }
 0x1eb   :  { %4934 = vmatpush1.bf16.msra.mxu1 %v9490_v20  ;;  %4716 = vmatprep.subr.bf16.mxu0 %v9495_v4  ;;  %v2403_v20 = vpack.c.bf16 %v2245_v31, %v2245_v31  ;;  %v2405_v4 = vpack.c.bf16 %v2253_v12, %v2253_v12  ;;  %v9523_v31 = vld [vmem:[#allocation3 + $0x2f0] ss:$8 sps:$4 sm:$0xff]   ;;  %v9531_v12 = vld [vmem:[#allocation3 + $0x304] ss:$8 sps:$4 sm:$0xff]  }
 0x1ec   :  { %4935 = vmatprep.subr.bf16.mxu1 %v9498_v34 }
 0x1ed   :  { %v7340_v34 = vunpack.c.l.b16 %v2405_v4  ;;  %v7338_v3 = vunpack.c.l.b16 %v2403_v20  ;;  %v9540_v20 = vld [vmem:[#allocation3 + $0x464] ss:$8 sps:$4 sm:$0xff]  }
 0x1ee   :  { %4717 = vmatpush1.bf16.msra.mxu0 %v9493_v44  ;;  %v7341_v44 = vrot.slane %v7339_v0, 7 }
 0x1ef   :  { %4936 = vmatpush1.bf16.msra.mxu1 %v9496_v8  ;;  %4718 = vmatprep.subr.bf16.mxu0 %v9501_v28  ;;  %v7343_v21 = vrot.slane %v7340_v34, 7  ;;  %v3083_v17 = vpop.f32.mrb[12].mxu1 }
 0x1f0   :  { %5339 = vmatprep.subr.bf16.mxu1 %v9504_v41  ;;  %v11845_v22 = vsel %vm2547_vm0, %v7341_v44, %v7337_v9  ;;  %v7995_v8 = vsel %vm7985_vm2, %v3083_v17, 0.0  ;;  %v3085_v28 = vpop.f32.mrb[13].mxu1  ;;  %v9543_v9 = vld [vmem:[#allocation3 + $0x324] ss:$8 sps:$4 sm:$0xff]   ;;  %v9541_v17 = vld [vmem:[#allocation3 + $0x320] ss:$8 sps:$4 sm:$0xff]  }
 0x1f1   :  { %v11842_v48 = vsel %vm2547_vm0, %v7343_v21, %v7338_v3  ;;  %v11849_v41 = vadd.f32 %v7995_v8, %v11825_v32  ;;  %v8026_v16 = vsel %vm7985_vm2, %v3085_v28, 0.0  ;;  %v9526_v32 = vld [vmem:[#allocation3 + $0x440] ss:$8 sps:$4 sm:$0xff]   ;;  %v9546_v3 = vld [vmem:[#allocation3 + $0x474] ss:$8 sps:$4 sm:$0xff]  }
 0x1f2   :  { %4719 = vmatpush1.bf16.msra.mxu0 %v9499_v15  ;;  %4938 = vmatmul.mubr.bf16.vlgmr.msra.gmra.mrb[36].mxu1 %v4741_v42  ;;  %v3087_v15 = vpop.f32.mrb[14].mxu1  ;;  %v11853_v42 = vadd.f32 %v8026_v16, %v11828_v27  ;;  %v9529_v27 = vld [vmem:[#allocation3 + $0x300] ss:$8 sps:$4 sm:$0xff]   ;;  %v9549_v16 = vld [vmem:[#allocation3 + $0x334] ss:$8 sps:$4 sm:$0xff]  }
 0x1f3   :  { %5340 = vmatpush1.bf16.msra.mxu1 %v9502_v1  ;;  %5371 = vmatprep.mubr.bf16.mxu1 %v5176_v54  ;;  %v9525_v1 = vld [vmem:[#allocation3 + $0x2f4] ss:$8 sps:$4 sm:$0xff]   ;;  %v1997_v54 = vmax.f32 %v11545_v25, 0.0 }
 0x1f4   :  { %5122 = vmatprep.subr.bf16.mxu0 %v9507_v39  ;;  %5341 = vmatprep.subr.bf16.mxu1 %v9510_v45  ;;  %v3088_v39 = vpop.f32.mrb[15].mxu1  ;;  %v9528_v45 = vld [vmem:[#allocation3 + $0x444] ss:$8 sps:$4 sm:$0xff]   ;;  %v9537_v25 = vld [vmem:[#allocation3 + $0x314] ss:$8 sps:$4 sm:$0xff]  }
 0x1f5   :  { %4721 = vmatmul.mubr.bf16.vlgmr.msra.gmra.mrb[28].mxu0 %v4524_v30  ;;  %v2281_v0 = vrot.slane %v1997_v54, %v10368_v11  ;;  %v1996_v30 = vmax.f32 %v11543_v14, 0.0  ;;  %v2285_v4 = vrot.slane %v1997_v54, %v12174_v52  ;;  %v9538_v14 = vld [vmem:[#allocation3 + $0x460] ss:$8 sps:$4 sm:$0xff]  }
 0x1f6   :  { %5123 = vmatpush1.bf16.msra.mxu0 %v9505_v35  ;;  %5154 = vmatprep.mubr.bf16.mxu0 %v4959_v29  ;;  %v9534_v35 = vld [vmem:[#allocation3 + $0x454] ss:$8 sps:$4 sm:$0xff]  }
 0x1f7   :  { %5342 = vmatpush1.bf16.msra.mxu1 %v9508_v5  ;;  %5124 = vmatprep.subr.bf16.mxu0 %v9513_v24  ;;  %v9532_v5 = vld [vmem:[#allocation3 + $0x450] ss:$8 sps:$4 sm:$0xff]   ;;  %v2265_v24 = vrot.slane %v1995_v36, %v10368_v11  ;;  %v2412_v29 = vpack.c.bf16 %v2281_v0, %v2281_v0  ;;  %v2273_v34 = vrot.slane %v1996_v30, %v10368_v11 }
 0x1f8   :  { %5343 = vmatprep.subr.bf16.mxu1 %v9516_v47  ;;  %v9535_v47 = vld [vmem:[#allocation3 + $0x310] ss:$8 sps:$4 sm:$0xff]   ;;  %v2413_v21 = vpack.c.bf16 %v2285_v4, %v2285_v4 }
 0x1f9   :  { %v7773_v44 = vunpack.c.l.b16 %v2412_v29  ;;  %v2410_v8 = vpack.c.bf16 %v2273_v34, %v2273_v34  ;;  %v9553_v29 = vld [vmem:[#allocation3 + $0x340] ss:$8 sps:$4 sm:$0xff]  }
 0x1fa   :  { %5125 = vmatpush1.bf16.msra.mxu0 %v9511_v51  ;;  %v2277_v51 = vrot.slane %v1996_v30, %v12174_v52  ;;  %v9558_v30 = vld [vmem:[#allocation3 + $0x494] ss:$8 sps:$4 sm:$0xff]  }
 0x1fb   :  { %5344 = vmatpush1.bf16.msra.mxu1 %v9514_v63  ;;  %5126 = vmatprep.subr.bf16.mxu0 %v9519_v58  ;;  %v2269_v63 = vrot.slane %v1995_v36, %v12174_v52  ;;  %v2408_v58 = vpack.c.bf16 %v2265_v24, %v2265_v24  ;;  %v7775_v39 = vrot.slane %v7773_v44, 7  ;;  %v9550_v52 = vld [vmem:[#allocation3 + $0x480] ss:$8 sps:$4 sm:$0xff]   ;;  %v9555_v36 = vld [vmem:[#allocation3 + $0x344] ss:$8 sps:$4 sm:$0xff]  }
 0x1fc   :  { %5345 = vmatprep.subr.bf16.mxu1 %v9522_v37  ;;  %v2257_v37 = vrot.slane %v1994_v55, %v10368_v11  ;;  %v2411_v28 = vpack.c.bf16 %v2277_v51, %v2277_v51  ;;  %v9556_v51 = vld [vmem:[#allocation3 + $0x490] ss:$8 sps:$4 sm:$0xff]  }
 0x1fd   :  { %v2409_v15 = vpack.c.bf16 %v2269_v63, %v2269_v63  ;;  %v9564_v63 = vld [vmem:[#allocation3 + $0x4a4] ss:$8 sps:$4 sm:$0xff]  }
 0x1fe   :  { %5127 = vmatpush1.bf16.msra.mxu0 %v9517_v59  ;;  %v9544_v59 = vld [vmem:[#allocation3 + $0x470] ss:$8 sps:$4 sm:$0xff]   ;;  %v2406_v54 = vpack.c.bf16 %v2257_v37, %v2257_v37 }
 0x1ff   :  { %5346 = vmatpush1.bf16.msra.mxu1 %v9520_v10  ;;  %5128 = vmatprep.subr.bf16.mxu0 %v9525_v1  ;;  %v7556_v10 = vunpack.c.l.b16 %v2408_v58  ;;  %v9552_v1 = vld [vmem:[#allocation3 + $0x484] ss:$8 sps:$4 sm:$0xff]  }
 0x200   :  { %5347 = vmatprep.subr.bf16.mxu1 %v9528_v45  ;;  %v7774_v45 = vunpack.c.l.b16 %v2413_v21 }
 0x202   :  { %5129 = vmatpush1.bf16.msra.mxu0 %v9523_v31  ;;  %v2407_v31 = vpack.c.bf16 %v2261_v56, %v2261_v56  ;;  %v7777_v0 = vrot.slane %v7774_v45, 7  ;;  %v9570_v45 = vld [vmem:[#allocation3 + $0x4b4] ss:$8 sps:$4 sm:$0xff]  }
 0x203   :  { %5348 = vmatpush1.bf16.msra.mxu1 %v9526_v32  ;;  %5130 = vmatprep.subr.bf16.mxu0 %v9531_v12  ;;  %v9547_v32 = vld [vmem:[#allocation3 + $0x330] ss:$8 sps:$4 sm:$0xff]   ;;  %v7771_v12 = vunpack.c.l.b16 %v2410_v8 }
 0x204   :  { %5349 = vmatprep.subr.bf16.mxu1 %v9534_v35  ;;  %v7772_v35 = vunpack.c.l.b16 %v2411_v28  ;;  %v7555_v55 = vunpack.c.l.b16 %v2407_v31 }
 0x205   :  { %v11871_v24 = vsel %vm2547_vm0, %v7775_v39, %v7771_v12  ;;  %v9568_v12 = vld [vmem:[#allocation3 + $0x4b0] ss:$8 sps:$4 sm:$0xff]  }
 0x206   :  { %5131 = vmatpush1.bf16.msra.mxu0 %v9529_v27  ;;  %v7558_v27 = vrot.slane %v7556_v10, 7 }
 0x207   :  { %5350 = vmatpush1.bf16.msra.mxu1 %v9532_v5  ;;  %5132 = vmatprep.subr.bf16.mxu0 %v9537_v25  ;;  %v7557_v5 = vunpack.c.l.b16 %v2409_v15  ;;  %v11868_v25 = vsel %vm2547_vm0, %v7777_v0, %v7772_v35  ;;  %v9567_v15 = vld [vmem:[#allocation3 + $0x364] ss:$8 sps:$4 sm:$0xff]   ;;  %v9571_v35 = vld [vmem:[#allocation3 + $0x370] ss:$8 sps:$4 sm:$0xff]  }
 0x208   :  { %5351 = vmatprep.subr.bf16.mxu1 %v9540_v20  ;;  %v7554_v20 = vunpack.c.l.b16 %v2406_v54  ;;  %v9579_v0 = vld [vmem:[#allocation3 + $0x384] ss:$8 sps:$4 sm:$0xff]  }
 0x20a   :  { %5133 = vmatpush1.bf16.msra.mxu0 %v9535_v47  ;;  %v3265_v4 = vpop.f32.mrb[16].mxu1  ;;  %v7560_v47 = vrot.slane %v7557_v5, 7  ;;  %v9580_v5 = vld [vmem:[#allocation3 + $0x4d0] ss:$8 sps:$4 sm:$0xff]  }
 0x20b   :  { %5352 = vmatpush1.bf16.msra.mxu1 %v9538_v14  ;;  %5134 = vmatprep.subr.bf16.mxu0 %v9543_v9  ;;  %v3267_v34 = vpop.f32.mrb[17].mxu1  ;;  %v9561_v14 = vld [vmem:[#allocation3 + $0x354] ss:$8 sps:$4 sm:$0xff]   ;;  %v7999_v10 = vsel %vm7985_vm2, %v3265_v4, 0.0  ;;  %v9588_v4 = vld [vmem:[#allocation3 + $0x4e4] ss:$8 sps:$4 sm:$0xff]  }
 0x20c   :  { %5353 = vmatprep.subr.bf16.mxu1 %v9546_v3  ;;  %v3269_v9 = vpop.f32.mrb[18].mxu1  ;;  %v11874_v58 = vsel %vm2547_vm0, %v7560_v47, %v7555_v55  ;;  %v11877_v3 = vsel %vm2547_vm0, %v7558_v27, %v7554_v20  ;;  %v8030_v54 = vsel %vm7985_vm2, %v3267_v34, 0.0  ;;  %v9582_v27 = vld [vmem:[#allocation3 + $0x4d4] ss:$8 sps:$4 sm:$0xff]   ;;  %v9583_v34 = vld [vmem:[#allocation3 + $0x390] ss:$8 sps:$4 sm:$0xff]  }
 0x20d   :  { %v3174_v21 = vpop.f32.mrb[8].mxu0  ;;  %v3270_v44 = vpop.f32.mrb[19].mxu1  ;;  %v9585_v20 = vld [vmem:[#allocation3 + $0x394] ss:$8 sps:$4 sm:$0xff]  }
 0x20e   :  { %5135 = vmatpush1.bf16.msra.mxu0 %v9541_v17  ;;  %v7997_v37 = vsel %vm7985_vm2, %v3174_v21, 0.0  ;;  %v3176_v56 = vpop.f32.mrb[9].mxu0  ;;  %v9559_v17 = vld [vmem:[#allocation3 + $0x350] ss:$8 sps:$4 sm:$0xff]   ;;  %v9591_v21 = vld [vmem:[#allocation3 + $0x3a4] ss:$8 sps:$4 sm:$0xff]  }
 0x20f   :  { %5354 = vmatpush1.bf16.msra.mxu1 %v9544_v59  ;;  %5136 = vmatprep.subr.bf16.mxu0 %v9549_v16  ;;  %v7998_v8 = vadd.f32 %v7997_v37, %v11849_v41  ;;  %v8028_v28 = vsel %vm7985_vm2, %v3176_v56, 0.0  ;;  %v3178_v59 = vpop.f32.mrb[10].mxu0  ;;  %v9562_v16 = vld [vmem:[#allocation3 + $0x4a0] ss:$8 sps:$4 sm:$0xff]   ;;  %v9594_v56 = vld [vmem:[#allocation3 + $0x4f4] ss:$8 sps:$4 sm:$0xff]  }
 0x210   :  { %5355 = vmatprep.subr.bf16.mxu1 %v9552_v1  ;;  %v8029_v1 = vadd.f32 %v8028_v28, %v11853_v42  ;;  %v3179_v39 = vpop.f32.mrb[11].mxu0  ;;  %v9565_v41 = vld [vmem:[#allocation3 + $0x360] ss:$8 sps:$4 sm:$0xff]   ;;  %v9597_v28 = vld [vmem:[#allocation3 + $0x3b4] ss:$8 sps:$4 sm:$0xff]  }
 0x211   :  { %v8000_v31 = vadd.f32 %v7999_v10, %v7998_v8  ;;  %v9574_v42 = vld [vmem:[#allocation3 + $0x4c0] ss:$8 sps:$4 sm:$0xff]   ;;  %v9592_v8 = vld [vmem:[#allocation3 + $0x4f0] ss:$8 sps:$4 sm:$0xff]   ;;  %v9600_v59 = vld [vmem:[#allocation3 + $0x684] ss:$8 sps:$4 sm:$0xff]  }
 0x212   :  { %5137 = vmatpush1.bf16.msra.mxu0 %v9547_v32  ;;  %v8031_v32 = vadd.f32 %v8030_v54, %v8029_v1  ;;  %v9598_v10 = vld [vmem:[#allocation3 + $0x680] ss:$8 sps:$4 sm:$0xff]   ;;  %v9603_v54 = vld [vmem:[#allocation3 + $0x544] ss:$8 sps:$4 sm:$0xff]  }
 0x213   :  { %5356 = vmatpush1.bf16.msra.mxu1 %v9550_v52  ;;  %5138 = vmatprep.subr.bf16.mxu0 %v9555_v36  ;;  %v9573_v52 = vld [vmem:[#allocation3 + $0x374] ss:$8 sps:$4 sm:$0xff]   ;;  %v9576_v36 = vld [vmem:[#allocation3 + $0x4c4] ss:$8 sps:$4 sm:$0xff]  }
 0x214   :  { %5357 = vmatprep.subr.bf16.mxu1 %v9558_v30  ;;  %v9577_v30 = vld [vmem:[#allocation3 + $0x380] ss:$8 sps:$4 sm:$0xff]  }
 0x216   :  { %5139 = vmatpush1.bf16.msra.mxu0 %v9553_v29 }
 0x217   :  { %5358 = vmatpush1.bf16.msra.mxu1 %v9556_v51  ;;  %5140 = vmatprep.subr.bf16.mxu0 %v9561_v14 }
 0x218   :  { %5359 = vmatprep.subr.bf16.mxu1 %v9564_v63  ;;  %v9586_v63 = vld [vmem:[#allocation3 + $0x4e0] ss:$8 sps:$4 sm:$0xff]  }
 0x21a   :  { %5141 = vmatpush1.bf16.msra.mxu0 %v9559_v17  ;;  %v9589_v17 = vld [vmem:[#allocation3 + $0x3a0] ss:$8 sps:$4 sm:$0xff]  }
 0x21b   :  { %5360 = vmatpush1.bf16.msra.mxu1 %v9562_v16  ;;  %5142 = vmatprep.subr.bf16.mxu0 %v9567_v15  ;;  %v9595_v16 = vld [vmem:[#allocation3 + $0x3b0] ss:$8 sps:$4 sm:$0xff]  }
 0x21c   :  { %5361 = vmatprep.subr.bf16.mxu1 %v9570_v45  ;;  %v5175_v45 = vpack.c.b16 %v11631_v18, %v11631_v18  ;;  %v4958_v18 = vpack.c.b16 %v11645_v23, %v11645_v23  ;;  %v9613_v23 = vld [vmem:[#allocation3 + $0x560] ss:$8 sps:$4 sm:$0xff]  }
 0x21e   :  { %5143 = vmatpush1.bf16.msra.mxu0 %v9565_v41 }
 0x21f   :  { %5362 = vmatpush1.bf16.msra.mxu1 %v9568_v12  ;;  %5144 = vmatprep.subr.bf16.mxu0 %v9573_v52  ;;  %v3356_v29 = vpop.f32.mrb[12].mxu0  ;;  %v5610_v52 = vpack.c.b16 %v11681_v19, %v11681_v19  ;;  %v9607_v19 = vld [vmem:[#allocation3 + $0x550] ss:$8 sps:$4 sm:$0xff]  }
 0x220   :  { %5363 = vmatprep.subr.bf16.mxu1 %v9576_v36  ;;  %v8001_v55 = vsel %vm7985_vm2, %v3356_v29, 0.0  ;;  %v3358_v47 = vpop.f32.mrb[13].mxu0  ;;  %v9618_v29 = vld [vmem:[#allocation3 + $0x6b4] ss:$8 sps:$4 sm:$0xff]  }
 0x221   :  { %v8002_v51 = vadd.f32 %v8001_v55, %v8000_v31  ;;  %v8032_v14 = vsel %vm7985_vm2, %v3358_v47, 0.0  ;;  %v3360_v9 = vpop.f32.mrb[14].mxu0  ;;  %v9606_v31 = vld [vmem:[#allocation3 + $0x694] ss:$8 sps:$4 sm:$0xff]   ;;  %v9616_v55 = vld [vmem:[#allocation3 + $0x6b0] ss:$8 sps:$4 sm:$0xff]  }
 0x222   :  { %5145 = vmatpush1.bf16.msra.mxu0 %v9571_v35  ;;  %v8033_v44 = vadd.f32 %v8032_v14, %v8031_v32  ;;  %v3361_v37 = vpop.f32.mrb[15].mxu0  ;;  %v9621_v47 = vld [vmem:[#allocation3 + $0x574] ss:$8 sps:$4 sm:$0xff]   ;;  %v9627_v14 = vld [vmem:[#allocation3 + $0x584] ss:$8 sps:$4 sm:$0xff]  }
 0x223   :  { %5364 = vmatpush1.bf16.msra.mxu1 %v9574_v42  ;;  %5146 = vmatprep.subr.bf16.mxu0 %v9579_v0  ;;  %v9601_v42 = vld [vmem:[#allocation3 + $0x540] ss:$8 sps:$4 sm:$0xff]   ;;  %v9604_v0 = vld [vmem:[#allocation3 + $0x690] ss:$8 sps:$4 sm:$0xff]   ;;  %v9630_v9 = vld [vmem:[#allocation3 + $0x6d4] ss:$8 sps:$4 sm:$0xff]  }
 0x224   :  { %5365 = vmatprep.subr.bf16.mxu1 %v9582_v27  ;;  %v9609_v27 = vld [vmem:[#allocation3 + $0x554] ss:$8 sps:$4 sm:$0xff]   ;;  %v9636_v37 = vld [vmem:[#allocation3 + $0x6e4] ss:$8 sps:$4 sm:$0xff]  }
 0x226   :  { %5147 = vmatpush1.bf16.msra.mxu0 %v9577_v30  ;;  %v5393_v30 = vpack.c.b16 %v11715_v6, %v11715_v6  ;;  %v9624_v6 = vld [vmem:[#allocation3 + $0x6c4] ss:$8 sps:$4 sm:$0xff]  }
 0x227   :  { %5366 = vmatpush1.bf16.msra.mxu1 %v9580_v5  ;;  %5148 = vmatprep.subr.bf16.mxu0 %v9585_v20  ;;  %v9612_v5 = vld [vmem:[#allocation3 + $0x6a4] ss:$8 sps:$4 sm:$0xff]   ;;  %v9610_v20 = vld [vmem:[#allocation3 + $0x6a0] ss:$8 sps:$4 sm:$0xff]  }
 0x228   :  { %5367 = vmatprep.subr.bf16.mxu1 %v9588_v4  ;;  %v9615_v4 = vld [vmem:[#allocation3 + $0x564] ss:$8 sps:$4 sm:$0xff]  }
 0x22a   :  { %5149 = vmatpush1.bf16.msra.mxu0 %v9583_v34  ;;  %v9619_v34 = vld [vmem:[#allocation3 + $0x570] ss:$8 sps:$4 sm:$0xff]  }
 0x22b   :  { %5368 = vmatpush1.bf16.msra.mxu1 %v9586_v63  ;;  %5150 = vmatprep.subr.bf16.mxu0 %v9591_v21  ;;  %v9625_v63 = vld [vmem:[#allocation3 + $0x580] ss:$8 sps:$4 sm:$0xff]   ;;  %v9628_v21 = vld [vmem:[#allocation3 + $0x6d0] ss:$8 sps:$4 sm:$0xff]  }
 0x22c   :  { %5369 = vmatprep.subr.bf16.mxu1 %v9594_v56  ;;  %v3447_v15 = vpop.f32.mrb[20].mxu1  ;;  %v9631_v56 = vld [vmem:[#allocation3 + $0x590] ss:$8 sps:$4 sm:$0xff]  }
 0x22d   :  { %v8003_v1 = vsel %vm7985_vm2, %v3447_v15, 0.0  ;;  %v3449_v39 = vpop.f32.mrb[21].mxu1 }
 0x22e   :  { %5151 = vmatpush1.bf16.msra.mxu0 %v9589_v17  ;;  %v11890_v32 = vadd.f32 %v8003_v1, %v8002_v51  ;;  %v8034_v41 = vsel %vm7985_vm2, %v3449_v39, 0.0  ;;  %v3451_v12 = vpop.f32.mrb[22].mxu1  ;;  %v9622_v51 = vld [vmem:[#allocation3 + $0x6c0] ss:$8 sps:$4 sm:$0xff]   ;;  %v9645_v1 = vld [vmem:[#allocation3 + $0x5b4] ss:$8 sps:$4 sm:$0xff]  }
 0x22f   :  { %5370 = vmatpush1.bf16.msra.mxu1 %v9592_v8  ;;  %5152 = vmatprep.subr.bf16.mxu0 %v9597_v28  ;;  %v11895_v36 = vadd.f32 %v8034_v41, %v8033_v44  ;;  %v3452_v35 = vpop.f32.mrb[23].mxu1  ;;  %v9633_v44 = vld [vmem:[#allocation3 + $0x594] ss:$8 sps:$4 sm:$0xff]   ;;  %v9634_v17 = vld [vmem:[#allocation3 + $0x6e0] ss:$8 sps:$4 sm:$0xff]  }
 0x230   :  { %5773 = vmatprep.subr.bf16.mxu1 %v9600_v59  ;;  %v9639_v8 = vld [vmem:[#allocation3 + $0x5a4] ss:$8 sps:$4 sm:$0xff]   ;;  %v9642_v28 = vld [vmem:[#allocation3 + $0x6f4] ss:$8 sps:$4 sm:$0xff]  }
 0x232   :  { %5153 = vmatpush1.bf16.msra.mxu0 %v9595_v16  ;;  %5372 = vmatmul.mubr.bf16.vlgmr.msra.gmra.mrb[40].mxu1 %v5175_v45  ;;  %v9637_v16 = vld [vmem:[#allocation3 + $0x5a0] ss:$8 sps:$4 sm:$0xff]   ;;  %v9648_v45 = vld [vmem:[#allocation3 + $0x704] ss:$8 sps:$4 sm:$0xff]  }
 0x233   :  { %5774 = vmatpush1.bf16.msra.mxu1 %v9598_v10  ;;  %5805 = vmatprep.mubr.bf16.mxu1 %v5610_v52  ;;  %v9640_v10 = vld [vmem:[#allocation3 + $0x6f0] ss:$8 sps:$4 sm:$0xff]  }
 0x234   :  { %5556 = vmatprep.subr.bf16.mxu0 %v9603_v54  ;;  %5775 = vmatprep.subr.bf16.mxu1 %v9606_v31  ;;  %v9643_v52 = vld [vmem:[#allocation3 + $0x5b0] ss:$8 sps:$4 sm:$0xff]  }
 0x235   :  { %5155 = vmatmul.mubr.bf16.vlgmr.msra.gmra.mrb[32].mxu0 %v4958_v18 }
 0x236   :  { %5557 = vmatpush1.bf16.msra.mxu0 %v9601_v42  ;;  %5588 = vmatprep.mubr.bf16.mxu0 %v5393_v30 }
 0x237   :  { %5776 = vmatpush1.bf16.msra.mxu1 %v9604_v0  ;;  %5558 = vmatprep.subr.bf16.mxu0 %v9609_v27  ;;  %v9646_v0 = vld [vmem:[#allocation3 + $0x700] ss:$8 sps:$4 sm:$0xff]   ;;  %v9651_v27 = vld [vmem:[#allocation3 + $0x5c4] ss:$8 sps:$4 sm:$0xff]  }
 0x238   :  { %5777 = vmatprep.subr.bf16.mxu1 %v9612_v5 }
 0x23a   :  { %5559 = vmatpush1.bf16.msra.mxu0 %v9607_v19 }
 0x23b   :  { %5778 = vmatpush1.bf16.msra.mxu1 %v9610_v20  ;;  %5560 = vmatprep.subr.bf16.mxu0 %v9615_v4  ;;  %v9654_v20 = vld [vmem:[#allocation3 + $0x714] ss:$8 sps:$4 sm:$0xff]  }
 0x23c   :  { %5779 = vmatprep.subr.bf16.mxu1 %v9618_v29 }
 0x23e   :  { %5561 = vmatpush1.bf16.msra.mxu0 %v9613_v23  ;;  %v9649_v23 = vld [vmem:[#allocation3 + $0x5c0] ss:$8 sps:$4 sm:$0xff]  }
 0x23f   :  { %5780 = vmatpush1.bf16.msra.mxu1 %v9616_v55  ;;  %5562 = vmatprep.subr.bf16.mxu0 %v9621_v47  ;;  %v9652_v55 = vld [vmem:[#allocation3 + $0x710] ss:$8 sps:$4 sm:$0xff]   ;;  %v9657_v47 = vld [vmem:[#allocation3 + $0x5d4] ss:$8 sps:$4 sm:$0xff]  }
 0x240   :  { %5781 = vmatprep.subr.bf16.mxu1 %v9624_v6  ;;  %v9660_v6 = vld [vmem:[#allocation3 + $0x724] ss:$8 sps:$4 sm:$0xff]  }
 0x242   :  { %5563 = vmatpush1.bf16.msra.mxu0 %v9619_v34  ;;  %v9655_v34 = vld [vmem:[#allocation3 + $0x5d0] ss:$8 sps:$4 sm:$0xff]  }
 0x243   :  { %5782 = vmatpush1.bf16.msra.mxu1 %v9622_v51  ;;  %5564 = vmatprep.subr.bf16.mxu0 %v9627_v14  ;;  %v9663_v51 = vld [vmem:[#allocation3 + $0x5e4] ss:$8 sps:$4 sm:$0xff]   ;;  %v9666_v14 = vld [vmem:[#allocation3 + $0x734] ss:$8 sps:$4 sm:$0xff]  }
 0x244   :  { %5783 = vmatprep.subr.bf16.mxu1 %v9630_v9  ;;  %v9661_v9 = vld [vmem:[#allocation3 + $0x5e0] ss:$8 sps:$4 sm:$0xff]  }
 0x246   :  { %5565 = vmatpush1.bf16.msra.mxu0 %v9625_v63  ;;  %v9664_v63 = vld [vmem:[#allocation3 + $0x730] ss:$8 sps:$4 sm:$0xff]  }
 0x247   :  { %5784 = vmatpush1.bf16.msra.mxu1 %v9628_v21  ;;  %5566 = vmatprep.subr.bf16.mxu0 %v9633_v44  ;;  %v9669_v21 = vld [vmem:[#allocation3 + $0x5f4] ss:$8 sps:$4 sm:$0xff]   ;;  %v9672_v44 = vld [vmem:[#allocation3 + $0x744] ss:$8 sps:$4 sm:$0xff]  }
 0x248   :  { %5785 = vmatprep.subr.bf16.mxu1 %v9636_v37  ;;  %v3629_v59 = vpop.f32.mrb[24].mxu1 }
 0x249   :  { %v3631_v15 = vpop.f32.mrb[25].mxu1  ;;  %v8007_v30 = vsel %vm7985_vm2, %v3629_v59, 0.0 }
 0x24a   :  { %5567 = vmatpush1.bf16.msra.mxu0 %v9631_v56  ;;  %v3633_v39 = vpop.f32.mrb[26].mxu1  ;;  %v8038_v4 = vsel %vm7985_vm2, %v3631_v15, 0.0  ;;  %v9670_v15 = vld [vmem:[#allocation3 + $0x740] ss:$8 sps:$4 sm:$0xff]  }
 0x24b   :  { %5786 = vmatpush1.bf16.msra.mxu1 %v9634_v17  ;;  %5568 = vmatprep.subr.bf16.mxu0 %v9639_v8  ;;  %v3538_v54 = vpop.f32.mrb[16].mxu0  ;;  %v3634_v31 = vpop.f32.mrb[27].mxu1  ;;  %v9667_v8 = vld [vmem:[#allocation3 + $0x5f0] ss:$8 sps:$4 sm:$0xff]  }
 0x24c   :  { %5787 = vmatprep.subr.bf16.mxu1 %v9642_v28  ;;  %v8005_v41 = vsel %vm7985_vm2, %v3538_v54, 0.0  ;;  %v3540_v12 = vpop.f32.mrb[17].mxu0  ;;  %v9673_v54 = vld [vmem:[#allocation3 + $0x600] ss:$8 sps:$4 sm:$0xff]   ;;  %v9676_v31 = vld [vmem:[#allocation3 + $0x750] ss:$8 sps:$4 sm:$0xff]  }
 0x24d   :  { %v8006_v35 = vadd.f32 %v8005_v41, %v11890_v32  ;;  %v8036_v42 = vsel %vm7985_vm2, %v3540_v12, 0.0  ;;  %v3542_v18 = vpop.f32.mrb[18].mxu0  ;;  %v9681_v41 = vld [vmem:[#allocation3 + $0x614] ss:$8 sps:$4 sm:$0xff]   ;;  %v9684_v12 = vld [vmem:[#allocation3 + $0x764] ss:$8 sps:$4 sm:$0xff]  }
 0x24e   :  { %5569 = vmatpush1.bf16.msra.mxu0 %v9637_v16  ;;  %v8037_v5 = vadd.f32 %v8036_v42, %v11895_v36  ;;  %v3543_v19 = vpop.f32.mrb[19].mxu0  ;;  %v9658_v36 = vld [vmem:[#allocation3 + $0x720] ss:$8 sps:$4 sm:$0xff]   ;;  %v9687_v42 = vld [vmem:[#allocation3 + $0x624] ss:$8 sps:$4 sm:$0xff]  }
 0x24f   :  { %5788 = vmatpush1.bf16.msra.mxu1 %v9640_v10  ;;  %5570 = vmatprep.subr.bf16.mxu0 %v9645_v1  ;;  %v8008_v29 = vadd.f32 %v8007_v30, %v8006_v35  ;;  %v9675_v10 = vld [vmem:[#allocation3 + $0x604] ss:$8 sps:$4 sm:$0xff]   ;;  %v9682_v35 = vld [vmem:[#allocation3 + $0x760] ss:$8 sps:$4 sm:$0xff]   ;;  %v9690_v18 = vld [vmem:[#allocation3 + $0x774] ss:$8 sps:$4 sm:$0xff]  }
 0x250   :  { %5789 = vmatprep.subr.bf16.mxu1 %v9648_v45  ;;  %v8039_v32 = vadd.f32 %v8038_v4, %v8037_v5  ;;  %v9678_v45 = vld [vmem:[#allocation3 + $0x754] ss:$8 sps:$4 sm:$0xff]   ;;  %v9696_v5 = vld [vmem:[#allocation3 + $0x904] ss:$8 sps:$4 sm:$0xff]  }
 0x251   :  { %v9693_v30 = vld [vmem:[#allocation3 + $0x634] ss:$8 sps:$4 sm:$0xff]  }
 0x252   :  { %5571 = vmatpush1.bf16.msra.mxu0 %v9643_v52  ;;  %v9679_v52 = vld [vmem:[#allocation3 + $0x610] ss:$8 sps:$4 sm:$0xff]  }
 0x253   :  { %5790 = vmatpush1.bf16.msra.mxu1 %v9646_v0  ;;  %5572 = vmatprep.subr.bf16.mxu0 %v9651_v27  ;;  %v9685_v0 = vld [vmem:[#allocation3 + $0x620] ss:$8 sps:$4 sm:$0xff]   ;;  %v9688_v27 = vld [vmem:[#allocation3 + $0x770] ss:$8 sps:$4 sm:$0xff]  }
 0x254   :  { %5791 = vmatprep.subr.bf16.mxu1 %v9654_v20 }
 0x256   :  { %5573 = vmatpush1.bf16.msra.mxu0 %v9649_v23 }
 0x257   :  { %5792 = vmatpush1.bf16.msra.mxu1 %v9652_v55  ;;  %5574 = vmatprep.subr.bf16.mxu0 %v9657_v47  ;;  %v9694_v47 = vld [vmem:[#allocation3 + $0x900] ss:$8 sps:$4 sm:$0xff]  }
 0x258   :  { %5793 = vmatprep.subr.bf16.mxu1 %v9660_v6 }
 0x25a   :  { %5575 = vmatpush1.bf16.msra.mxu0 %v9655_v34 }
 0x25b   :  { %5794 = vmatpush1.bf16.msra.mxu1 %v9658_v36  ;;  %5576 = vmatprep.subr.bf16.mxu0 %v9663_v51  ;;  %v3720_v37 = vpop.f32.mrb[20].mxu0  ;;  %v5609_v36 = vpack.c.b16 %v11696_v57, %v11696_v57  ;;  %v9699_v51 = vld [vmem:[#allocation3 + $0x7c4] ss:$8 sps:$4 sm:$0xff]   ;;  %v5827_v57 = vpack.c.b16 %v11734_v50, %v11734_v50 }
 0x25c   :  { %5795 = vmatprep.subr.bf16.mxu1 %v9666_v14  ;;  %v8009_v56 = vsel %vm7985_vm2, %v3720_v37, 0.0  ;;  %v3722_v17 = vpop.f32.mrb[21].mxu0  ;;  %v9702_v14 = vld [vmem:[#allocation3 + $0x914] ss:$8 sps:$4 sm:$0xff]   ;;  %v9720_v50 = vld [vmem:[#allocation3 + $0x944] ss:$8 sps:$4 sm:$0xff]  }
 0x25d   :  { %v8010_v28 = vadd.f32 %v8009_v56, %v8008_v29  ;;  %v8040_v59 = vsel %vm7985_vm2, %v3722_v17, 0.0  ;;  %v3724_v16 = vpop.f32.mrb[22].mxu0  ;;  %v9691_v29 = vld [vmem:[#allocation3 + $0x630] ss:$8 sps:$4 sm:$0xff]   ;;  %v9705_v37 = vld [vmem:[#allocation3 + $0x7d4] ss:$8 sps:$4 sm:$0xff]  }
 0x25e   :  { %5577 = vmatpush1.bf16.msra.mxu0 %v9661_v9  ;;  %v8041_v1 = vadd.f32 %v8040_v59, %v8039_v32  ;;  %v3725_v39 = vpop.f32.mrb[23].mxu0  ;;  %v6044_v9 = vpack.c.b16 %v11727_v53, %v11727_v53  ;;  %v9708_v56 = vld [vmem:[#allocation3 + $0x924] ss:$8 sps:$4 sm:$0xff]   ;;  %v9703_v53 = vld [vmem:[#allocation3 + $0x7d0] ss:$8 sps:$4 sm:$0xff]  }
 0x25f   :  { %5796 = vmatpush1.bf16.msra.mxu1 %v9664_v63  ;;  %5578 = vmatprep.subr.bf16.mxu0 %v9669_v21  ;;  %v9697_v63 = vld [vmem:[#allocation3 + $0x7c0] ss:$8 sps:$4 sm:$0xff]   ;;  %v5392_v21 = vpack.c.b16 %v11700_v43, %v11700_v43  ;;  %v9712_v59 = vld [vmem:[#allocation3 + $0x930] ss:$8 sps:$4 sm:$0xff]   ;;  %v9717_v16 = vld [vmem:[#allocation3 + $0x7f4] ss:$8 sps:$4 sm:$0xff]  }
 0x260   :  { %5797 = vmatprep.subr.bf16.mxu1 %v9672_v44  ;;  %v9700_v44 = vld [vmem:[#allocation3 + $0x910] ss:$8 sps:$4 sm:$0xff]   ;;  %v9706_v17 = vld [vmem:[#allocation3 + $0x920] ss:$8 sps:$4 sm:$0xff]   ;;  %v9726_v39 = vld [vmem:[#allocation3 + $0x954] ss:$8 sps:$4 sm:$0xff]  }
 0x261   :  { %v9709_v43 = vld [vmem:[#allocation3 + $0x7e0] ss:$8 sps:$4 sm:$0xff]  }
 0x262   :  { %5579 = vmatpush1.bf16.msra.mxu0 %v9667_v8  ;;  %v9711_v8 = vld [vmem:[#allocation3 + $0x7e4] ss:$8 sps:$4 sm:$0xff]  }
 0x263   :  { %5798 = vmatpush1.bf16.msra.mxu1 %v9670_v15  ;;  %5580 = vmatprep.subr.bf16.mxu0 %v9675_v10  ;;  %v9715_v15 = vld [vmem:[#allocation3 + $0x7f0] ss:$8 sps:$4 sm:$0xff]   ;;  %v9718_v10 = vld [vmem:[#allocation3 + $0x940] ss:$8 sps:$4 sm:$0xff]  }
 0x264   :  { %5799 = vmatprep.subr.bf16.mxu1 %v9678_v45  ;;  %v9721_v45 = vld [vmem:[#allocation3 + $0x800] ss:$8 sps:$4 sm:$0xff]  }
 0x266   :  { %5581 = vmatpush1.bf16.msra.mxu0 %v9673_v54  ;;  %v9724_v54 = vld [vmem:[#allocation3 + $0x950] ss:$8 sps:$4 sm:$0xff]  }
 0x267   :  { %5800 = vmatpush1.bf16.msra.mxu1 %v9676_v31  ;;  %5582 = vmatprep.subr.bf16.mxu0 %v9681_v41  ;;  %v9729_v31 = vld [vmem:[#allocation3 + $0x814] ss:$8 sps:$4 sm:$0xff]   ;;  %v9732_v41 = vld [vmem:[#allocation3 + $0x964] ss:$8 sps:$4 sm:$0xff]  }
 0x268   :  { %5801 = vmatprep.subr.bf16.mxu1 %v9684_v12 }
 0x26a   :  { %5583 = vmatpush1.bf16.msra.mxu0 %v9679_v52 }
 0x26b   :  { %5802 = vmatpush1.bf16.msra.mxu1 %v9682_v35  ;;  %5584 = vmatprep.subr.bf16.mxu0 %v9687_v42  ;;  %v3811_v19 = vpop.f32.mrb[28].mxu1  ;;  %v9727_v35 = vld [vmem:[#allocation3 + $0x810] ss:$8 sps:$4 sm:$0xff]  }
 0x26c   :  { %5803 = vmatprep.subr.bf16.mxu1 %v9690_v18  ;;  %v8011_v20 = vsel %vm7985_vm2, %v3811_v19, 0.0  ;;  %v3813_v4 = vpop.f32.mrb[29].mxu1  ;;  %v9730_v18 = vld [vmem:[#allocation3 + $0x960] ss:$8 sps:$4 sm:$0xff]  }
 0x26d   :  { %v11910_v23 = vadd.f32 %v8011_v20, %v8010_v28  ;;  %v8042_v32 = vsel %vm7985_vm2, %v3813_v4, 0.0  ;;  %v3815_v55 = vpop.f32.mrb[30].mxu1  ;;  %v9714_v28 = vld [vmem:[#allocation3 + $0x934] ss:$8 sps:$4 sm:$0xff]  }
 0x26e   :  { %5585 = vmatpush1.bf16.msra.mxu0 %v9685_v0  ;;  %v11913_v6 = vadd.f32 %v8042_v32, %v8041_v1  ;;  %v3816_v34 = vpop.f32.mrb[31].mxu1  ;;  %v9723_v1 = vld [vmem:[#allocation3 + $0x804] ss:$8 sps:$4 sm:$0xff]   ;;  %v9733_v55 = vld [vmem:[#allocation3 + $0x820] ss:$8 sps:$4 sm:$0xff]  }
 0x26f   :  { %5804 = vmatpush1.bf16.msra.mxu1 %v9688_v27  ;;  %5586 = vmatprep.subr.bf16.mxu0 %v9693_v30  ;;  %v9735_v0 = vld [vmem:[#allocation3 + $0x824] ss:$8 sps:$4 sm:$0xff]  }
 0x270   :  { %6207 = vmatprep.subr.bf16.mxu1 %v9696_v5  ;;  %v9738_v5 = vld [vmem:[#allocation3 + $0x974] ss:$8 sps:$4 sm:$0xff]  }
 0x272   :  { %5587 = vmatpush1.bf16.msra.mxu0 %v9691_v29  ;;  %5806 = vmatmul.mubr.bf16.vlgmr.msra.gmra.mrb[44].mxu1 %v5609_v36 }
 0x273   :  { %6208 = vmatpush1.bf16.msra.mxu1 %v9694_v47  ;;  %6239 = vmatprep.mubr.bf16.mxu1 %v6044_v9 }
 0x274   :  { %5990 = vmatprep.subr.bf16.mxu0 %v9699_v51  ;;  %6209 = vmatprep.subr.bf16.mxu1 %v9702_v14  ;;  %v9736_v51 = vld [vmem:[#allocation3 + $0x970] ss:$8 sps:$4 sm:$0xff]   ;;  %v9741_v14 = vld [vmem:[#allocation3 + $0x834] ss:$8 sps:$4 sm:$0xff]  }
 0x275   :  { %5589 = vmatmul.mubr.bf16.vlgmr.msra.gmra.mrb[36].mxu0 %v5392_v21 }
 0x276   :  { %5991 = vmatpush1.bf16.msra.mxu0 %v9697_v63  ;;  %6022 = vmatprep.mubr.bf16.mxu0 %v5827_v57  ;;  %v9747_v57 = vld [vmem:[#allocation3 + $0x844] ss:$8 sps:$4 sm:$0xff]  }
 0x277   :  { %6210 = vmatpush1.bf16.msra.mxu1 %v9700_v44  ;;  %5992 = vmatprep.subr.bf16.mxu0 %v9705_v37  ;;  %v9739_v44 = vld [vmem:[#allocation3 + $0x830] ss:$8 sps:$4 sm:$0xff]   ;;  %v9742_v37 = vld [vmem:[#allocation3 + $0x980] ss:$8 sps:$4 sm:$0xff]  }
 0x278   :  { %6211 = vmatprep.subr.bf16.mxu1 %v9708_v56  ;;  %v9745_v56 = vld [vmem:[#allocation3 + $0x840] ss:$8 sps:$4 sm:$0xff]  }
 0x27a   :  { %5993 = vmatpush1.bf16.msra.mxu0 %v9703_v53  ;;  %v9748_v53 = vld [vmem:[#allocation3 + $0x990] ss:$8 sps:$4 sm:$0xff]  }
 0x27b   :  { %6212 = vmatpush1.bf16.msra.mxu1 %v9706_v17  ;;  %5994 = vmatprep.subr.bf16.mxu0 %v9711_v8  ;;  %v9753_v17 = vld [vmem:[#allocation3 + $0x854] ss:$8 sps:$4 sm:$0xff]   ;;  %v9756_v8 = vld [vmem:[#allocation3 + $0x9a4] ss:$8 sps:$4 sm:$0xff]  }
 0x27c   :  { %6213 = vmatprep.subr.bf16.mxu1 %v9714_v28  ;;  %v9751_v28 = vld [vmem:[#allocation3 + $0x850] ss:$8 sps:$4 sm:$0xff]  }
 0x27e   :  { %5995 = vmatpush1.bf16.msra.mxu0 %v9709_v43  ;;  %v9754_v43 = vld [vmem:[#allocation3 + $0x9a0] ss:$8 sps:$4 sm:$0xff]  }
 0x27f   :  { %6214 = vmatpush1.bf16.msra.mxu1 %v9712_v59  ;;  %5996 = vmatprep.subr.bf16.mxu0 %v9717_v16  ;;  %v9759_v59 = vld [vmem:[#allocation3 + $0x864] ss:$8 sps:$4 sm:$0xff]   ;;  %v9762_v16 = vld [vmem:[#allocation3 + $0x9b4] ss:$8 sps:$4 sm:$0xff]  }
 0x280   :  { %6215 = vmatprep.subr.bf16.mxu1 %v9720_v50  ;;  %v9757_v50 = vld [vmem:[#allocation3 + $0x860] ss:$8 sps:$4 sm:$0xff]  }
 0x282   :  { %5997 = vmatpush1.bf16.msra.mxu0 %v9715_v15  ;;  %v9760_v15 = vld [vmem:[#allocation3 + $0x9b0] ss:$8 sps:$4 sm:$0xff]  }
 0x283   :  { %6216 = vmatpush1.bf16.msra.mxu1 %v9718_v10  ;;  %5998 = vmatprep.subr.bf16.mxu0 %v9723_v1  ;;  %v9765_v10 = vld [vmem:[#allocation3 + $0x874] ss:$8 sps:$4 sm:$0xff]   ;;  %v9768_v1 = vld [vmem:[#allocation3 + $0x9c4] ss:$8 sps:$4 sm:$0xff]  }
 0x284   :  { %6217 = vmatprep.subr.bf16.mxu1 %v9726_v39  ;;  %v9763_v39 = vld [vmem:[#allocation3 + $0x870] ss:$8 sps:$4 sm:$0xff]  }
 0x285   :  { %v3993_v12 = vpop.f32.mrb[32].mxu1 }
 0x286   :  { %5999 = vmatpush1.bf16.msra.mxu0 %v9721_v45  ;;  %v3995_v52 = vpop.f32.mrb[33].mxu1  ;;  %v8015_v47 = vsel %vm7985_vm2, %v3993_v12, 0.0  ;;  %v9766_v45 = vld [vmem:[#allocation3 + $0x9c0] ss:$8 sps:$4 sm:$0xff]   ;;  %v9772_v12 = vld [vmem:[#allocation3 + $0x9d0] ss:$8 sps:$4 sm:$0xff]  }
 0x287   :  { %6218 = vmatpush1.bf16.msra.mxu1 %v9724_v54  ;;  %v3997_v42 = vpop.f32.mrb[34].mxu1  ;;  %6000 = vmatprep.subr.bf16.mxu0 %v9729_v31  ;;  %v8046_v9 = vsel %vm7985_vm2, %v3995_v52, 0.0  ;;  %v9771_v54 = vld [vmem:[#allocation3 + $0x884] ss:$8 sps:$4 sm:$0xff]   ;;  %v9774_v31 = vld [vmem:[#allocation3 + $0x9d4] ss:$8 sps:$4 sm:$0xff]  }
 0x288   :  { %v3902_v27 = vpop.f32.mrb[24].mxu0  ;;  %v3998_v30 = vpop.f32.mrb[35].mxu1  ;;  %6219 = vmatprep.subr.bf16.mxu1 %v9732_v41  ;;  %v9769_v41 = vld [vmem:[#allocation3 + $0x880] ss:$8 sps:$4 sm:$0xff]   ;;  %v9777_v52 = vld [vmem:[#allocation3 + $0x894] ss:$8 sps:$4 sm:$0xff]  }
 0x289   :  { %v8013_v19 = vsel %vm7985_vm2, %v3902_v27, 0.0  ;;  %v3904_v20 = vpop.f32.mrb[25].mxu0  ;;  %v9775_v42 = vld [vmem:[#allocation3 + $0x890] ss:$8 sps:$4 sm:$0xff]   ;;  %v9786_v27 = vld [vmem:[#allocation3 + $0x9f4] ss:$8 sps:$4 sm:$0xff]  }
 0x28a   :  { %v8014_v4 = vadd.f32 %v8013_v19, %v11910_v23  ;;  %v8044_v29 = vsel %vm7985_vm2, %v3904_v20, 0.0  ;;  %6001 = vmatpush1.bf16.msra.mxu0 %v9727_v35  ;;  %v3906_v32 = vpop.f32.mrb[26].mxu0  ;;  %v9744_v23 = vld [vmem:[#allocation3 + $0x984] ss:$8 sps:$4 sm:$0xff]   ;;  %v9781_v30 = vld [vmem:[#allocation3 + $0x8a0] ss:$8 sps:$4 sm:$0xff]  }
 0x28b   :  { %v8045_v34 = vadd.f32 %v8044_v29, %v11913_v6  ;;  %6220 = vmatpush1.bf16.msra.mxu1 %v9730_v18  ;;  %v3907_v36 = vpop.f32.mrb[27].mxu0  ;;  %6002 = vmatprep.subr.bf16.mxu0 %v9735_v0  ;;  %v9750_v6 = vld [vmem:[#allocation3 + $0x994] ss:$8 sps:$4 sm:$0xff]   ;;  %v9780_v35 = vld [vmem:[#allocation3 + $0x9e4] ss:$8 sps:$4 sm:$0xff]   ;;  %v6043_v32 = vpack.c.b16 %v11744_v46, %v11744_v46  ;;  %v6261_v46 = vpack.c.b16 %v11779_v60, %v11779_v60 }
 0x28c   :  { %v11929_v63 = vadd.f32 %v8015_v47, %v8014_v4  ;;  %6221 = vmatprep.subr.bf16.mxu1 %v9738_v5  ;;  %v9778_v18 = vld [vmem:[#allocation3 + $0x9e0] ss:$8 sps:$4 sm:$0xff]   ;;  %v9783_v0 = vld [vmem:[#allocation3 + $0x8a4] ss:$8 sps:$4 sm:$0xff]   ;;  %v9784_v5 = vld [vmem:[#allocation3 + $0x9f0] ss:$8 sps:$4 sm:$0xff]  }
 0x28d   :  { %v11931_v21 = vadd.f32 %v8046_v9, %v8045_v34  ;;  %v9789_v19 = vld [vmem:[#allocation3 + $0x8b4] ss:$8 sps:$4 sm:$0xff]   ;;  %v9792_v20 = vld [vmem:[#allocation3 + $0xb84] ss:$8 sps:$4 sm:$0xff]   ;;  %v9787_v4 = vld [vmem:[#allocation3 + $0x8b0] ss:$8 sps:$4 sm:$0xff]   ;;  %v6478_v34 = vpack.c.b16 %v11752_v2, %v11752_v2 }
 0x28e   :  { %6003 = vmatpush1.bf16.msra.mxu0 %v9733_v55  ;;  %v9790_v29 = vld [vmem:[#allocation3 + $0xb80] ss:$8 sps:$4 sm:$0xff]   ;;  %v9795_v55 = vld [vmem:[#allocation3 + $0xa44] ss:$8 sps:$4 sm:$0xff]   ;;  %v9798_v47 = vld [vmem:[#allocation3 + $0xb94] ss:$8 sps:$4 sm:$0xff]  }
 0x28f   :  { %6222 = vmatpush1.bf16.msra.mxu1 %v9736_v51  ;;  %6004 = vmatprep.subr.bf16.mxu0 %v9741_v14  ;;  %v9793_v36 = vld [vmem:[#allocation3 + $0xa40] ss:$8 sps:$4 sm:$0xff]   ;;  %v5826_v51 = vpack.c.b16 %v11738_v49, %v11738_v49  ;;  %v9796_v14 = vld [vmem:[#allocation3 + $0xb90] ss:$8 sps:$4 sm:$0xff]   ;;  %v9801_v9 = vld [vmem:[#allocation3 + $0xa54] ss:$8 sps:$4 sm:$0xff]  }
 0x290   :  { %6223 = vmatprep.subr.bf16.mxu1 %v9744_v23  ;;  %v9804_v23 = vld [vmem:[#allocation3 + $0xba4] ss:$8 sps:$4 sm:$0xff]   ;;  %v9799_v2 = vld [vmem:[#allocation3 + $0xa50] ss:$8 sps:$4 sm:$0xff]   ;;  %v9805_v49 = vld [vmem:[#allocation3 + $0xa60] ss:$8 sps:$4 sm:$0xff]  }
 0x291   :  { %v9816_v60 = vld [vmem:[#allocation3 + $0xbc4] ss:$8 sps:$4 sm:$0xff]  }
 0x292   :  { %6005 = vmatpush1.bf16.msra.mxu0 %v9739_v44  ;;  %v9802_v44 = vld [vmem:[#allocation3 + $0xba0] ss:$8 sps:$4 sm:$0xff]  }
 0x293   :  { %6224 = vmatpush1.bf16.msra.mxu1 %v9742_v37  ;;  %6006 = vmatprep.subr.bf16.mxu0 %v9747_v57  ;;  %v9807_v37 = vld [vmem:[#allocation3 + $0xa64] ss:$8 sps:$4 sm:$0xff]   ;;  %v9810_v57 = vld [vmem:[#allocation3 + $0xbb4] ss:$8 sps:$4 sm:$0xff]  }
 0x294   :  { %6225 = vmatprep.subr.bf16.mxu1 %v9750_v6  ;;  %v9808_v6 = vld [vmem:[#allocation3 + $0xbb0] ss:$8 sps:$4 sm:$0xff]  }
 0x296   :  { %6007 = vmatpush1.bf16.msra.mxu0 %v9745_v56  ;;  %v9813_v56 = vld [vmem:[#allocation3 + $0xa74] ss:$8 sps:$4 sm:$0xff]  }
 0x297   :  { %6226 = vmatpush1.bf16.msra.mxu1 %v9748_v53  ;;  %6008 = vmatprep.subr.bf16.mxu0 %v9753_v17  ;;  %v9811_v53 = vld [vmem:[#allocation3 + $0xa70] ss:$8 sps:$4 sm:$0xff]   ;;  %v9814_v17 = vld [vmem:[#allocation3 + $0xbc0] ss:$8 sps:$4 sm:$0xff]  }
 0x298   :  { %6227 = vmatprep.subr.bf16.mxu1 %v9756_v8  ;;  %v9819_v8 = vld [vmem:[#allocation3 + $0xa84] ss:$8 sps:$4 sm:$0xff]  }
 0x29a   :  { %6009 = vmatpush1.bf16.msra.mxu0 %v9751_v28  ;;  %v9822_v28 = vld [vmem:[#allocation3 + $0xbd4] ss:$8 sps:$4 sm:$0xff]  }
 0x29b   :  { %6228 = vmatpush1.bf16.msra.mxu1 %v9754_v43  ;;  %6010 = vmatprep.subr.bf16.mxu0 %v9759_v59  ;;  %v9817_v43 = vld [vmem:[#allocation3 + $0xa80] ss:$8 sps:$4 sm:$0xff]   ;;  %v9820_v59 = vld [vmem:[#allocation3 + $0xbd0] ss:$8 sps:$4 sm:$0xff]  }
 0x29c   :  { %6229 = vmatprep.subr.bf16.mxu1 %v9762_v16  ;;  %v9825_v16 = vld [vmem:[#allocation3 + $0xa94] ss:$8 sps:$4 sm:$0xff]  }
 0x29e   :  { %6011 = vmatpush1.bf16.msra.mxu0 %v9757_v50  ;;  %v9828_v50 = vld [vmem:[#allocation3 + $0xbe4] ss:$8 sps:$4 sm:$0xff]  }
 0x29f   :  { %6230 = vmatpush1.bf16.msra.mxu1 %v9760_v15  ;;  %6012 = vmatprep.subr.bf16.mxu0 %v9765_v10 }
 0x2a0   :  { %6231 = vmatprep.subr.bf16.mxu1 %v9768_v1  ;;  %v9823_v1 = vld [vmem:[#allocation3 + $0xa90] ss:$8 sps:$4 sm:$0xff]  }
 0x2a2   :  { %6013 = vmatpush1.bf16.msra.mxu0 %v9763_v39 }
 0x2a3   :  { %6232 = vmatpush1.bf16.msra.mxu1 %v9766_v45  ;;  %6014 = vmatprep.subr.bf16.mxu0 %v9771_v54  ;;  %v9826_v45 = vld [vmem:[#allocation3 + $0xbe0] ss:$8 sps:$4 sm:$0xff]   ;;  %v9831_v54 = vld [vmem:[#allocation3 + $0xaa4] ss:$8 sps:$4 sm:$0xff]  }
 0x2a4   :  { %6233 = vmatprep.subr.bf16.mxu1 %v9774_v31 }
 0x2a6   :  { %6015 = vmatpush1.bf16.msra.mxu0 %v9769_v41 }
 0x2a7   :  { %6234 = vmatpush1.bf16.msra.mxu1 %v9772_v12  ;;  %6016 = vmatprep.subr.bf16.mxu0 %v9777_v52  ;;  %v9834_v12 = vld [vmem:[#allocation3 + $0xbf4] ss:$8 sps:$4 sm:$0xff]  }
 0x2a8   :  { %6235 = vmatprep.subr.bf16.mxu1 %v9780_v35 }
 0x2aa   :  { %6017 = vmatpush1.bf16.msra.mxu0 %v9775_v42 }
 0x2ab   :  { %6236 = vmatpush1.bf16.msra.mxu1 %v9778_v18  ;;  %6018 = vmatprep.subr.bf16.mxu0 %v9783_v0 }
 0x2ac   :  { %6237 = vmatprep.subr.bf16.mxu1 %v9786_v27 }
 0x2ae   :  { %6019 = vmatpush1.bf16.msra.mxu0 %v9781_v30 }
 0x2af   :  { %6238 = vmatpush1.bf16.msra.mxu1 %v9784_v5  ;;  %6020 = vmatprep.subr.bf16.mxu0 %v9789_v19  ;;  %v9829_v5 = vld [vmem:[#allocation3 + $0xaa0] ss:$8 sps:$4 sm:$0xff]  }
 0x2b0   :  { %6641 = vmatprep.subr.bf16.mxu1 %v9792_v20 }
 0x2b2   :  { %6021 = vmatpush1.bf16.msra.mxu0 %v9787_v4  ;;  %6240 = vmatmul.mubr.bf16.vlgmr.msra.gmra.mrb[48].mxu1 %v6043_v32  ;;  %v9832_v4 = vld [vmem:[#allocation3 + $0xbf0] ss:$8 sps:$4 sm:$0xff]   ;;  %v9840_v32 = vld [vmem:[#allocation3 + $0xc04] ss:$8 sps:$4 sm:$0xff]  }
 0x2b3   :  { %6642 = vmatpush1.bf16.msra.mxu1 %v9790_v29  ;;  %6673 = vmatprep.mubr.bf16.mxu1 %v6478_v34  ;;  %v9837_v29 = vld [vmem:[#allocation3 + $0xab4] ss:$8 sps:$4 sm:$0xff]   ;;  %v9843_v34 = vld [vmem:[#allocation3 + $0xac4] ss:$8 sps:$4 sm:$0xff]  }
 0x2b4   :  { %6424 = vmatprep.subr.bf16.mxu0 %v9795_v55  ;;  %6643 = vmatprep.subr.bf16.mxu1 %v9798_v47  ;;  %v9835_v55 = vld [vmem:[#allocation3 + $0xab0] ss:$8 sps:$4 sm:$0xff]   ;;  %v9838_v47 = vld [vmem:[#allocation3 + $0xc00] ss:$8 sps:$4 sm:$0xff]  }
 0x2b5   :  { %6023 = vmatmul.mubr.bf16.vlgmr.msra.gmra.mrb[40].mxu0 %v5826_v51  ;;  %v9841_v51 = vld [vmem:[#allocation3 + $0xac0] ss:$8 sps:$4 sm:$0xff]  }
 0x2b6   :  { %6425 = vmatpush1.bf16.msra.mxu0 %v9793_v36  ;;  %6456 = vmatprep.mubr.bf16.mxu0 %v6261_v46  ;;  %v9846_v36 = vld [vmem:[#allocation3 + $0xc14] ss:$8 sps:$4 sm:$0xff]   ;;  %v9852_v46 = vld [vmem:[#allocation3 + $0xc24] ss:$8 sps:$4 sm:$0xff]  }
 0x2b7   :  { %6644 = vmatpush1.bf16.msra.mxu1 %v9796_v14  ;;  %6426 = vmatprep.subr.bf16.mxu0 %v9801_v9  ;;  %v9844_v14 = vld [vmem:[#allocation3 + $0xc10] ss:$8 sps:$4 sm:$0xff]   ;;  %v9849_v9 = vld [vmem:[#allocation3 + $0xad4] ss:$8 sps:$4 sm:$0xff]  }
 0x2b8   :  { %6645 = vmatprep.subr.bf16.mxu1 %v9804_v23  ;;  %v9847_v23 = vld [vmem:[#allocation3 + $0xad0] ss:$8 sps:$4 sm:$0xff]  }
 0x2ba   :  { %6427 = vmatpush1.bf16.msra.mxu0 %v9799_v2  ;;  %v9850_v2 = vld [vmem:[#allocation3 + $0xc20] ss:$8 sps:$4 sm:$0xff]  }
 0x2bb   :  { %6646 = vmatpush1.bf16.msra.mxu1 %v9802_v44  ;;  %6428 = vmatprep.subr.bf16.mxu0 %v9807_v37  ;;  %v9855_v44 = vld [vmem:[#allocation3 + $0xae4] ss:$8 sps:$4 sm:$0xff]   ;;  %v9858_v37 = vld [vmem:[#allocation3 + $0xc34] ss:$8 sps:$4 sm:$0xff]  }
 0x2bc   :  { %6647 = vmatprep.subr.bf16.mxu1 %v9810_v57  ;;  %v9853_v57 = vld [vmem:[#allocation3 + $0xae0] ss:$8 sps:$4 sm:$0xff]  }
 0x2be   :  { %6429 = vmatpush1.bf16.msra.mxu0 %v9805_v49  ;;  %v9856_v49 = vld [vmem:[#allocation3 + $0xc30] ss:$8 sps:$4 sm:$0xff]  }
 0x2bf   :  { %6648 = vmatpush1.bf16.msra.mxu1 %v9808_v6  ;;  %6430 = vmatprep.subr.bf16.mxu0 %v9813_v56  ;;  %v9861_v6 = vld [vmem:[#allocation3 + $0xaf4] ss:$8 sps:$4 sm:$0xff]   ;;  %v9864_v56 = vld [vmem:[#allocation3 + $0xc44] ss:$8 sps:$4 sm:$0xff]  }
 0x2c0   :  { %6649 = vmatprep.subr.bf16.mxu1 %v9816_v60  ;;  %v9859_v60 = vld [vmem:[#allocation3 + $0xaf0] ss:$8 sps:$4 sm:$0xff]  }
 0x2c2   :  { %6431 = vmatpush1.bf16.msra.mxu0 %v9811_v53  ;;  %v9862_v53 = vld [vmem:[#allocation3 + $0xc40] ss:$8 sps:$4 sm:$0xff]  }
 0x2c3   :  { %6650 = vmatpush1.bf16.msra.mxu1 %v9814_v17  ;;  %6432 = vmatprep.subr.bf16.mxu0 %v9819_v8  ;;  %v9867_v17 = vld [vmem:[#allocation3 + $0xb04] ss:$8 sps:$4 sm:$0xff]   ;;  %v9870_v8 = vld [vmem:[#allocation3 + $0xc54] ss:$8 sps:$4 sm:$0xff]  }
 0x2c4   :  { %6651 = vmatprep.subr.bf16.mxu1 %v9822_v28  ;;  %v9865_v28 = vld [vmem:[#allocation3 + $0xb00] ss:$8 sps:$4 sm:$0xff]  }
 0x2c5   :  { %v4939_v15 = vpop.f32.mrb[36].mxu1 }
 0x2c6   :  { %v4941_v10 = vpop.f32.mrb[37].mxu1  ;;  %6433 = vmatpush1.bf16.msra.mxu0 %v9817_v43  ;;  %v8049_v52 = vsel %vm7985_vm2, %v4939_v15, 0.0  ;;  %v9868_v43 = vld [vmem:[#allocation3 + $0xc50] ss:$8 sps:$4 sm:$0xff]   ;;  %v9874_v15 = vld [vmem:[#allocation3 + $0xc60] ss:$8 sps:$4 sm:$0xff]  }
 0x2c7   :  { %v4943_v39 = vpop.f32.mrb[38].mxu1  ;;  %6652 = vmatpush1.bf16.msra.mxu1 %v9820_v59  ;;  %6434 = vmatprep.subr.bf16.mxu0 %v9825_v16  ;;  %v8080_v18 = vsel %vm7985_vm2, %v4941_v10, 0.0  ;;  %v9873_v59 = vld [vmem:[#allocation3 + $0xb14] ss:$8 sps:$4 sm:$0xff]   ;;  %v9876_v16 = vld [vmem:[#allocation3 + $0xc64] ss:$8 sps:$4 sm:$0xff]  }
 0x2c8   :  { %v4722_v31 = vpop.f32.mrb[28].mxu0  ;;  %v4944_v41 = vpop.f32.mrb[39].mxu1  ;;  %6653 = vmatprep.subr.bf16.mxu1 %v9828_v50  ;;  %v9871_v50 = vld [vmem:[#allocation3 + $0xb10] ss:$8 sps:$4 sm:$0xff]   ;;  %v9879_v10 = vld [vmem:[#allocation3 + $0xb24] ss:$8 sps:$4 sm:$0xff]  }
 0x2c9   :  { %v8048_v35 = vsel %vm7985_vm2, %v4722_v31, 0.0  ;;  %v4724_v42 = vpop.f32.mrb[29].mxu0  ;;  %v9877_v39 = vld [vmem:[#allocation3 + $0xb20] ss:$8 sps:$4 sm:$0xff]   ;;  %v9888_v31 = vld [vmem:[#allocation3 + $0xe04] ss:$8 sps:$4 sm:$0xff]  }
 0x2ca   :  { %v11944_v0 = vadd.f32 %v8049_v52, %v8048_v35  ;;  %v8079_v27 = vsel %vm7985_vm2, %v4724_v42, 0.0  ;;  %v4726_v30 = vpop.f32.mrb[30].mxu0  ;;  %6435 = vmatpush1.bf16.msra.mxu0 %v9823_v1  ;;  %v9882_v1 = vld [vmem:[#allocation3 + $0xc74] ss:$8 sps:$4 sm:$0xff]   ;;  %v9883_v41 = vld [vmem:[#allocation3 + $0xb30] ss:$8 sps:$4 sm:$0xff]   ;;  %v6477_v52 = vpack.c.b16 %v11769_v26, %v11769_v26  ;;  %v6695_v26 = vpack.c.b16 %v11806_v61, %v11806_v61 }
 0x2cb   :  { %v11947_v19 = vadd.f32 %v8080_v18, %v8079_v27  ;;  %v4727_v20 = vpop.f32.mrb[31].mxu0  ;;  %6654 = vmatpush1.bf16.msra.mxu1 %v9826_v45  ;;  %6436 = vmatprep.subr.bf16.mxu0 %v9831_v54  ;;  %v9880_v45 = vld [vmem:[#allocation3 + $0xc70] ss:$8 sps:$4 sm:$0xff]   ;;  %v9885_v54 = vld [vmem:[#allocation3 + $0xb34] ss:$8 sps:$4 sm:$0xff]   ;;  %v6912_v18 = vpack.c.b16 %v11798_v38, %v11798_v38  ;;  %v6260_v30 = vpack.c.b16 %v11801_v33, %v11801_v33 }
 0x2cc   :  { %6655 = vmatprep.subr.bf16.mxu1 %v9834_v12  ;;  %v9886_v12 = vld [vmem:[#allocation3 + $0xe00] ss:$8 sps:$4 sm:$0xff]   ;;  %v9891_v35 = vld [vmem:[#allocation3 + $0xcc4] ss:$8 sps:$4 sm:$0xff]   ;;  %v9894_v42 = vld [vmem:[#allocation3 + $0xe14] ss:$8 sps:$4 sm:$0xff]  }
 0x2cd   :  { %v9889_v27 = vld [vmem:[#allocation3 + $0xcc0] ss:$8 sps:$4 sm:$0xff]   ;;  %v9897_v20 = vld [vmem:[#allocation3 + $0xcd4] ss:$8 sps:$4 sm:$0xff]   ;;  %v9895_v38 = vld [vmem:[#allocation3 + $0xcd0] ss:$8 sps:$4 sm:$0xff]  }
 0x2ce   :  { %6437 = vmatpush1.bf16.msra.mxu0 %v9829_v5  ;;  %v9892_v5 = vld [vmem:[#allocation3 + $0xe10] ss:$8 sps:$4 sm:$0xff]   ;;  %v9901_v33 = vld [vmem:[#allocation3 + $0xce0] ss:$8 sps:$4 sm:$0xff]   ;;  %v9912_v61 = vld [vmem:[#allocation3 + $0xe44] ss:$8 sps:$4 sm:$0xff]  }
 0x2cf   :  { %6656 = vmatpush1.bf16.msra.mxu1 %v9832_v4  ;;  %6438 = vmatprep.subr.bf16.mxu0 %v9837_v29  ;;  %v9900_v4 = vld [vmem:[#allocation3 + $0xe24] ss:$8 sps:$4 sm:$0xff]   ;;  %v9898_v29 = vld [vmem:[#allocation3 + $0xe20] ss:$8 sps:$4 sm:$0xff]  }
 0x2d0   :  { %6657 = vmatprep.subr.bf16.mxu1 %v9840_v32  ;;  %v9903_v32 = vld [vmem:[#allocation3 + $0xce4] ss:$8 sps:$4 sm:$0xff]  }
 0x2d2   :  { %6439 = vmatpush1.bf16.msra.mxu0 %v9835_v55  ;;  %v9906_v55 = vld [vmem:[#allocation3 + $0xe34] ss:$8 sps:$4 sm:$0xff]  }
 0x2d3   :  { %6658 = vmatpush1.bf16.msra.mxu1 %v9838_v47  ;;  %6440 = vmatprep.subr.bf16.mxu0 %v9843_v34  ;;  %v9904_v47 = vld [vmem:[#allocation3 + $0xe30] ss:$8 sps:$4 sm:$0xff]   ;;  %v9909_v34 = vld [vmem:[#allocation3 + $0xcf4] ss:$8 sps:$4 sm:$0xff]  }
 0x2d4   :  { %6659 = vmatprep.subr.bf16.mxu1 %v9846_v36  ;;  %v9907_v36 = vld [vmem:[#allocation3 + $0xcf0] ss:$8 sps:$4 sm:$0xff]  }
 0x2d6   :  { %6441 = vmatpush1.bf16.msra.mxu0 %v9841_v51  ;;  %v9910_v51 = vld [vmem:[#allocation3 + $0xe40] ss:$8 sps:$4 sm:$0xff]  }
 0x2d7   :  { %6660 = vmatpush1.bf16.msra.mxu1 %v9844_v14  ;;  %6442 = vmatprep.subr.bf16.mxu0 %v9849_v9  ;;  %v9915_v14 = vld [vmem:[#allocation3 + $0xd04] ss:$8 sps:$4 sm:$0xff]   ;;  %v9918_v9 = vld [vmem:[#allocation3 + $0xe54] ss:$8 sps:$4 sm:$0xff]  }
 0x2d8   :  { %6661 = vmatprep.subr.bf16.mxu1 %v9852_v46  ;;  %v9913_v46 = vld [vmem:[#allocation3 + $0xd00] ss:$8 sps:$4 sm:$0xff]  }
 0x2da   :  { %6443 = vmatpush1.bf16.msra.mxu0 %v9847_v23  ;;  %v9916_v23 = vld [vmem:[#allocation3 + $0xe50] ss:$8 sps:$4 sm:$0xff]  }
 0x2db   :  { %6662 = vmatpush1.bf16.msra.mxu1 %v9850_v2  ;;  %6444 = vmatprep.subr.bf16.mxu0 %v9855_v44  ;;  %v9921_v2 = vld [vmem:[#allocation3 + $0xd14] ss:$8 sps:$4 sm:$0xff]   ;;  %v9924_v44 = vld [vmem:[#allocation3 + $0xe64] ss:$8 sps:$4 sm:$0xff]  }
 0x2dc   :  { %6663 = vmatprep.subr.bf16.mxu1 %v9858_v37 }
 0x2de   :  { %6445 = vmatpush1.bf16.msra.mxu0 %v9853_v57 }
 0x2df   :  { %6664 = vmatpush1.bf16.msra.mxu1 %v9856_v49  ;;  %6446 = vmatprep.subr.bf16.mxu0 %v9861_v6  ;;  %v9919_v49 = vld [vmem:[#allocation3 + $0xd10] ss:$8 sps:$4 sm:$0xff]  }
 0x2e0   :  { %6665 = vmatprep.subr.bf16.mxu1 %v9864_v56  ;;  %v9922_v56 = vld [vmem:[#allocation3 + $0xe60] ss:$8 sps:$4 sm:$0xff]  }
 0x2e2   :  { %6447 = vmatpush1.bf16.msra.mxu0 %v9859_v60  ;;  %v9927_v60 = vld [vmem:[#allocation3 + $0xd24] ss:$8 sps:$4 sm:$0xff]  }
 0x2e3   :  { %6666 = vmatpush1.bf16.msra.mxu1 %v9862_v53  ;;  %6448 = vmatprep.subr.bf16.mxu0 %v9867_v17 }
 0x2e4   :  { %6667 = vmatprep.subr.bf16.mxu1 %v9870_v8  ;;  %v9930_v8 = vld [vmem:[#allocation3 + $0xe74] ss:$8 sps:$4 sm:$0xff]  }
 0x2e6   :  { %6449 = vmatpush1.bf16.msra.mxu0 %v9865_v28 }
 0x2e7   :  { %6668 = vmatpush1.bf16.msra.mxu1 %v9868_v43  ;;  %6450 = vmatprep.subr.bf16.mxu0 %v9873_v59 }
 0x2e8   :  { %6669 = vmatprep.subr.bf16.mxu1 %v9876_v16 }
 0x2ea   :  { %6451 = vmatpush1.bf16.msra.mxu0 %v9871_v50 }
 0x2eb   :  { %6670 = vmatpush1.bf16.msra.mxu1 %v9874_v15  ;;  %6452 = vmatprep.subr.bf16.mxu0 %v9879_v10  ;;  %v9925_v15 = vld [vmem:[#allocation3 + $0xd20] ss:$8 sps:$4 sm:$0xff]  }
 0x2ec   :  { %6671 = vmatprep.subr.bf16.mxu1 %v9882_v1 }
 0x2ee   :  { %6453 = vmatpush1.bf16.msra.mxu0 %v9877_v39 }
 0x2ef   :  { %6672 = vmatpush1.bf16.msra.mxu1 %v9880_v45  ;;  %6454 = vmatprep.subr.bf16.mxu0 %v9885_v54  ;;  %v9928_v45 = vld [vmem:[#allocation3 + $0xe70] ss:$8 sps:$4 sm:$0xff]   ;;  %v9933_v54 = vld [vmem:[#allocation3 + $0xd34] ss:$8 sps:$4 sm:$0xff]  }
 0x2f0   :  { %7075 = vmatprep.subr.bf16.mxu1 %v9888_v31 }
 0x2f2   :  { %6455 = vmatpush1.bf16.msra.mxu0 %v9883_v41  ;;  %6674 = vmatmul.mubr.bf16.vlgmr.msra.gmra.mrb[52].mxu1 %v6477_v52  ;;  %v9936_v41 = vld [vmem:[#allocation3 + $0xe84] ss:$8 sps:$4 sm:$0xff]   ;;  %v9931_v52 = vld [vmem:[#allocation3 + $0xd30] ss:$8 sps:$4 sm:$0xff]  }
 0x2f3   :  { %7076 = vmatpush1.bf16.msra.mxu1 %v9886_v12  ;;  %7107 = vmatprep.mubr.bf16.mxu1 %v6912_v18  ;;  %v9937_v18 = vld [vmem:[#allocation3 + $0xd40] ss:$8 sps:$4 sm:$0xff]  }
 0x2f4   :  { %6858 = vmatprep.subr.bf16.mxu0 %v9891_v35  ;;  %7077 = vmatprep.subr.bf16.mxu1 %v9894_v42  ;;  %v9934_v35 = vld [vmem:[#allocation3 + $0xe80] ss:$8 sps:$4 sm:$0xff]   ;;  %v9939_v42 = vld [vmem:[#allocation3 + $0xd44] ss:$8 sps:$4 sm:$0xff]  }
 0x2f5   :  { %6457 = vmatmul.mubr.bf16.vlgmr.msra.gmra.mrb[44].mxu0 %v6260_v30  ;;  %v9945_v30 = vld [vmem:[#allocation3 + $0xd54] ss:$8 sps:$4 sm:$0xff]  }
 0x2f6   :  { %6859 = vmatpush1.bf16.msra.mxu0 %v9889_v27  ;;  %6890 = vmatprep.mubr.bf16.mxu0 %v6695_v26  ;;  %v9940_v27 = vld [vmem:[#allocation3 + $0xe90] ss:$8 sps:$4 sm:$0xff]   ;;  %v9946_v26 = vld [vmem:[#allocation3 + $0xea0] ss:$8 sps:$4 sm:$0xff]  }
 0x2f7   :  { %7078 = vmatpush1.bf16.msra.mxu1 %v9892_v5  ;;  %6860 = vmatprep.subr.bf16.mxu0 %v9897_v20  ;;  %v9948_v5 = vld [vmem:[#allocation3 + $0xea4] ss:$8 sps:$4 sm:$0xff]   ;;  %v9943_v20 = vld [vmem:[#allocation3 + $0xd50] ss:$8 sps:$4 sm:$0xff]  }
 0x2f8   :  { %7079 = vmatprep.subr.bf16.mxu1 %v9900_v4  ;;  %v9951_v4 = vld [vmem:[#allocation3 + $0xd64] ss:$8 sps:$4 sm:$0xff]  }
 0x2fa   :  { %6861 = vmatpush1.bf16.msra.mxu0 %v9895_v38  ;;  %v9954_v38 = vld [vmem:[#allocation3 + $0xeb4] ss:$8 sps:$4 sm:$0xff]  }
 0x2fb   :  { %7080 = vmatpush1.bf16.msra.mxu1 %v9898_v29  ;;  %6862 = vmatprep.subr.bf16.mxu0 %v9903_v32  ;;  %v9949_v29 = vld [vmem:[#allocation3 + $0xd60] ss:$8 sps:$4 sm:$0xff]   ;;  %v9952_v32 = vld [vmem:[#allocation3 + $0xeb0] ss:$8 sps:$4 sm:$0xff]  }
 0x2fc   :  { %7081 = vmatprep.subr.bf16.mxu1 %v9906_v55  ;;  %v9957_v55 = vld [vmem:[#allocation3 + $0xd74] ss:$8 sps:$4 sm:$0xff]  }
 0x2fe   :  { %6863 = vmatpush1.bf16.msra.mxu0 %v9901_v33  ;;  %v9960_v33 = vld [vmem:[#allocation3 + $0xec4] ss:$8 sps:$4 sm:$0xff]  }
 0x2ff   :  { %7082 = vmatpush1.bf16.msra.mxu1 %v9904_v47  ;;  %6864 = vmatprep.subr.bf16.mxu0 %v9909_v34  ;;  %v9955_v47 = vld [vmem:[#allocation3 + $0xd70] ss:$8 sps:$4 sm:$0xff]   ;;  %v9958_v34 = vld [vmem:[#allocation3 + $0xec0] ss:$8 sps:$4 sm:$0xff]  }
 0x300   :  { %7083 = vmatprep.subr.bf16.mxu1 %v9912_v61  ;;  %v9963_v61 = vld [vmem:[#allocation3 + $0xd84] ss:$8 sps:$4 sm:$0xff]  }
 0x302   :  { %6865 = vmatpush1.bf16.msra.mxu0 %v9907_v36  ;;  %v9966_v36 = vld [vmem:[#allocation3 + $0xed4] ss:$8 sps:$4 sm:$0xff]  }
 0x303   :  { %7084 = vmatpush1.bf16.msra.mxu1 %v9910_v51  ;;  %6866 = vmatprep.subr.bf16.mxu0 %v9915_v14  ;;  %v9961_v51 = vld [vmem:[#allocation3 + $0xd80] ss:$8 sps:$4 sm:$0xff]   ;;  %v9964_v14 = vld [vmem:[#allocation3 + $0xed0] ss:$8 sps:$4 sm:$0xff]  }
 0x304   :  { %7085 = vmatprep.subr.bf16.mxu1 %v9918_v9  ;;  %v9969_v9 = vld [vmem:[#allocation3 + $0xd94] ss:$8 sps:$4 sm:$0xff]  }
 0x305   :  { %v5373_v37 = vpop.f32.mrb[40].mxu1 }
 0x306   :  { %v5375_v57 = vpop.f32.mrb[41].mxu1  ;;  %6867 = vmatpush1.bf16.msra.mxu0 %v9913_v46  ;;  %v8053_v10 = vsel %vm7985_vm2, %v5373_v37, 0.0  ;;  %v9972_v46 = vld [vmem:[#allocation3 + $0xee4] ss:$8 sps:$4 sm:$0xff]   ;;  %v9978_v37 = vld [vmem:[#allocation3 + $0xef4] ss:$8 sps:$4 sm:$0xff]  }
 0x307   :  { %v5377_v6 = vpop.f32.mrb[42].mxu1  ;;  %7086 = vmatpush1.bf16.msra.mxu1 %v9916_v23  ;;  %6868 = vmatprep.subr.bf16.mxu0 %v9921_v2  ;;  %v8084_v31 = vsel %vm7985_vm2, %v5375_v57, 0.0  ;;  %v9967_v23 = vld [vmem:[#allocation3 + $0xd90] ss:$8 sps:$4 sm:$0xff]   ;;  %v9970_v2 = vld [vmem:[#allocation3 + $0xee0] ss:$8 sps:$4 sm:$0xff]  }
 0x308   :  { %v5156_v53 = vpop.f32.mrb[32].mxu0  ;;  %v5378_v17 = vpop.f32.mrb[43].mxu1  ;;  %7087 = vmatprep.subr.bf16.mxu1 %v9924_v44  ;;  %v9975_v44 = vld [vmem:[#allocation3 + $0xda4] ss:$8 sps:$4 sm:$0xff]   ;;  %v9973_v57 = vld [vmem:[#allocation3 + $0xda0] ss:$8 sps:$4 sm:$0xff]  }
 0x309   :  { %v8051_v28 = vsel %vm7985_vm2, %v5156_v53, 0.0  ;;  %v5158_v43 = vpop.f32.mrb[33].mxu0  ;;  %v9981_v6 = vld [vmem:[#allocation3 + $0xdb4] ss:$8 sps:$4 sm:$0xff]   ;;  %v9982_v53 = vld [vmem:[#allocation3 + $0x1080] ss:$8 sps:$4 sm:$0xff]   ;;  %v6911_v17 = vpack.c.b16 %v11791_v40, %v11791_v40  ;;  %v7129_v40 = vpack.c.b16 %v11816_v62, %v11816_v62 }
 0x30a   :  { %v8052_v59 = vadd.f32 %v8051_v28, %v11944_v0  ;;  %v8082_v16 = vsel %vm7985_vm2, %v5158_v43, 0.0  ;;  %v5160_v50 = vpop.f32.mrb[34].mxu0  ;;  %6869 = vmatpush1.bf16.msra.mxu0 %v9919_v49  ;;  %v9976_v49 = vld [vmem:[#allocation3 + $0xef0] ss:$8 sps:$4 sm:$0xff]   ;;  %v9990_v28 = vld [vmem:[#allocation3 + $0x1094] ss:$8 sps:$4 sm:$0xff]   ;;  %v7346_v43 = vpack.c.b16 %v11842_v48, %v11842_v48 }
 0x30b   :  { %v8083_v1 = vadd.f32 %v8082_v16, %v11947_v19  ;;  %v5161_v39 = vpop.f32.mrb[35].mxu0  ;;  %7088 = vmatpush1.bf16.msra.mxu1 %v9922_v56  ;;  %6870 = vmatprep.subr.bf16.mxu0 %v9927_v60  ;;  %v9942_v19 = vld [vmem:[#allocation3 + $0xe94] ss:$8 sps:$4 sm:$0xff]   ;;  %v9984_v56 = vld [vmem:[#allocation3 + $0x1084] ss:$8 sps:$4 sm:$0xff]   ;;  %v6694_v16 = vpack.c.b16 %v11794_v7, %v11794_v7 }
 0x30c   :  { %7089 = vmatprep.subr.bf16.mxu1 %v9930_v8  ;;  %v11963_v12 = vadd.f32 %v8053_v10, %v8052_v59  ;;  %v9979_v60 = vld [vmem:[#allocation3 + $0xdb0] ss:$8 sps:$4 sm:$0xff]   ;;  %v9987_v8 = vld [vmem:[#allocation3 + $0xf44] ss:$8 sps:$4 sm:$0xff]   ;;  %v9985_v59 = vld [vmem:[#allocation3 + $0xf40] ss:$8 sps:$4 sm:$0xff]  }
 0x30d   :  { %v11965_v0 = vadd.f32 %v8084_v31, %v8083_v1  ;;  %v9988_v50 = vld [vmem:[#allocation3 + $0x1090] ss:$8 sps:$4 sm:$0xff]   ;;  %v9996_v10 = vld [vmem:[#allocation3 + $0x10a4] ss:$8 sps:$4 sm:$0xff]   ;;  %v9994_v1 = vld [vmem:[#allocation3 + $0x10a0] ss:$8 sps:$4 sm:$0xff]  }
 0x30e   :  { %6871 = vmatpush1.bf16.msra.mxu0 %v9925_v15  ;;  %v9993_v15 = vld [vmem:[#allocation3 + $0xf54] ss:$8 sps:$4 sm:$0xff]   ;;  %v9991_v48 = vld [vmem:[#allocation3 + $0xf50] ss:$8 sps:$4 sm:$0xff]   ;;  %v9999_v39 = vld [vmem:[#allocation3 + $0xf64] ss:$8 sps:$4 sm:$0xff]  }
 0x30f   :  { %7090 = vmatpush1.bf16.msra.mxu1 %v9928_v45  ;;  %6872 = vmatprep.subr.bf16.mxu0 %v9933_v54  ;;  %v10002_v45 = vld [vmem:[#allocation3 + $0x10b4] ss:$8 sps:$4 sm:$0xff]   ;;  %v9997_v7 = vld [vmem:[#allocation3 + $0xf60] ss:$8 sps:$4 sm:$0xff]   ;;  %v10000_v54 = vld [vmem:[#allocation3 + $0x10b0] ss:$8 sps:$4 sm:$0xff]  }
 0x310   :  { %7091 = vmatprep.subr.bf16.mxu1 %v9936_v41  ;;  %v10005_v31 = vld [vmem:[#allocation3 + $0xf74] ss:$8 sps:$4 sm:$0xff]   ;;  %v10008_v62 = vld [vmem:[#allocation3 + $0x10c4] ss:$8 sps:$4 sm:$0xff]   ;;  %v10003_v41 = vld [vmem:[#allocation3 + $0xf70] ss:$8 sps:$4 sm:$0xff]  }
 0x312   :  { %6873 = vmatpush1.bf16.msra.mxu0 %v9931_v52  ;;  %v10006_v52 = vld [vmem:[#allocation3 + $0x10c0] ss:$8 sps:$4 sm:$0xff]  }
 0x313   :  { %7092 = vmatpush1.bf16.msra.mxu1 %v9934_v35  ;;  %6874 = vmatprep.subr.bf16.mxu0 %v9939_v42  ;;  %v10011_v35 = vld [vmem:[#allocation3 + $0xf84] ss:$8 sps:$4 sm:$0xff]   ;;  %v10014_v42 = vld [vmem:[#allocation3 + $0x10d4] ss:$8 sps:$4 sm:$0xff]  }
 0x314   :  { %7093 = vmatprep.subr.bf16.mxu1 %v9942_v19  ;;  %v10009_v19 = vld [vmem:[#allocation3 + $0xf80] ss:$8 sps:$4 sm:$0xff]  }
 0x316   :  { %6875 = vmatpush1.bf16.msra.mxu0 %v9937_v18  ;;  %v10012_v18 = vld [vmem:[#allocation3 + $0x10d0] ss:$8 sps:$4 sm:$0xff]  }
 0x317   :  { %7094 = vmatpush1.bf16.msra.mxu1 %v9940_v27  ;;  %6876 = vmatprep.subr.bf16.mxu0 %v9945_v30  ;;  %v10017_v27 = vld [vmem:[#allocation3 + $0xf94] ss:$8 sps:$4 sm:$0xff]   ;;  %v10020_v30 = vld [vmem:[#allocation3 + $0x10e4] ss:$8 sps:$4 sm:$0xff]  }
 0x318   :  { %7095 = vmatprep.subr.bf16.mxu1 %v9948_v5 }
 0x31a   :  { %6877 = vmatpush1.bf16.msra.mxu0 %v9943_v20 }
 0x31b   :  { %7096 = vmatpush1.bf16.msra.mxu1 %v9946_v26  ;;  %6878 = vmatprep.subr.bf16.mxu0 %v9951_v4  ;;  %v10015_v26 = vld [vmem:[#allocation3 + $0xf90] ss:$8 sps:$4 sm:$0xff]  }
 0x31c   :  { %7097 = vmatprep.subr.bf16.mxu1 %v9954_v38  ;;  %v10018_v38 = vld [vmem:[#allocation3 + $0x10e0] ss:$8 sps:$4 sm:$0xff]  }
 0x31e   :  { %6879 = vmatpush1.bf16.msra.mxu0 %v9949_v29  ;;  %v10023_v29 = vld [vmem:[#allocation3 + $0xfa4] ss:$8 sps:$4 sm:$0xff]  }
 0x31f   :  { %7098 = vmatpush1.bf16.msra.mxu1 %v9952_v32  ;;  %6880 = vmatprep.subr.bf16.mxu0 %v9957_v55 }
 0x320   :  { %7099 = vmatprep.subr.bf16.mxu1 %v9960_v33  ;;  %v10026_v33 = vld [vmem:[#allocation3 + $0x10f4] ss:$8 sps:$4 sm:$0xff]  }
 0x322   :  { %6881 = vmatpush1.bf16.msra.mxu0 %v9955_v47 }
 0x323   :  { %7100 = vmatpush1.bf16.msra.mxu1 %v9958_v34  ;;  %6882 = vmatprep.subr.bf16.mxu0 %v9963_v61 }
 0x324   :  { %7101 = vmatprep.subr.bf16.mxu1 %v9966_v36 }
 0x326   :  { %6883 = vmatpush1.bf16.msra.mxu0 %v9961_v51 }
 0x327   :  { %7102 = vmatpush1.bf16.msra.mxu1 %v9964_v14  ;;  %6884 = vmatprep.subr.bf16.mxu0 %v9969_v9  ;;  %v10021_v14 = vld [vmem:[#allocation3 + $0xfa0] ss:$8 sps:$4 sm:$0xff]  }
 0x328   :  { %7103 = vmatprep.subr.bf16.mxu1 %v9972_v46 }
 0x32a   :  { %6885 = vmatpush1.bf16.msra.mxu0 %v9967_v23 }
 0x32b   :  { %7104 = vmatpush1.bf16.msra.mxu1 %v9970_v2  ;;  %6886 = vmatprep.subr.bf16.mxu0 %v9975_v44  ;;  %v10024_v2 = vld [vmem:[#allocation3 + $0x10f0] ss:$8 sps:$4 sm:$0xff]   ;;  %v10029_v44 = vld [vmem:[#allocation3 + $0xfb4] ss:$8 sps:$4 sm:$0xff]  }
 0x32c   :  { %7105 = vmatprep.subr.bf16.mxu1 %v9978_v37 }
 0x32e   :  { %6887 = vmatpush1.bf16.msra.mxu0 %v9973_v57  ;;  %v10032_v57 = vld [vmem:[#allocation3 + $0x1104] ss:$8 sps:$4 sm:$0xff]  }
 0x32f   :  { %7106 = vmatpush1.bf16.msra.mxu1 %v9976_v49  ;;  %6888 = vmatprep.subr.bf16.mxu0 %v9981_v6  ;;  %v10027_v6 = vld [vmem:[#allocation3 + $0xfb0] ss:$8 sps:$4 sm:$0xff]  }
 0x330   :  { %7509 = vmatprep.subr.bf16.mxu1 %v9984_v56  ;;  %v10030_v56 = vld [vmem:[#allocation3 + $0x1100] ss:$8 sps:$4 sm:$0xff]  }
 0x332   :  { %6889 = vmatpush1.bf16.msra.mxu0 %v9979_v60  ;;  %7108 = vmatmul.mubr.bf16.vlgmr.msra.gmra.mrb[56].mxu1 %v6911_v17  ;;  %v10035_v60 = vld [vmem:[#allocation3 + $0xfc4] ss:$8 sps:$4 sm:$0xff]   ;;  %v10036_v17 = vld [vmem:[#allocation3 + $0x1110] ss:$8 sps:$4 sm:$0xff]  }
 0x333   :  { %7510 = vmatpush1.bf16.msra.mxu1 %v9982_v53  ;;  %7541 = vmatprep.mubr.bf16.mxu1 %v7346_v43  ;;  %v10033_v53 = vld [vmem:[#allocation3 + $0xfc0] ss:$8 sps:$4 sm:$0xff]   ;;  %v10039_v43 = vld [vmem:[#allocation3 + $0xfd0] ss:$8 sps:$4 sm:$0xff]  }
 0x334   :  { %7292 = vmatprep.subr.bf16.mxu0 %v9987_v8  ;;  %7511 = vmatprep.subr.bf16.mxu1 %v9990_v28  ;;  %v10041_v8 = vld [vmem:[#allocation3 + $0xfd4] ss:$8 sps:$4 sm:$0xff]   ;;  %v10044_v28 = vld [vmem:[#allocation3 + $0x1124] ss:$8 sps:$4 sm:$0xff]  }
 0x335   :  { %6891 = vmatmul.mubr.bf16.vlgmr.msra.gmra.mrb[48].mxu0 %v6694_v16  ;;  %v10047_v16 = vld [vmem:[#allocation3 + $0xfe4] ss:$8 sps:$4 sm:$0xff]  }
 0x336   :  { %7293 = vmatpush1.bf16.msra.mxu0 %v9985_v59  ;;  %7324 = vmatprep.mubr.bf16.mxu0 %v7129_v40  ;;  %v10042_v59 = vld [vmem:[#allocation3 + $0x1120] ss:$8 sps:$4 sm:$0xff]   ;;  %v10048_v40 = vld [vmem:[#allocation3 + $0x1130] ss:$8 sps:$4 sm:$0xff]  }
 0x337   :  { %7512 = vmatpush1.bf16.msra.mxu1 %v9988_v50  ;;  %7294 = vmatprep.subr.bf16.mxu0 %v9993_v15  ;;  %v10050_v50 = vld [vmem:[#allocation3 + $0x1134] ss:$8 sps:$4 sm:$0xff]   ;;  %v10045_v15 = vld [vmem:[#allocation3 + $0xfe0] ss:$8 sps:$4 sm:$0xff]  }
 0x338   :  { %7513 = vmatprep.subr.bf16.mxu1 %v9996_v10  ;;  %v10053_v10 = vld [vmem:[#allocation3 + $0xff4] ss:$8 sps:$4 sm:$0xff]  }
 0x33a   :  { %7295 = vmatpush1.bf16.msra.mxu0 %v9991_v48  ;;  %v10056_v48 = vld [vmem:[#allocation3 + $0x1144] ss:$8 sps:$4 sm:$0xff]  }
 0x33b   :  { %7514 = vmatpush1.bf16.msra.mxu1 %v9994_v1  ;;  %7296 = vmatprep.subr.bf16.mxu0 %v9999_v39  ;;  %v10051_v1 = vld [vmem:[#allocation3 + $0xff0] ss:$8 sps:$4 sm:$0xff]   ;;  %v10054_v39 = vld [vmem:[#allocation3 + $0x1140] ss:$8 sps:$4 sm:$0xff]  }
 0x33c   :  { %7515 = vmatprep.subr.bf16.mxu1 %v10002_v45  ;;  %v10059_v45 = vld [vmem:[#allocation3 + $0x1004] ss:$8 sps:$4 sm:$0xff]  }
 0x33e   :  { %7297 = vmatpush1.bf16.msra.mxu0 %v9997_v7  ;;  %v10062_v7 = vld [vmem:[#allocation3 + $0x1154] ss:$8 sps:$4 sm:$0xff]  }
 0x33f   :  { %7516 = vmatpush1.bf16.msra.mxu1 %v10000_v54  ;;  %7298 = vmatprep.subr.bf16.mxu0 %v10005_v31  ;;  %v10057_v54 = vld [vmem:[#allocation3 + $0x1000] ss:$8 sps:$4 sm:$0xff]   ;;  %v10060_v31 = vld [vmem:[#allocation3 + $0x1150] ss:$8 sps:$4 sm:$0xff]  }
 0x340   :  { %7517 = vmatprep.subr.bf16.mxu1 %v10008_v62  ;;  %v10065_v62 = vld [vmem:[#allocation3 + $0x1014] ss:$8 sps:$4 sm:$0xff]  }
 0x342   :  { %7299 = vmatpush1.bf16.msra.mxu0 %v10003_v41  ;;  %v10068_v41 = vld [vmem:[#allocation3 + $0x1164] ss:$8 sps:$4 sm:$0xff]  }
 0x343   :  { %7518 = vmatpush1.bf16.msra.mxu1 %v10006_v52  ;;  %7300 = vmatprep.subr.bf16.mxu0 %v10011_v35  ;;  %v10063_v52 = vld [vmem:[#allocation3 + $0x1010] ss:$8 sps:$4 sm:$0xff]   ;;  %v10066_v35 = vld [vmem:[#allocation3 + $0x1160] ss:$8 sps:$4 sm:$0xff]  }
 0x344   :  { %7519 = vmatprep.subr.bf16.mxu1 %v10014_v42  ;;  %v10071_v42 = vld [vmem:[#allocation3 + $0x1024] ss:$8 sps:$4 sm:$0xff]  }
 0x345   :  { %v5807_v5 = vpop.f32.mrb[44].mxu1 }
 0x346   :  { %v5809_v20 = vpop.f32.mrb[45].mxu1  ;;  %7301 = vmatpush1.bf16.msra.mxu0 %v10009_v19  ;;  %v8057_v9 = vsel %vm7985_vm2, %v5807_v5, 0.0  ;;  %v10074_v19 = vld [vmem:[#allocation3 + $0x1174] ss:$8 sps:$4 sm:$0xff]   ;;  %v10080_v5 = vld [vmem:[#allocation3 + $0x1304] ss:$8 sps:$4 sm:$0xff]  }
 0x347   :  { %v5811_v4 = vpop.f32.mrb[46].mxu1  ;;  %7520 = vmatpush1.bf16.msra.mxu1 %v10012_v18  ;;  %7302 = vmatprep.subr.bf16.mxu0 %v10017_v27  ;;  %v8088_v37 = vsel %vm7985_vm2, %v5809_v20, 0.0  ;;  %v10069_v18 = vld [vmem:[#allocation3 + $0x1020] ss:$8 sps:$4 sm:$0xff]   ;;  %v10072_v27 = vld [vmem:[#allocation3 + $0x1170] ss:$8 sps:$4 sm:$0xff]  }
 0x348   :  { %v5590_v32 = vpop.f32.mrb[36].mxu0  ;;  %v5812_v55 = vpop.f32.mrb[47].mxu1  ;;  %7521 = vmatprep.subr.bf16.mxu1 %v10020_v30  ;;  %v10077_v30 = vld [vmem:[#allocation3 + $0x1034] ss:$8 sps:$4 sm:$0xff]   ;;  %v10075_v20 = vld [vmem:[#allocation3 + $0x1030] ss:$8 sps:$4 sm:$0xff]   ;;  %v7345_v4 = vpack.c.b16 %v11845_v22, %v11845_v22  ;;  %v7563_v22 = vpack.c.b16 %v11874_v58, %v11874_v58 }
 0x349   :  { %v8055_v47 = vsel %vm7985_vm2, %v5590_v32, 0.0  ;;  %v5592_v34 = vpop.f32.mrb[37].mxu0  ;;  %v7780_v32 = vpack.c.b16 %v11868_v25, %v11868_v25  ;;  %v10081_v55 = vld [vmem:[#allocation3 + $0x11c0] ss:$8 sps:$4 sm:$0xff]   ;;  %v10087_v25 = vld [vmem:[#allocation3 + $0x11d0] ss:$8 sps:$4 sm:$0xff]  }
 0x34a   :  { %v8056_v61 = vadd.f32 %v8055_v47, %v11963_v12  ;;  %v8086_v36 = vsel %vm7985_vm2, %v5592_v34, 0.0  ;;  %v5594_v51 = vpop.f32.mrb[38].mxu0  ;;  %7303 = vmatpush1.bf16.msra.mxu0 %v10015_v26  ;;  %v10078_v26 = vld [vmem:[#allocation3 + $0x1300] ss:$8 sps:$4 sm:$0xff]   ;;  %v10084_v47 = vld [vmem:[#allocation3 + $0x1310] ss:$8 sps:$4 sm:$0xff]  }
 0x34b   :  { %v8087_v46 = vadd.f32 %v8086_v36, %v11965_v0  ;;  %v5595_v23 = vpop.f32.mrb[39].mxu0  ;;  %7522 = vmatpush1.bf16.msra.mxu1 %v10018_v38  ;;  %7304 = vmatprep.subr.bf16.mxu0 %v10023_v29  ;;  %v10038_v0 = vld [vmem:[#allocation3 + $0x1114] ss:$8 sps:$4 sm:$0xff]   ;;  %v10083_v38 = vld [vmem:[#allocation3 + $0x11c4] ss:$8 sps:$4 sm:$0xff]  }
 0x34c   :  { %7523 = vmatprep.subr.bf16.mxu1 %v10026_v33  ;;  %v11981_v49 = vadd.f32 %v8057_v9, %v8056_v61  ;;  %v10086_v29 = vld [vmem:[#allocation3 + $0x1314] ss:$8 sps:$4 sm:$0xff]   ;;  %v7128_v33 = vpack.c.b16 %v11819_v13, %v11819_v13  ;;  %v10092_v61 = vld [vmem:[#allocation3 + $0x1324] ss:$8 sps:$4 sm:$0xff]   ;;  %v10090_v36 = vld [vmem:[#allocation3 + $0x1320] ss:$8 sps:$4 sm:$0xff]  }
 0x34d   :  { %v11983_v12 = vadd.f32 %v8088_v37, %v8087_v46  ;;  %v10089_v34 = vld [vmem:[#allocation3 + $0x11d4] ss:$8 sps:$4 sm:$0xff]   ;;  %v10095_v51 = vld [vmem:[#allocation3 + $0x11e4] ss:$8 sps:$4 sm:$0xff]   ;;  %v10093_v13 = vld [vmem:[#allocation3 + $0x11e0] ss:$8 sps:$4 sm:$0xff]  }
 0x34e   :  { %7305 = vmatpush1.bf16.msra.mxu0 %v10021_v14  ;;  %v10098_v14 = vld [vmem:[#allocation3 + $0x1334] ss:$8 sps:$4 sm:$0xff]   ;;  %v10096_v9 = vld [vmem:[#allocation3 + $0x1330] ss:$8 sps:$4 sm:$0xff]   ;;  %v10104_v58 = vld [vmem:[#allocation3 + $0x1344] ss:$8 sps:$4 sm:$0xff]  }
 0x34f   :  { %7524 = vmatpush1.bf16.msra.mxu1 %v10024_v2  ;;  %7306 = vmatprep.subr.bf16.mxu0 %v10029_v44  ;;  %v10101_v46 = vld [vmem:[#allocation3 + $0x11f4] ss:$8 sps:$4 sm:$0xff]   ;;  %v10099_v23 = vld [vmem:[#allocation3 + $0x11f0] ss:$8 sps:$4 sm:$0xff]   ;;  %v10102_v2 = vld [vmem:[#allocation3 + $0x1340] ss:$8 sps:$4 sm:$0xff]  }
 0x350   :  { %7525 = vmatprep.subr.bf16.mxu1 %v10032_v57  ;;  %v10107_v44 = vld [vmem:[#allocation3 + $0x1204] ss:$8 sps:$4 sm:$0xff]   ;;  %v10110_v37 = vld [vmem:[#allocation3 + $0x1354] ss:$8 sps:$4 sm:$0xff]   ;;  %v10105_v57 = vld [vmem:[#allocation3 + $0x1200] ss:$8 sps:$4 sm:$0xff]  }
 0x352   :  { %7307 = vmatpush1.bf16.msra.mxu0 %v10027_v6  ;;  %v10108_v6 = vld [vmem:[#allocation3 + $0x1350] ss:$8 sps:$4 sm:$0xff]  }
 0x353   :  { %7526 = vmatpush1.bf16.msra.mxu1 %v10030_v56  ;;  %7308 = vmatprep.subr.bf16.mxu0 %v10035_v60  ;;  %v10113_v56 = vld [vmem:[#allocation3 + $0x1214] ss:$8 sps:$4 sm:$0xff]   ;;  %v10116_v60 = vld [vmem:[#allocation3 + $0x1364] ss:$8 sps:$4 sm:$0xff]  }
 0x354   :  { %7527 = vmatprep.subr.bf16.mxu1 %v10038_v0 }
 0x356   :  { %7309 = vmatpush1.bf16.msra.mxu0 %v10033_v53 }
 0x357   :  { %7528 = vmatpush1.bf16.msra.mxu1 %v10036_v17  ;;  %7310 = vmatprep.subr.bf16.mxu0 %v10041_v8  ;;  %v10111_v17 = vld [vmem:[#allocation3 + $0x1210] ss:$8 sps:$4 sm:$0xff]  }
 0x358   :  { %7529 = vmatprep.subr.bf16.mxu1 %v10044_v28  ;;  %v10114_v28 = vld [vmem:[#allocation3 + $0x1360] ss:$8 sps:$4 sm:$0xff]  }
 0x35a   :  { %7311 = vmatpush1.bf16.msra.mxu0 %v10039_v43  ;;  %v10119_v43 = vld [vmem:[#allocation3 + $0x1224] ss:$8 sps:$4 sm:$0xff]  }
 0x35b   :  { %7530 = vmatpush1.bf16.msra.mxu1 %v10042_v59  ;;  %7312 = vmatprep.subr.bf16.mxu0 %v10047_v16 }
 0x35c   :  { %7531 = vmatprep.subr.bf16.mxu1 %v10050_v50  ;;  %v10122_v50 = vld [vmem:[#allocation3 + $0x1374] ss:$8 sps:$4 sm:$0xff]  }
 0x35e   :  { %7313 = vmatpush1.bf16.msra.mxu0 %v10045_v15 }
 0x35f   :  { %7532 = vmatpush1.bf16.msra.mxu1 %v10048_v40  ;;  %7314 = vmatprep.subr.bf16.mxu0 %v10053_v10 }
 0x360   :  { %7533 = vmatprep.subr.bf16.mxu1 %v10056_v48 }
 0x362   :  { %7315 = vmatpush1.bf16.msra.mxu0 %v10051_v1 }
 0x363   :  { %7534 = vmatpush1.bf16.msra.mxu1 %v10054_v39  ;;  %7316 = vmatprep.subr.bf16.mxu0 %v10059_v45  ;;  %v10117_v39 = vld [vmem:[#allocation3 + $0x1220] ss:$8 sps:$4 sm:$0xff]  }
 0x364   :  { %7535 = vmatprep.subr.bf16.mxu1 %v10062_v7 }
 0x366   :  { %7317 = vmatpush1.bf16.msra.mxu0 %v10057_v54 }
 0x367   :  { %7536 = vmatpush1.bf16.msra.mxu1 %v10060_v31  ;;  %7318 = vmatprep.subr.bf16.mxu0 %v10065_v62  ;;  %v10120_v31 = vld [vmem:[#allocation3 + $0x1370] ss:$8 sps:$4 sm:$0xff]   ;;  %v10125_v62 = vld [vmem:[#allocation3 + $0x1234] ss:$8 sps:$4 sm:$0xff]  }
 0x368   :  { %7537 = vmatprep.subr.bf16.mxu1 %v10068_v41 }
 0x36a   :  { %7319 = vmatpush1.bf16.msra.mxu0 %v10063_v52  ;;  %v10128_v52 = vld [vmem:[#allocation3 + $0x1384] ss:$8 sps:$4 sm:$0xff]  }
 0x36b   :  { %7538 = vmatpush1.bf16.msra.mxu1 %v10066_v35  ;;  %7320 = vmatprep.subr.bf16.mxu0 %v10071_v42  ;;  %v10123_v42 = vld [vmem:[#allocation3 + $0x1230] ss:$8 sps:$4 sm:$0xff]  }
 0x36c   :  { %7539 = vmatprep.subr.bf16.mxu1 %v10074_v19  ;;  %v10126_v19 = vld [vmem:[#allocation3 + $0x1380] ss:$8 sps:$4 sm:$0xff]  }
 0x36e   :  { %7321 = vmatpush1.bf16.msra.mxu0 %v10069_v18  ;;  %v10131_v18 = vld [vmem:[#allocation3 + $0x1244] ss:$8 sps:$4 sm:$0xff]  }
 0x36f   :  { %7540 = vmatpush1.bf16.msra.mxu1 %v10072_v27  ;;  %7322 = vmatprep.subr.bf16.mxu0 %v10077_v30  ;;  %v10129_v27 = vld [vmem:[#allocation3 + $0x1240] ss:$8 sps:$4 sm:$0xff]   ;;  %v10132_v30 = vld [vmem:[#allocation3 + $0x1390] ss:$8 sps:$4 sm:$0xff]  }
 0x370   :  { %7943 = vmatprep.subr.bf16.mxu1 %v10080_v5  ;;  %v10137_v5 = vld [vmem:[#allocation3 + $0x1254] ss:$8 sps:$4 sm:$0xff]  }
 0x372   :  { %7323 = vmatpush1.bf16.msra.mxu0 %v10075_v20  ;;  %7542 = vmatmul.mubr.bf16.vlgmr.msra.gmra.mrb[60].mxu1 %v7345_v4  ;;  %v10140_v20 = vld [vmem:[#allocation3 + $0x13a4] ss:$8 sps:$4 sm:$0xff]   ;;  %v10138_v4 = vld [vmem:[#allocation3 + $0x13a0] ss:$8 sps:$4 sm:$0xff]  }
 0x373   :  { %7944 = vmatpush1.bf16.msra.mxu1 %v10078_v26  ;;  %7975 = vmatprep.mubr.bf16.mxu1 %v7780_v32  ;;  %v10135_v26 = vld [vmem:[#allocation3 + $0x1250] ss:$8 sps:$4 sm:$0xff]   ;;  %v10141_v32 = vld [vmem:[#allocation3 + $0x1260] ss:$8 sps:$4 sm:$0xff]  }
 0x374   :  { %7726 = vmatprep.subr.bf16.mxu0 %v10083_v38  ;;  %7945 = vmatprep.subr.bf16.mxu1 %v10086_v29  ;;  %v10143_v38 = vld [vmem:[#allocation3 + $0x1264] ss:$8 sps:$4 sm:$0xff]   ;;  %v10146_v29 = vld [vmem:[#allocation3 + $0x13b4] ss:$8 sps:$4 sm:$0xff]  }
 0x375   :  { %7325 = vmatmul.mubr.bf16.vlgmr.msra.gmra.mrb[52].mxu0 %v7128_v33  ;;  %v10149_v33 = vld [vmem:[#allocation3 + $0x1274] ss:$8 sps:$4 sm:$0xff]  }
 0x376   :  { %7727 = vmatpush1.bf16.msra.mxu0 %v10081_v55  ;;  %7758 = vmatprep.mubr.bf16.mxu0 %v7563_v22  ;;  %v10144_v55 = vld [vmem:[#allocation3 + $0x13b0] ss:$8 sps:$4 sm:$0xff]   ;;  %v10150_v22 = vld [vmem:[#allocation3 + $0x13c0] ss:$8 sps:$4 sm:$0xff]  }
 0x377   :  { %7946 = vmatpush1.bf16.msra.mxu1 %v10084_v47  ;;  %7728 = vmatprep.subr.bf16.mxu0 %v10089_v34  ;;  %v10152_v47 = vld [vmem:[#allocation3 + $0x13c4] ss:$8 sps:$4 sm:$0xff]   ;;  %v10147_v34 = vld [vmem:[#allocation3 + $0x1270] ss:$8 sps:$4 sm:$0xff]  }
 0x378   :  { %7947 = vmatprep.subr.bf16.mxu1 %v10092_v61  ;;  %v10155_v61 = vld [vmem:[#allocation3 + $0x1284] ss:$8 sps:$4 sm:$0xff]  }
 0x37a   :  { %7729 = vmatpush1.bf16.msra.mxu0 %v10087_v25  ;;  %v10158_v25 = vld [vmem:[#allocation3 + $0x13d4] ss:$8 sps:$4 sm:$0xff]  }
 0x37b   :  { %7948 = vmatpush1.bf16.msra.mxu1 %v10090_v36  ;;  %7730 = vmatprep.subr.bf16.mxu0 %v10095_v51  ;;  %v10153_v36 = vld [vmem:[#allocation3 + $0x1280] ss:$8 sps:$4 sm:$0xff]   ;;  %v10156_v51 = vld [vmem:[#allocation3 + $0x13d0] ss:$8 sps:$4 sm:$0xff]  }
 0x37c   :  { %7949 = vmatprep.subr.bf16.mxu1 %v10098_v14  ;;  %v10161_v14 = vld [vmem:[#allocation3 + $0x1294] ss:$8 sps:$4 sm:$0xff]  }
 0x37e   :  { %7731 = vmatpush1.bf16.msra.mxu0 %v10093_v13  ;;  %v10164_v13 = vld [vmem:[#allocation3 + $0x13e4] ss:$8 sps:$4 sm:$0xff]  }
 0x37f   :  { %7950 = vmatpush1.bf16.msra.mxu1 %v10096_v9  ;;  %7732 = vmatprep.subr.bf16.mxu0 %v10101_v46  ;;  %v10159_v9 = vld [vmem:[#allocation3 + $0x1290] ss:$8 sps:$4 sm:$0xff]   ;;  %v10162_v46 = vld [vmem:[#allocation3 + $0x13e0] ss:$8 sps:$4 sm:$0xff]  }
 0x380   :  { %7951 = vmatprep.subr.bf16.mxu1 %v10104_v58  ;;  %v10167_v58 = vld [vmem:[#allocation3 + $0x12a4] ss:$8 sps:$4 sm:$0xff]  }
 0x382   :  { %7733 = vmatpush1.bf16.msra.mxu0 %v10099_v23  ;;  %v10170_v23 = vld [vmem:[#allocation3 + $0x13f4] ss:$8 sps:$4 sm:$0xff]  }
 0x383   :  { %7952 = vmatpush1.bf16.msra.mxu1 %v10102_v2  ;;  %7734 = vmatprep.subr.bf16.mxu0 %v10107_v44  ;;  %v10165_v2 = vld [vmem:[#allocation3 + $0x12a0] ss:$8 sps:$4 sm:$0xff]   ;;  %v10168_v44 = vld [vmem:[#allocation3 + $0x13f0] ss:$8 sps:$4 sm:$0xff]  }
 0x384   :  { %7953 = vmatprep.subr.bf16.mxu1 %v10110_v37  ;;  %v10173_v37 = vld [vmem:[#allocation3 + $0x12b4] ss:$8 sps:$4 sm:$0xff]  }
 0x385   :  { %v6241_v0 = vpop.f32.mrb[48].mxu1 }
 0x386   :  { %v6243_v53 = vpop.f32.mrb[49].mxu1  ;;  %7735 = vmatpush1.bf16.msra.mxu0 %v10105_v57  ;;  %v8061_v45 = vsel %vm7985_vm2, %v6241_v0, 0.0  ;;  %v10171_v57 = vld [vmem:[#allocation3 + $0x12b0] ss:$8 sps:$4 sm:$0xff]  }
 0x387   :  { %v6245_v8 = vpop.f32.mrb[50].mxu1  ;;  %7954 = vmatpush1.bf16.msra.mxu1 %v10108_v6  ;;  %7736 = vmatprep.subr.bf16.mxu0 %v10113_v56  ;;  %v8092_v41 = vsel %vm7985_vm2, %v6243_v53, 0.0  ;;  %v7779_v6 = vpack.c.b16 %v11871_v24, %v11871_v24  ;;  %v7562_v56 = vpack.c.b16 %v11877_v3, %v11877_v3 }
 0x388   :  { %v6024_v59 = vpop.f32.mrb[40].mxu0  ;;  %v6246_v16 = vpop.f32.mrb[51].mxu1  ;;  %7955 = vmatprep.subr.bf16.mxu1 %v10116_v60 }
 0x389   :  { %v8059_v15 = vsel %vm7985_vm2, %v6024_v59, 0.0  ;;  %v6026_v40 = vpop.f32.mrb[41].mxu0 }
 0x38a   :  { %v8060_v10 = vadd.f32 %v8059_v15, %v11981_v49  ;;  %v8090_v48 = vsel %vm7985_vm2, %v6026_v40, 0.0  ;;  %v6028_v1 = vpop.f32.mrb[42].mxu0  ;;  %7737 = vmatpush1.bf16.msra.mxu0 %v10111_v17 }
 0x38b   :  { %v8091_v7 = vadd.f32 %v8090_v48, %v11983_v12  ;;  %v6029_v54 = vpop.f32.mrb[43].mxu0  ;;  %7956 = vmatpush1.bf16.msra.mxu1 %v10114_v28  ;;  %7738 = vmatprep.subr.bf16.mxu0 %v10119_v43  ;;  %v10134_v12 = vld [vmem:[#allocation3 + $0x1394] ss:$8 sps:$4 sm:$0xff]  }
 0x38c   :  { %7957 = vmatprep.subr.bf16.mxu1 %v10122_v50  ;;  %v11999_v35 = vadd.f32 %v8061_v45, %v8060_v10 }
 0x38d   :  { %v12001_v49 = vadd.f32 %v8092_v41, %v8091_v7 }
 0x38e   :  { %7739 = vmatpush1.bf16.msra.mxu0 %v10117_v39 }
 0x38f   :  { %7958 = vmatpush1.bf16.msra.mxu1 %v10120_v31  ;;  %7740 = vmatprep.subr.bf16.mxu0 %v10125_v62 }
 0x390   :  { %7959 = vmatprep.subr.bf16.mxu1 %v10128_v52 }
 0x392   :  { %7741 = vmatpush1.bf16.msra.mxu0 %v10123_v42 }
 0x393   :  { %7960 = vmatpush1.bf16.msra.mxu1 %v10126_v19  ;;  %7742 = vmatprep.subr.bf16.mxu0 %v10131_v18 }
 0x394   :  { %7961 = vmatprep.subr.bf16.mxu1 %v10134_v12 }
 0x396   :  { %7743 = vmatpush1.bf16.msra.mxu0 %v10129_v27 }
 0x397   :  { %7962 = vmatpush1.bf16.msra.mxu1 %v10132_v30  ;;  %7744 = vmatprep.subr.bf16.mxu0 %v10137_v5  ;;  %v10279_v30 = vmov 0.0   ;;  %v10174_v5 = vld [vmem:[%s12099_s6 + $0x40] sm:$0xff]  }
 0x398   :  { %7963 = vmatprep.subr.bf16.mxu1 %v10140_v20  ;;  %61 = vst [vmem:[#allocation2] sm:$0xf] %v10279_v30  ;;  %v10175_v20 = vld [vmem:[%s12099_s6] sm:$0xff]  }
 0x39a   :  { %7745 = vmatpush1.bf16.msra.mxu0 %v10135_v26  ;;  %v10176_v26 = vld [vmem:[%s12099_s6 + $0x48] sm:$0xff]  }
 0x39b   :  { %7964 = vmatpush1.bf16.msra.mxu1 %v10138_v4  ;;  %7746 = vmatprep.subr.bf16.mxu0 %v10143_v38  ;;  %v10177_v4 = vld [vmem:[%s12099_s6 + $0x8] sm:$0xff]   ;;  %v10178_v38 = vld [vmem:[%s12099_s6 + $0x50] sm:$0xff]  }
 0x39c   :  { %7965 = vmatprep.subr.bf16.mxu1 %v10146_v29  ;;  %v10179_v29 = vld [vmem:[%s12099_s6 + $0x10] sm:$0xff]  }
 0x39e   :  { %7747 = vmatpush1.bf16.msra.mxu0 %v10141_v32  ;;  %v10180_v32 = vld [vmem:[%s12099_s6 + $0x58] sm:$0xff]  }
 0x39f   :  { %7966 = vmatpush1.bf16.msra.mxu1 %v10144_v55  ;;  %7748 = vmatprep.subr.bf16.mxu0 %v10149_v33  ;;  %v10181_v55 = vld [vmem:[%s12099_s6 + $0x18] sm:$0xff]   ;;  %v10182_v33 = vld [vmem:[%s12099_s6 + $0x60] sm:$0xff]  }
 0x3a0   :  { %7967 = vmatprep.subr.bf16.mxu1 %v10152_v47  ;;  %v10183_v47 = vld [vmem:[%s12099_s6 + $0x20] sm:$0xff]  }
 0x3a2   :  { %7749 = vmatpush1.bf16.msra.mxu0 %v10147_v34  ;;  %v10184_v34 = vld [vmem:[%s12099_s6 + $0x68] sm:$0xff]  }
 0x3a3   :  { %7968 = vmatpush1.bf16.msra.mxu1 %v10150_v22  ;;  %7750 = vmatprep.subr.bf16.mxu0 %v10155_v61  ;;  %v10185_v22 = vld [vmem:[%s12099_s6 + $0x28] sm:$0xff]   ;;  %v10186_v61 = vld [vmem:[%s12099_s6 + $0x70] sm:$0xff]  }
 0x3a4   :  { %7969 = vmatprep.subr.bf16.mxu1 %v10158_v25  ;;  %v10187_v25 = vld [vmem:[%s12099_s6 + $0x30] sm:$0xff]  }
 0x3a6   :  { %7751 = vmatpush1.bf16.msra.mxu0 %v10153_v36  ;;  %v10188_v36 = vld [vmem:[%s12099_s6 + $0x78] sm:$0xff]  }
 0x3a7   :  { %7970 = vmatpush1.bf16.msra.mxu1 %v10156_v51  ;;  %7752 = vmatprep.subr.bf16.mxu0 %v10161_v14  ;;  %v10189_v51 = vld [vmem:[%s12099_s6 + $0x38] sm:$0xff]  }
 0x3a8   :  { %7971 = vmatprep.subr.bf16.mxu1 %v10164_v13 }
 0x3aa   :  { %7753 = vmatpush1.bf16.msra.mxu0 %v10159_v9 }
 0x3ab   :  { %7972 = vmatpush1.bf16.msra.mxu1 %v10162_v46  ;;  %7754 = vmatprep.subr.bf16.mxu0 %v10167_v58 }
 0x3ac   :  { %7973 = vmatprep.subr.bf16.mxu1 %v10170_v23 }
 0x3ae   :  { %7755 = vmatpush1.bf16.msra.mxu0 %v10165_v2 }
 0x3af   :  { %7974 = vmatpush1.bf16.msra.mxu1 %v10168_v44  ;;  %7756 = vmatprep.subr.bf16.mxu0 %v10173_v37 }
 0x3b2   :  { %7757 = vmatpush1.bf16.msra.mxu0 %v10171_v57  ;;  %7976 = vmatmul.mubr.bf16.vlgmr.msra.gmra.mrb[64].mxu1 %v7779_v6 }
 0x3b3   :  { %9124 = vmatprep.subr.bf16.mxu0 %v10174_v5 }
 0x3b5   :  { %7759 = vmatmul.mubr.bf16.vlgmr.msra.gmra.mrb[56].mxu0 %v7562_v56 }
 0x3b6   :  { %9125 = vmatpush3.bf16.msra.mxu0 %v10175_v20 }
 0x3b7   :  { %9126 = vmatprep.subr.bf16.mxu0 %v10176_v26 }
 0x3ba   :  { %9127 = vmatpush3.bf16.msra.mxu0 %v10177_v4 }
 0x3bb   :  { %9128 = vmatprep.subr.bf16.mxu0 %v10178_v38 }
 0x3be   :  { %9129 = vmatpush3.bf16.msra.mxu0 %v10179_v29 }
 0x3bf   :  { %9130 = vmatprep.subr.bf16.mxu0 %v10180_v32 }
 0x3c2   :  { %9131 = vmatpush3.bf16.msra.mxu0 %v10181_v55 }
 0x3c3   :  { %9132 = vmatprep.subr.bf16.mxu0 %v10182_v33 }
 0x3c5   :  { %v6675_v60 = vpop.f32.mrb[52].mxu1 }
 0x3c6   :  { %v6677_v0 = vpop.f32.mrb[53].mxu1  ;;  %v8065_v24 = vsel %vm7985_vm2, %v6675_v60, 0.0  ;;  %9133 = vmatpush3.bf16.msra.mxu0 %v10183_v47 }
 0x3c7   :  { %v6679_v53 = vpop.f32.mrb[54].mxu1  ;;  %v8096_v3 = vsel %vm7985_vm2, %v6677_v0, 0.0  ;;  %9134 = vmatprep.subr.bf16.mxu0 %v10184_v34  ;;  %v9107_v34 = vld [vmem:[%s12100_s7] ss:$0 sm:$0xff] }
 0x3c8   :  { %v6458_v17 = vpop.f32.mrb[44].mxu0  ;;  %v6680_v8 = vpop.f32.mrb[55].mxu1 }
 0x3c9   :  { %v8063_v28 = vsel %vm7985_vm2, %v6458_v17, 0.0  ;;  %v6460_v43 = vpop.f32.mrb[45].mxu0 }
 0x3ca   :  { %v8064_v59 = vadd.f32 %v8063_v28, %v11999_v35  ;;  %v8094_v16 = vsel %vm7985_vm2, %v6460_v43, 0.0  ;;  %v6462_v50 = vpop.f32.mrb[46].mxu0  ;;  %9135 = vmatpush3.bf16.msra.mxu0 %v10185_v22 }
 0x3cb   :  { %v8095_v15 = vadd.f32 %v8094_v16, %v12001_v49  ;;  %v6463_v40 = vpop.f32.mrb[47].mxu0  ;;  %9136 = vmatprep.subr.bf16.mxu0 %v10186_v61 }
 0x3cc   :  { %v8066_v10 = vadd.f32 %v8065_v24, %v8064_v59  ;;  %v10280_v59 = vmov 1983009808  }
 0x3cd   :  { %v8097_v48 = vadd.f32 %v8096_v3, %v8095_v15  ;;  %v8116_v16 = vunpack.c.l.s4 %v10280_v59 }
 0x3ce   :  { %9137 = vmatpush3.bf16.msra.mxu0 %v10187_v25 }
 0x3cf   :  { %9138 = vmatprep.subr.bf16.mxu0 %v10188_v36 }
 0x3d2   :  { %9139 = vmatpush3.bf16.msra.mxu0 %v10189_v51 }
 0x405   :  { %v7109_v1 = vpop.f32.mrb[56].mxu1 }
 0x406   :  { %v7111_v39 = vpop.f32.mrb[57].mxu1  ;;  %v8069_v42 = vsel %vm7985_vm2, %v7109_v1, 0.0 }
 0x407   :  { %v7113_v45 = vpop.f32.mrb[58].mxu1  ;;  %v8100_v18 = vsel %vm7985_vm2, %v7111_v39, 0.0 }
 0x408   :  { %v6892_v7 = vpop.f32.mrb[48].mxu0  ;;  %v7114_v54 = vpop.f32.mrb[59].mxu1  ;;  %v8117_v45 = vunpack.c.0.s8 %v8116_v16 }
 0x409   :  { %v8067_v31 = vsel %vm7985_vm2, %v6892_v7, 0.0  ;;  %v6894_v62 = vpop.f32.mrb[49].mxu0 }
 0x40a   :  { %v8068_v41 = vadd.f32 %v8067_v31, %v8066_v10  ;;  %v8098_v52 = vsel %vm7985_vm2, %v6894_v62, 0.0  ;;  %v6896_v35 = vpop.f32.mrb[50].mxu0 }
 0x40b   :  { %v8099_v49 = vadd.f32 %v8098_v52, %v8097_v48  ;;  %v6897_v19 = vpop.f32.mrb[51].mxu0  ;;  %v12223_v35 = vld [vmem:[#allocation12_spill] sm:$0xff] }
 0x40c   :  { %v8070_v12 = vadd.f32 %v8069_v42, %v8068_v41  ;;  %v8120_v42 = vsub.s32 %v8117_v45, %v12223_v35  ;;  %v8129_v19 = vld [vmem:[#allocation6] sm:$0x3] }
 0x40d   :  { %v8101_v27 = vadd.f32 %v8100_v18, %v8099_v49  ;;  %v8137_v49 = vsub.s32 1, %v12223_v35  ;;  %v8134_v30 = vrot.slane %v8129_v19, %v10368_v11 }
 0x40f   :  { %v8138_v5 = vrot.slane %v8129_v19, %v8137_v49 }
 0x411   :  { %v8139_v26 = vcombine.low %v8134_v30, %v8138_v5 }
 0x413   :  { %v8146_v4 = vrot.slane %v8139_v26, %v8120_v42 }
 0x445   :  { %v7543_v14 = vpop.f32.mrb[60].mxu1 }
 0x446   :  { %v7545_v13 = vpop.f32.mrb[61].mxu1  ;;  %v8073_v6 = vsel %vm7985_vm2, %v7543_v14, 0.0 }
 0x447   :  { %v7547_v9 = vpop.f32.mrb[62].mxu1  ;;  %v8104_v0 = vsel %vm7985_vm2, %v7545_v13, 0.0 }
 0x448   :  { %v7326_v46 = vpop.f32.mrb[52].mxu0  ;;  %v7548_v58 = vpop.f32.mrb[63].mxu1 }
 0x449   :  { %v8071_v23 = vsel %vm7985_vm2, %v7326_v46, 0.0  ;;  %v7328_v2 = vpop.f32.mrb[53].mxu0 }
 0x44a   :  { %v8072_v44 = vadd.f32 %v8071_v23, %v8070_v12  ;;  %v8102_v37 = vsel %vm7985_vm2, %v7328_v2, 0.0  ;;  %v7330_v57 = vpop.f32.mrb[54].mxu0  ;;  %v7984_v12 = vld [vmem:[#allocation2] sm:$0xf] }
 0x44b   :  { %v8103_v56 = vadd.f32 %v8102_v37, %v8101_v27  ;;  %v7331_v60 = vpop.f32.mrb[55].mxu0 }
 0x44c   :  { %v8074_v53 = vadd.f32 %v8073_v6, %v8072_v44 }
 0x44d   :  { %v8105_v17 = vadd.f32 %v8104_v0, %v8103_v56 }
 0x485   :  { %v7977_v8 = vpop.f32.mrb[64].mxu1 }
 0x486   :  { %v7979_v28 = vpop.f32.mrb[65].mxu1  ;;  %v8077_v1 = vsel %vm7985_vm2, %v7977_v8, 0.0 }
 0x487   :  { %v7981_v43 = vpop.f32.mrb[66].mxu1  ;;  %v8108_v54 = vsel %vm7985_vm2, %v7979_v28, 0.0 }
 0x488   :  { %v7760_v50 = vpop.f32.mrb[56].mxu0  ;;  %v7982_v24 = vpop.f32.mrb[67].mxu1 }
 0x489   :  { %v8075_v15 = vsel %vm7985_vm2, %v7760_v50, 0.0  ;;  %v7762_v40 = vpop.f32.mrb[57].mxu0 }
 0x48a   :  { %v8076_v3 = vadd.f32 %v8075_v15, %v8074_v53  ;;  %v8106_v10 = vsel %vm7985_vm2, %v7762_v40, 0.0  ;;  %v7764_v48 = vpop.f32.mrb[58].mxu0 }
 0x48b   :  { %v8107_v39 = vadd.f32 %v8106_v10, %v8105_v17  ;;  %v7765_v7 = vpop.f32.mrb[59].mxu0 }
 0x48c   :  { %v8078_v31 = vadd.f32 %v8077_v1, %v8076_v3 }
 0x48d   :  { %v8109_v62 = vadd.f32 %v8108_v54, %v8107_v39 }
 0x48e   :  { %v8110_v41 = vadd.f32 %v8078_v31, %v11929_v63 }
 0x48f   :  { %v8111_v52 = vadd.f32 %v8109_v62, %v11931_v21 }
 0x491   :  { %v8114_v18 = vcombine.low %v8110_v41, %v8111_v52 }
 0x493   :  { %v8121_v27 = vrot.slane %v8114_v18, %v8120_v42 }
 0x495   :  { %v8123_v20 = vadd.f32 %v8121_v27, %v7984_v12 }
 0x497   :  { %8124 = vst [vmem:[#allocation2] sm:$0xf] %v8123_v20 }
 0x49e   :  { %v8128_v38 = vld [vmem:[#allocation2] sm:$0xf] }
 0x49f   :  { %v8148_v29 = vadd.f32 %v8146_v4, %v8128_v38 }
 0x4a1   :  { %v8149_v63 = vmax.f32 %v8148_v29, 0.0 }
 0x4a3   :  { %v8157_v32 = vrot.slane %v8149_v63, %v8120_v42 }
 0x4a5   :  { %v8158_v21 = vcombine.high %v8157_v32, %v8157_v32  ;;  %v8161_v33 = vpack.c.bf16 %v8157_v32, %v8157_v32 }
 0x4a7   :  { %v8162_v55 = vpack.c.bf16 %v8158_v21, %v8158_v21 }
 0x4a9   :  { %8330 = vmatprep.mubr.bf16.mxu0 %v8162_v55 }
 0x4aa   :  { %8331 = vmatmul.mubr.bf16.vlgmr.msra.gmra.mrb[60].mxu0 %v8161_v33 }
 0x57d   :  { %v9140_v47 = vpop.f32.mrb[60].mxu0 }
 0x57e   :  { %v9141_v11 = vpop.f32.mrb[61].mxu0 }
 0x57f   :  { %v9142_v22 = vadd.f32 %v9141_v11, %v9140_v47  ;;  %v9143_v61 = vpop.f32.mrb[62].mxu0 }
 0x580   :  { %v9144_v25 = vpop.f32.mrb[63].mxu0 }
 0x581   :  { %v8333_v36 = vadd.f32 %v9142_v22, %v9107_v34 }
 0x583   :  { %8338 = vst [vmem:[#allocation8] sm:$0x3] %v8333_v36 }
 0x584   :  { %10253 = shalt.err (!%p10250_p6)
}
 0x585   :  { %s10254_s7 = scalar_lea.hbm %s12101_s8, 32 }
 0x586   :  { %p10255_p7 = scmp.ne.s32.totalorder %s12101_s8, %s10254_s7  ;;  %p10258_p8 = scmp.lt.u32.totalorder %s10254_s7, %s12101_s8 }
 0x588   :  { %p10260_p9 = pnand %p10258_p8, %p10255_p7 }
 0x58a   :  { %10263 = shalt.err (!%p10260_p9)
}
 0x58b   :  { %8348 = dma.vmem_to_hbm [thread:$0]  %s8346_s15, 32, %s12101_s8, [#allocation5]  }
 0x58c   :  { %10268 = dma.done.wait [#allocation5], 32  }
 0x58d   :  { %10269 = vsyncadd [#allocation5], 4294967264 }
 0x58e   :  { %8352 = vsyncpa [#allocation4], 1 }
 0x58f   :  { %8353 = vsyncpa [#allocation7], 1 }
 0x590   :  { %8354 = vsyncpa [#allocation5], 1 }

</bundles_post_ra>
